<compile_context>
chip_gen: v6e
topology: v6e:2x2x1
jax: 0.10.0
libtpu: 0.0.40
codegen_flags: <defaults>
</compile_context>

<pallas_src>
import functools

import jax
import jax.numpy as jnp
from jax.experimental import pallas as pl
from jax.experimental.pallas import tpu as pltpu

BN_EPS = 1e-5
_PAD_W = 16   # aligned left margin of the padded VMEM images (multiple of the bf16 sublane tile)


def _make_fused_residual_kernel(KH, KW, stride, H, W, Cin, Cout, Ho, Wo, has_id_conv):
    """Fused conv1(+BN+ReLU) -> conv2(+BN) -> + identity -> ReLU for one batch element."""

    def im2col(img, C, s):
        # `img` is a zero-padded image whose 1-pixel "same"-padding ring starts at row 0 /
        # col (_PAD_W - 1) of the VMEM scratch.  Returns the (Ho*Wo, KH*KW*C) slab whose column
        # order matches a row-major (KH, KW, C, Cout) -> (KH*KW*C, Cout) weight reshape.
        patches = []
        for kh in range(KH):
            for kw in range(KW):
                patch = jax.lax.slice(
                    img,
                    (kh, _PAD_W - 1 + kw, 0),
                    (kh + s * (Ho - 1) + 1, _PAD_W - 1 + kw + s * (Wo - 1) + 1, C),
                    (s, s, 1),
                )                                   # (Ho, Wo, C)
                patches.append(patch)
        slab = jnp.concatenate(patches, axis=-1)    # (Ho, Wo, KH*KW*C)
        return slab.reshape(Ho * Wo, KH * KW * C)

    def kernel(*refs):
        if has_id_conv:
            (x_ref, w1_ref, b1_ref, w2_ref, b2_ref, wi_ref, bi_ref,
             o_ref, xp_ref, yp_ref) = refs
        else:
            x_ref, w1_ref, b1_ref, w2_ref, b2_ref, o_ref, xp_ref, yp_ref = refs

        x = x_ref[0]                                 # (H, W, Cin), bf16

        # ---- conv1: 3x3, stride, pad 1, folded-BN bias, ReLU -------------------------------
        xp_ref[...] = jnp.zeros_like(xp_ref)         # zero ring for "same" padding
        xp_ref[1:H + 1, _PAD_W:_PAD_W + W, :] = x    # aligned interior store (offset % 16 == 0)
        slab1 = im2col(xp_ref[...], Cin, stride)     # (Ho*Wo, KH*KW*Cin) bf16
        y1 = jnp.dot(slab1, w1_ref[...], preferred_element_type=jnp.float32)
        y1 = jnp.maximum(y1 + b1_ref[...], 0.0)      # f32 epilogue (v5e-friendly)

        # ---- identity path -----------------------------------------------------------------
        if has_id_conv:
            xs = jax.lax.slice(
                x, (0, 0, 0),
                (stride * (Ho - 1) + 1, stride * (Wo - 1) + 1, Cin),
                (stride, stride, 1)).reshape(Ho * Wo, Cin)
            ident = (jnp.dot(xs, wi_ref[...], preferred_element_type=jnp.float32)
                     + bi_ref[...])
        else:
            # Mirrors PyTorch: nn.Identity() whenever cin == cout (stride != 1 with cin == cout
            # would shape-mismatch in the original module as well).
            ident = x.reshape(Ho * Wo, Cout).astype(jnp.float32)

        # ---- conv2: 3x3, stride 1, pad 1, folded-BN bias + residual add + final ReLU --------
        yp_ref[...] = jnp.zeros_like(yp_ref)
        yp_ref[1:Ho + 1, _PAD_W:_PAD_W + Wo, :] = (
            y1.reshape(Ho, Wo, Cout).astype(jnp.bfloat16))
        slab2 = im2col(yp_ref[...], Cout, 1)         # (Ho*Wo, KH*KW*Cout) bf16
        y2 = jnp.dot(slab2, w2_ref[...], preferred_element_type=jnp.float32) + b2_ref[...]
        out = jnp.maximum(y2 + ident, 0.0)           # (Ho*Wo, Cout) f32

        # NOTE: with tiny Cout the final store is lane-sparse (Cout of 128 lanes).  After full
        # fusion it is a negligible fraction of this kernel; for store-bound shapes pad Cout
        # toward 128 or emit a (Ho, Wo*Cout) lane-dense output layout instead.
        o_ref[0] = out.reshape(Ho, Wo, Cout).astype(o_ref.dtype)

    return kernel


def residual_block_pallas(x_nchw, params, stride=1):
    """Forward pass of ResidualBlock. Input/output in PyTorch NCHW layout (f32)."""
    (w1, b1), (w2, b2), id_params = params
    N, Cin, H, W = x_nchw.shape
    KH, KW, _, Cout = w1.shape
    Ho = (H + 2 - KH) // stride + 1                  # conv1: padding = 1
    Wo = (W + 2 - KW) // stride + 1
    has_id_conv = id_params is not None

    # NCHW -> NHWC once at the block boundary, fused with the bf16 cast (halves activation DMA).
    x = jnp.transpose(x_nchw, (0, 2, 3, 1)).astype(jnp.bfloat16)

    # Weights: BN scale already folded in; flatten (KH,KW,C,Cout) -> (KH*KW*C, Cout) to match the
    # im2col column order, cast to bf16 for the MXU.  Biases stay f32.
    w1_flat = w1.reshape(KH * KW * Cin, Cout).astype(jnp.bfloat16)
    w2_flat = w2.reshape(KH * KW * Cout, Cout).astype(jnp.bfloat16)
    b1_2d = b1.reshape(1, Cout).astype(jnp.float32)
    b2_2d = b2.reshape(1, Cout).astype(jnp.float32)

    args = [x, w1_flat, b1_2d, w2_flat, b2_2d]
    in_specs = [
        pl.BlockSpec((1, H, W, Cin), lambda n: (n, 0, 0, 0)),
        pl.BlockSpec((KH * KW * Cin, Cout), lambda n: (0, 0)),
        pl.BlockSpec((1, Cout), lambda n: (0, 0)),
        pl.BlockSpec((KH * KW * Cout, Cout), lambda n: (0, 0)),
        pl.BlockSpec((1, Cout), lambda n: (0, 0)),
    ]
    if has_id_conv:
        wi, bi = id_params
        args += [wi.reshape(Cin, Cout).astype(jnp.bfloat16),
                 bi.reshape(1, Cout).astype(jnp.float32)]
        in_specs += [pl.BlockSpec((Cin, Cout), lambda n: (0, 0)),
                     pl.BlockSpec((1, Cout), lambda n: (0, 0))]

    kernel = _make_fused_residual_kernel(KH, KW, stride, H, W, Cin, Cout, Ho, Wo, has_id_conv)

    # TODO(synk): for production image sizes add an Ho-tile grid axis with a halo in the
    # index_map and set vmem_limit_bytes explicitly (v7x only has 64 MiB physical VMEM);
    # whole-image blocks are fine at these shapes.
    out_nhwc = pl.pallas_call(
        kernel,
        out_shape=jax.ShapeDtypeStruct((N, Ho, Wo, Cout), jnp.float32),
        grid=(N,),
        in_specs=in_specs,
        out_specs=pl.BlockSpec((1, Ho, Wo, Cout), lambda n: (n, 0, 0, 0)),
        scratch_shapes=[
            pltpu.VMEM((H + 2, W + 2 * _PAD_W, Cin), jnp.bfloat16),     # padded x image
            pltpu.VMEM((Ho + 2, Wo + 2 * _PAD_W, Cout), jnp.bfloat16),  # padded y1 image
        ],
        compiler_params=pltpu.CompilerParams(dimension_semantics=("parallel",)),
    )(*args)

    return jnp.transpose(out_nhwc, (0, 3, 1, 2))     # NHWC -> NCHW


def init_conv_block_params(key, cin, cout, ksize):
    """Deterministic synthetic params for Conv2d(cin, cout, ksize) + BatchNorm2d(cout), with the
    inference-mode BN scale folded into the conv weight (HWIO) and the bias folded separately."""
    k1, k2, k3, k4, k5, k6 = jax.random.split(key, 6)
    w_oihw = 0.1 * jax.random.normal(k1, (cout, cin, ksize, ksize), jnp.float32)
    conv_b = 0.1 * jax.random.normal(k2, (cout,), jnp.float32)
    gamma = 1.0 + 0.1 * jax.random.normal(k3, (cout,), jnp.float32)
    beta = 0.1 * jax.random.normal(k4, (cout,), jnp.float32)
    r_mean = 0.1 * jax.random.normal(k5, (cout,), jnp.float32)
    r_var = 0.5 + jax.random.uniform(k6, (cout,), jnp.float32)

    w_hwio = jnp.transpose(w_oihw, (2, 3, 1, 0))     # OIHW -> HWIO
    eff_scale = gamma / jnp.sqrt(r_var + BN_EPS)
    eff_bias = beta + (conv_b - r_mean) * eff_scale
    w_folded = w_hwio * eff_scale                    # fold BN scale into the conv weight
    return w_folded, eff_bias


# ---------------------------------------------------------------------------
# Pure-JAX reference with the same numerics (bf16 MXU operands, f32 accumulation).
# ---------------------------------------------------------------------------
def _ref_conv_bias(x_bf16, w_folded, bias, stride, padding):
    out = jax.lax.conv_general_dilated(
        x_bf16, w_folded.astype(jnp.bfloat16),
        window_strides=(stride, stride),
        padding=[(padding, padding), (padding, padding)],
        dimension_numbers=("NHWC", "HWIO", "NHWC"),
        preferred_element_type=jnp.float32)
    return out + bias


def residual_block_ref(x_nchw, params, stride=1):
    (w1, b1), (w2, b2), id_params = params
    x = jnp.transpose(x_nchw, (0, 2, 3, 1)).astype(jnp.bfloat16)
    y1 = jnp.maximum(_ref_conv_bias(x, w1, b1, stride, 1), 0.0)
    if id_params is not None:
        wi, bi = id_params
        identity = _ref_conv_bias(x, wi, bi, stride, 0)
    else:
        identity = x.astype(jnp.float32)
    out = jnp.maximum(
        _ref_conv_bias(y1.astype(jnp.bfloat16), w2, b2, 1, 1) + identity, 0.0)
    return jnp.transpose(out, (0, 3, 1, 2))


if __name__ == "__main__":
    key = jax.random.PRNGKey(0)
    kx, kp1, kp2, kp3 = jax.random.split(key, 4)

    N, C_IN, C_OUT, H, W = 2, 4, 8, 16, 16
    STRIDE = 1

    x = jax.random.normal(kx, (N, C_IN, H, W), jnp.float32)   # PyTorch NCHW input

    params = (
        init_conv_block_params(kp1, C_IN, C_OUT, 3),                             # conv1
        init_conv_block_params(kp2, C_OUT, C_OUT, 3),                            # conv2
        init_conv_block_params(kp3, C_IN, C_OUT, 1) if C_IN != C_OUT else None,  # identity_reshape
    )

    fwd = jax.jit(functools.partial(residual_block_pallas, stride=STRIDE))
    out = jax.block_until_ready(fwd(x, params))

    ref = residual_block_ref(x, params, stride=STRIDE)
    assert out.shape == (N, C_OUT, H // STRIDE, W // STRIDE), out.shape
    max_err = float(jnp.max(jnp.abs(out - ref)))
    assert jnp.allclose(out, ref, atol=1e-3, rtol=1e-3), max_err

    print("KERNEL_OK")
</pallas_src>

<mosaic_0001>
module attributes {stable_mosaic.version = 11 : i64} {
  func.func @kernel(%arg0: i32, %arg1: memref<1x16x16x4xbf16, #tpu.memory_space<vmem>>, %arg2: memref<36x8xbf16, #tpu.memory_space<vmem>>, %arg3: memref<1x8xf32, #tpu.memory_space<vmem>>, %arg4: memref<72x8xbf16, #tpu.memory_space<vmem>>, %arg5: memref<1x8xf32, #tpu.memory_space<vmem>>, %arg6: memref<4x8xbf16, #tpu.memory_space<vmem>>, %arg7: memref<1x8xf32, #tpu.memory_space<vmem>>, %arg8: memref<1x16x16x8xf32, #tpu.memory_space<vmem>>, %arg9: memref<18x48x4xbf16, #tpu.memory_space<vmem>>, %arg10: memref<18x48x8xbf16, #tpu.memory_space<vmem>>) attributes {dimension_semantics = [#tpu.dimension_semantics<parallel>], iteration_bounds = array<i64: 2>, scalar_prefetch = 0 : i64, scratch_operands = 2 : i64, tpu.core_type = #tpu.core_type<tc>, window_params = [{transform_indices = @transform_0, window_bounds = array<i64: 1, 16, 16, 4>}, {pipeline_mode = #tpu.pipeline_mode<synchronous>, transform_indices = @transform_1, window_bounds = array<i64: 36, 8>}, {pipeline_mode = #tpu.pipeline_mode<synchronous>, transform_indices = @transform_2, window_bounds = array<i64: 1, 8>}, {pipeline_mode = #tpu.pipeline_mode<synchronous>, transform_indices = @transform_3, window_bounds = array<i64: 72, 8>}, {pipeline_mode = #tpu.pipeline_mode<synchronous>, transform_indices = @transform_4, window_bounds = array<i64: 1, 8>}, {pipeline_mode = #tpu.pipeline_mode<synchronous>, transform_indices = @transform_5, window_bounds = array<i64: 4, 8>}, {pipeline_mode = #tpu.pipeline_mode<synchronous>, transform_indices = @transform_6, window_bounds = array<i64: 1, 8>}, {transform_indices = @transform_7, window_bounds = array<i64: 1, 16, 16, 8>}]} {
    %c0 = arith.constant 0 : index
    %c0_0 = arith.constant 0 : index
    %c0_1 = arith.constant 0 : index
    %c0_2 = arith.constant 0 : index
    %0 = vector.load %arg1[%c0, %c0_0, %c0_1, %c0_2] : memref<1x16x16x4xbf16, #tpu.memory_space<vmem>>, vector<1x16x16x4xbf16>
    %1 = vector.shape_cast %0 : vector<1x16x16x4xbf16> to vector<16x16x4xbf16>
    %cst = arith.constant 0.000000e+00 : bf16
    %2 = vector.broadcast %cst : bf16 to vector<18x48x4xbf16>
    %c0_3 = arith.constant 0 : index
    %c0_4 = arith.constant 0 : index
    %c0_5 = arith.constant 0 : index
    %3 = vector.load %arg9[%c0_3, %c0_4, %c0_5] : memref<18x48x4xbf16, #tpu.memory_space<vmem>>, vector<18x48x4xbf16>
    tpu.vector_store %arg9[%c0_3, %c0_4, %c0_5], %2 {strides = array<i32>} : memref<18x48x4xbf16, #tpu.memory_space<vmem>>, vector<18x48x4xbf16>,
    %c1 = arith.constant 1 : index
    %c16 = arith.constant 16 : index
    %c0_6 = arith.constant 0 : index
    %4 = vector.load %arg9[%c1, %c16, %c0_6] : memref<18x48x4xbf16, #tpu.memory_space<vmem>>, vector<16x16x4xbf16>
    tpu.vector_store %arg9[%c1, %c16, %c0_6], %1 {strides = array<i32>} : memref<18x48x4xbf16, #tpu.memory_space<vmem>>, vector<16x16x4xbf16>,
    %c0_7 = arith.constant 0 : index
    %c0_8 = arith.constant 0 : index
    %c0_9 = arith.constant 0 : index
    %5 = vector.load %arg9[%c0_7, %c0_8, %c0_9] : memref<18x48x4xbf16, #tpu.memory_space<vmem>>, vector<18x48x4xbf16>
    %6 = vector.extract_strided_slice %5 {offsets = [0, 15, 0], sizes = [16, 16, 4], strides = [1, 1, 1]} : vector<18x48x4xbf16> to vector<16x16x4xbf16>
    %7 = vector.extract_strided_slice %5 {offsets = [0, 16, 0], sizes = [16, 16, 4], strides = [1, 1, 1]} : vector<18x48x4xbf16> to vector<16x16x4xbf16>
    %8 = vector.extract_strided_slice %5 {offsets = [0, 17, 0], sizes = [16, 16, 4], strides = [1, 1, 1]} : vector<18x48x4xbf16> to vector<16x16x4xbf16>
    %9 = vector.extract_strided_slice %5 {offsets = [1, 15, 0], sizes = [16, 16, 4], strides = [1, 1, 1]} : vector<18x48x4xbf16> to vector<16x16x4xbf16>
    %10 = vector.extract_strided_slice %5 {offsets = [1, 16, 0], sizes = [16, 16, 4], strides = [1, 1, 1]} : vector<18x48x4xbf16> to vector<16x16x4xbf16>
    %11 = vector.extract_strided_slice %5 {offsets = [1, 17, 0], sizes = [16, 16, 4], strides = [1, 1, 1]} : vector<18x48x4xbf16> to vector<16x16x4xbf16>
    %12 = vector.extract_strided_slice %5 {offsets = [2, 15, 0], sizes = [16, 16, 4], strides = [1, 1, 1]} : vector<18x48x4xbf16> to vector<16x16x4xbf16>
    %13 = vector.extract_strided_slice %5 {offsets = [2, 16, 0], sizes = [16, 16, 4], strides = [1, 1, 1]} : vector<18x48x4xbf16> to vector<16x16x4xbf16>
    %14 = vector.extract_strided_slice %5 {offsets = [2, 17, 0], sizes = [16, 16, 4], strides = [1, 1, 1]} : vector<18x48x4xbf16> to vector<16x16x4xbf16>
    %15 = tpu.concatenate %6, %7, %8, %9, %10, %11, %12, %13, %14 in 2 : vector<16x16x4xbf16>, vector<16x16x4xbf16>, vector<16x16x4xbf16>, vector<16x16x4xbf16>, vector<16x16x4xbf16>, vector<16x16x4xbf16>, vector<16x16x4xbf16>, vector<16x16x4xbf16>, vector<16x16x4xbf16> -> vector<16x16x36xbf16>
    %16 = vector.shape_cast %15 : vector<16x16x36xbf16> to vector<256x36xbf16>
    %c0_10 = arith.constant 0 : index
    %c0_11 = arith.constant 0 : index
    %17 = vector.load %arg2[%c0_10, %c0_11] : memref<36x8xbf16, #tpu.memory_space<vmem>>, vector<36x8xbf16>
    %cst_12 = arith.constant dense<0.000000e+00> : vector<256x8xf32>
    %18 = tpu.matmul %16, %17, %cst_12 {dimension_numbers = #tpu.dot_dimension_numbers<[1], [0], [0], [1], [0, 0, 1, 1], [], []>} : vector<256x36xbf16>, vector<36x8xbf16>, vector<256x8xf32> -> vector<256x8xf32>
    %c0_13 = arith.constant 0 : index
    %c0_14 = arith.constant 0 : index
    %19 = vector.load %arg3[%c0_13, %c0_14] : memref<1x8xf32, #tpu.memory_space<vmem>>, vector<1x8xf32>
    %20 = vector.broadcast %19 : vector<1x8xf32> to vector<256x8xf32>
    %21 = arith.addf %18, %20 : vector<256x8xf32>
    %cst_15 = arith.constant 0.000000e+00 : f32
    %22 = vector.broadcast %cst_15 : f32 to vector<256x8xf32>
    %23 = arith.maximumf %21, %22 : vector<256x8xf32>
    %24 = vector.extract_strided_slice %1 {offsets = [0, 0, 0], sizes = [16, 16, 4], strides = [1, 1, 1]} : vector<16x16x4xbf16> to vector<16x16x4xbf16>
    %25 = vector.shape_cast %24 : vector<16x16x4xbf16> to vector<256x4xbf16>
    %c0_16 = arith.constant 0 : index
    %c0_17 = arith.constant 0 : index
    %26 = vector.load %arg6[%c0_16, %c0_17] : memref<4x8xbf16, #tpu.memory_space<vmem>>, vector<4x8xbf16>
    %cst_18 = arith.constant dense<0.000000e+00> : vector<256x8xf32>
    %27 = tpu.matmul %25, %26, %cst_18 {dimension_numbers = #tpu.dot_dimension_numbers<[1], [0], [0], [1], [0, 0, 1, 1], [], []>} : vector<256x4xbf16>, vector<4x8xbf16>, vector<256x8xf32> -> vector<256x8xf32>
    %c0_19 = arith.constant 0 : index
    %c0_20 = arith.constant 0 : index
    %28 = vector.load %arg7[%c0_19, %c0_20] : memref<1x8xf32, #tpu.memory_space<vmem>>, vector<1x8xf32>
    %29 = vector.broadcast %28 : vector<1x8xf32> to vector<256x8xf32>
    %30 = arith.addf %27, %29 : vector<256x8xf32>
    %cst_21 = arith.constant 0.000000e+00 : bf16
    %31 = vector.broadcast %cst_21 : bf16 to vector<18x48x8xbf16>
    %c0_22 = arith.constant 0 : index
    %c0_23 = arith.constant 0 : index
    %c0_24 = arith.constant 0 : index
    %32 = vector.load %arg10[%c0_22, %c0_23, %c0_24] : memref<18x48x8xbf16, #tpu.memory_space<vmem>>, vector<18x48x8xbf16>
    tpu.vector_store %arg10[%c0_22, %c0_23, %c0_24], %31 {strides = array<i32>} : memref<18x48x8xbf16, #tpu.memory_space<vmem>>, vector<18x48x8xbf16>,
    %33 = vector.shape_cast %23 : vector<256x8xf32> to vector<16x16x8xf32>
    %34 = arith.truncf %33 : vector<16x16x8xf32> to vector<16x16x8xbf16>
    %c1_25 = arith.constant 1 : index
    %c16_26 = arith.constant 16 : index
    %c0_27 = arith.constant 0 : index
    %35 = vector.load %arg10[%c1_25, %c16_26, %c0_27] : memref<18x48x8xbf16, #tpu.memory_space<vmem>>, vector<16x16x8xbf16>
    tpu.vector_store %arg10[%c1_25, %c16_26, %c0_27], %34 {strides = array<i32>} : memref<18x48x8xbf16, #tpu.memory_space<vmem>>, vector<16x16x8xbf16>,
    %c0_28 = arith.constant 0 : index
    %c0_29 = arith.constant 0 : index
    %c0_30 = arith.constant 0 : index
    %36 = vector.load %arg10[%c0_28, %c0_29, %c0_30] : memref<18x48x8xbf16, #tpu.memory_space<vmem>>, vector<18x48x8xbf16>
    %37 = vector.extract_strided_slice %36 {offsets = [0, 15, 0], sizes = [16, 16, 8], strides = [1, 1, 1]} : vector<18x48x8xbf16> to vector<16x16x8xbf16>
    %38 = vector.extract_strided_slice %36 {offsets = [0, 16, 0], sizes = [16, 16, 8], strides = [1, 1, 1]} : vector<18x48x8xbf16> to vector<16x16x8xbf16>
    %39 = vector.extract_strided_slice %36 {offsets = [0, 17, 0], sizes = [16, 16, 8], strides = [1, 1, 1]} : vector<18x48x8xbf16> to vector<16x16x8xbf16>
    %40 = vector.extract_strided_slice %36 {offsets = [1, 15, 0], sizes = [16, 16, 8], strides = [1, 1, 1]} : vector<18x48x8xbf16> to vector<16x16x8xbf16>
    %41 = vector.extract_strided_slice %36 {offsets = [1, 16, 0], sizes = [16, 16, 8], strides = [1, 1, 1]} : vector<18x48x8xbf16> to vector<16x16x8xbf16>
    %42 = vector.extract_strided_slice %36 {offsets = [1, 17, 0], sizes = [16, 16, 8], strides = [1, 1, 1]} : vector<18x48x8xbf16> to vector<16x16x8xbf16>
    %43 = vector.extract_strided_slice %36 {offsets = [2, 15, 0], sizes = [16, 16, 8], strides = [1, 1, 1]} : vector<18x48x8xbf16> to vector<16x16x8xbf16>
    %44 = vector.extract_strided_slice %36 {offsets = [2, 16, 0], sizes = [16, 16, 8], strides = [1, 1, 1]} : vector<18x48x8xbf16> to vector<16x16x8xbf16>
    %45 = vector.extract_strided_slice %36 {offsets = [2, 17, 0], sizes = [16, 16, 8], strides = [1, 1, 1]} : vector<18x48x8xbf16> to vector<16x16x8xbf16>
    %46 = tpu.concatenate %37, %38, %39, %40, %41, %42, %43, %44, %45 in 2 : vector<16x16x8xbf16>, vector<16x16x8xbf16>, vector<16x16x8xbf16>, vector<16x16x8xbf16>, vector<16x16x8xbf16>, vector<16x16x8xbf16>, vector<16x16x8xbf16>, vector<16x16x8xbf16>, vector<16x16x8xbf16> -> vector<16x16x72xbf16>
    %47 = vector.shape_cast %46 : vector<16x16x72xbf16> to vector<256x72xbf16>
    %c0_31 = arith.constant 0 : index
    %c0_32 = arith.constant 0 : index
    %48 = vector.load %arg4[%c0_31, %c0_32] : memref<72x8xbf16, #tpu.memory_space<vmem>>, vector<72x8xbf16>
    %cst_33 = arith.constant dense<0.000000e+00> : vector<256x8xf32>
    %49 = tpu.matmul %47, %48, %cst_33 {dimension_numbers = #tpu.dot_dimension_numbers<[1], [0], [0], [1], [0, 0, 1, 1], [], []>} : vector<256x72xbf16>, vector<72x8xbf16>, vector<256x8xf32> -> vector<256x8xf32>
    %c0_34 = arith.constant 0 : index
    %c0_35 = arith.constant 0 : index
    %50 = vector.load %arg5[%c0_34, %c0_35] : memref<1x8xf32, #tpu.memory_space<vmem>>, vector<1x8xf32>
    %51 = vector.broadcast %50 : vector<1x8xf32> to vector<256x8xf32>
    %52 = arith.addf %49, %51 : vector<256x8xf32>
    %53 = arith.addf %52, %30 : vector<256x8xf32>
    %cst_36 = arith.constant 0.000000e+00 : f32
    %54 = vector.broadcast %cst_36 : f32 to vector<256x8xf32>
    %55 = arith.maximumf %53, %54 : vector<256x8xf32>
    %56 = vector.shape_cast %55 : vector<256x8xf32> to vector<16x16x8xf32>
    %c0_37 = arith.constant 0 : index
    %c0_38 = arith.constant 0 : index
    %c0_39 = arith.constant 0 : index
    %c0_40 = arith.constant 0 : index
    %57 = vector.load %arg8[%c0_37, %c0_38, %c0_39, %c0_40] : memref<1x16x16x8xf32, #tpu.memory_space<vmem>>, vector<1x16x16x8xf32>
    %58 = vector.shape_cast %57 : vector<1x16x16x8xf32> to vector<16x16x8xf32>
    %59 = vector.shape_cast %56 : vector<16x16x8xf32> to vector<1x16x16x8xf32>
    tpu.vector_store %arg8[%c0_37, %c0_38, %c0_39, %c0_40], %59 {strides = array<i32>} : memref<1x16x16x8xf32, #tpu.memory_space<vmem>>, vector<1x16x16x8xf32>,
    return
  }
  func.func @transform_0(%arg0: i32) -> (i32, i32, i32, i32) {
    %c0_i32 = arith.constant 0 : i32
    %c0_i32_0 = arith.constant 0 : i32
    %c0_i32_1 = arith.constant 0 : i32
    %c0_i32_2 = arith.constant 0 : i32
    return %arg0, %c0_i32, %c0_i32_0, %c0_i32_1 : i32, i32, i32, i32
  }
  func.func @transform_1(%arg0: i32) -> (i32, i32) {
    %c0_i32 = arith.constant 0 : i32
    %c0_i32_0 = arith.constant 0 : i32
    %c0_i32_1 = arith.constant 0 : i32
    return %c0_i32, %c0_i32_0 : i32, i32
  }
  func.func @transform_2(%arg0: i32) -> (i32, i32) {
    %c0_i32 = arith.constant 0 : i32
    %c0_i32_0 = arith.constant 0 : i32
    %c0_i32_1 = arith.constant 0 : i32
    return %c0_i32, %c0_i32_0 : i32, i32
  }
  func.func @transform_3(%arg0: i32) -> (i32, i32) {
    %c0_i32 = arith.constant 0 : i32
    %c0_i32_0 = arith.constant 0 : i32
    %c0_i32_1 = arith.constant 0 : i32
    return %c0_i32, %c0_i32_0 : i32, i32
  }
  func.func @transform_4(%arg0: i32) -> (i32, i32) {
    %c0_i32 = arith.constant 0 : i32
    %c0_i32_0 = arith.constant 0 : i32
    %c0_i32_1 = arith.constant 0 : i32
    return %c0_i32, %c0_i32_0 : i32, i32
  }
  func.func @transform_5(%arg0: i32) -> (i32, i32) {
    %c0_i32 = arith.constant 0 : i32
    %c0_i32_0 = arith.constant 0 : i32
    %c0_i32_1 = arith.constant 0 : i32
    return %c0_i32, %c0_i32_0 : i32, i32
  }
  func.func @transform_6(%arg0: i32) -> (i32, i32) {
    %c0_i32 = arith.constant 0 : i32
    %c0_i32_0 = arith.constant 0 : i32
    %c0_i32_1 = arith.constant 0 : i32
    return %c0_i32, %c0_i32_0 : i32, i32
  }
  func.func @transform_7(%arg0: i32) -> (i32, i32, i32, i32) {
    %c0_i32 = arith.constant 0 : i32
    %c0_i32_0 = arith.constant 0 : i32
    %c0_i32_1 = arith.constant 0 : i32
    %c0_i32_2 = arith.constant 0 : i32
    return %arg0, %c0_i32, %c0_i32_0, %c0_i32_1 : i32, i32, i32, i32
  }
}

</mosaic_0001>

<bundles_post_ra>
// kernel: residual_block_pallas.1
= control target key start
LH: loop header
LB: loop body
LE: loop exit
PB: predicated region body
PF: predicated region fallthrough
CT: control target
= control target key end

     0   :  { %s5654_s24 = smov 0   ;;  %s9459_s0 = inlined_call_operand.vmem [shape: bf16[2,16,16,4], index: 0, kind: input, shape index: {}]   ;;  %s9460_s1 = inlined_call_operand.vmem [shape: bf16[36,8], index: 1, kind: input, shape index: {}]   ;;  %s9461_s2 = inlined_call_operand.vmem [shape: f32[1,8], index: 2, kind: input, shape index: {}]   ;;  %s9462_s3 = inlined_call_operand.vmem [shape: bf16[72,8], index: 3, kind: input, shape index: {}]   ;;  %s9463_s4 = inlined_call_operand.vmem [shape: f32[1,8], index: 4, kind: input, shape index: {}]   ;;  %s9464_s5 = inlined_call_operand.vmem [shape: bf16[4,8], index: 5, kind: input, shape index: {}]   ;;  %s9465_s6 = inlined_call_operand.vmem [shape: f32[1,8], index: 6, kind: input, shape index: {}]   ;;  %s9466_s7 = inlined_call_operand.vmem [shape: f32[2,16,16,8], index: 7, kind: output, shape index: {}]  }
   0x1 LB: > { %s4995_s25 = sadd.s32 4294967295, %s5599_s24   ;;  %p4999_p0 = scmp.ge.s32.totalorder %s5599_s24, 1  ;;  %s5599_s24 = sphi %s5654_s24, %s17_s24  }
   0x2   : > { %p237_p1 = scmp.lt.s32.totalorder %s5599_s24, 3 }
   0x4   : > { %p238_p2 = pnand %p4999_p0, %p237_p1 }
   0x6   : > { %241 = sbr.rel (%p238_p2) target bundleno = 1544 (0x608), region = 48 }
   0xb   : > { %vm312_vm0 = vcmask 27648   ;;  %p5664_p3 = scmp.lt.s32.totalorder %s4995_s25, 1  ;;  %v9467_v0 = vmov 0   ;;  %s5602_s8 = smov 4   ;;  %vm878_vm1 = vcmask 1042432   ;;  %vm2178_vm2 = vcmask 1041408  }
   0xc   : > { %315 = vst.msk [vmem:[#allocation2 + $0x8] sm:$0xf] %vm312_vm0, %v9467_v0  ;;  %316 = vst.msk [vmem:[#allocation2 + $0xc] sm:$0xf] %vm312_vm0, %v9467_v0  ;;  %s5603_s9 = smov 8   ;;  %s5604_s10 = smov 12  }
   0xd   : > { %314 = vst.msk [vmem:[#allocation2 + $0x4] sm:$0xf] %vm312_vm0, %v9467_v0  ;;  %317 = vst.msk [vmem:[#allocation2 + $0x10] sm:$0xf] %vm312_vm0, %v9467_v0  ;;  %s10022_s25 = smov (!%p5664_p3, %s4995_s25), 1  ;;  %s5605_s11 = smov 16  }
   0xe   : > { %320 = vst.msk [vmem:[#allocation2 + $0x1c] sm:$0xf] %vm312_vm0, %v9467_v0  ;;  %321 = vst.msk [vmem:[#allocation2 + $0x20] sm:$0xf] %vm312_vm0, %v9467_v0  ;;  %s5257_s27 = sshll.u32 %s10022_s25, 7  ;;  %s5606_s12 = smov 20  }
   0xf   : > { %322 = vst.msk [vmem:[#allocation2 + $0x24] sm:$0xf] %vm312_vm0, %v9467_v0  ;;  %323 = vst.msk [vmem:[#allocation2 + $0x28] sm:$0xf] %vm312_vm0, %v9467_v0  ;;  %s5822_s30 = scalar_lea.vmem %s9459_s0, %s5257_s27  ;;  %s5607_s15 = smov 24   ;;  %vm1357_vm3 = vcmask 31744  }
  0x10   : > { %326 = vst.msk [vmem:[#allocation2 + $0x34] sm:$0xf] %vm312_vm0, %v9467_v0  ;;  %327 = vst.msk [vmem:[#allocation2 + $0x38] sm:$0xf] %vm312_vm0, %v9467_v0  ;;  %v5825_v1 = vld [vmem:[%s5822_s30 + $0x8] sm:$0xf] }
  0x11   : > { %328 = vst.msk [vmem:[#allocation2 + $0x3c] sm:$0xf] %vm312_vm0, %v9467_v0  ;;  %329 = vst.msk [vmem:[#allocation2 + $0x40] sm:$0xf] %vm312_vm0, %v9467_v0  ;;  %v5828_v2 = vld [vmem:[%s5822_s30 + $0xc] sm:$0xf] }
  0x12   : > { %332 = vst.msk [vmem:[#allocation2 + $0x4c] sm:$0xf] %vm312_vm0, %v9467_v0  ;;  %333 = vst.msk [vmem:[#allocation2 + $0x50] sm:$0xf] %vm312_vm0, %v9467_v0  ;;  %v5831_v3 = vld [vmem:[%s5822_s30] sm:$0xf] }
  0x13   : > { %334 = vst.msk [vmem:[#allocation2 + $0x54] sm:$0xf] %vm312_vm0, %v9467_v0  ;;  %335 = vst.msk [vmem:[#allocation2 + $0x58] sm:$0xf] %vm312_vm0, %v9467_v0  ;;  %v5838_v4 = vld [vmem:[%s5822_s30 + $0x4] sm:$0xf] }
  0x14   : > { %338 = vst.msk [vmem:[#allocation2 + $0x64] sm:$0xf] %vm312_vm0, %v9467_v0  ;;  %339 = vst.msk [vmem:[#allocation2 + $0x68] sm:$0xf] %vm312_vm0, %v9467_v0  ;;  %v5843_v5 = vld [vmem:[%s5822_s30 + $0x10] sm:$0xf] }
  0x15   : > { %340 = vst.msk [vmem:[#allocation2 + $0x6c] sm:$0xf] %vm312_vm0, %v9467_v0  ;;  %341 = vst.msk [vmem:[#allocation2 + $0x70] sm:$0xf] %vm312_vm0, %v9467_v0  ;;  %v5846_v6 = vld [vmem:[%s5822_s30 + $0x14] sm:$0xf] }
  0x16   : > { %344 = vst.msk [vmem:[#allocation2 + $0x7c] sm:$0xf] %vm312_vm0, %v9467_v0  ;;  %345 = vst.msk [vmem:[#allocation2 + $0x80] sm:$0xf] %vm312_vm0, %v9467_v0  ;;  %v455_v7 = vld [vmem:[#allocation2 + $0x8] sm:$0xf] }
  0x17   : > { %346 = vst.msk [vmem:[#allocation2 + $0x84] sm:$0xf] %vm312_vm0, %v9467_v0  ;;  %347 = vst.msk [vmem:[#allocation2 + $0x88] sm:$0xf] %vm312_vm0, %v9467_v0  ;;  %v456_v8 = vld [vmem:[#allocation2 + $0xc] sm:$0xf] }
  0x18   : > { %350 = vst.msk [vmem:[#allocation2 + $0x94] sm:$0xf] %vm312_vm0, %v9467_v0  ;;  %351 = vst.msk [vmem:[#allocation2 + $0x98] sm:$0xf] %vm312_vm0, %v9467_v0  ;;  %v5855_v9 = vld [vmem:[%s5822_s30 + $0x18] sm:$0xf]  ;;  %v5857_v10 = vcombine.low %v455_v7, %v456_v8 }
  0x19   : > { %352 = vst.msk [vmem:[#allocation2 + $0x9c] sm:$0xf] %vm312_vm0, %v9467_v0  ;;  %353 = vst.msk [vmem:[#allocation2 + $0xa0] sm:$0xf] %vm312_vm0, %v9467_v0  ;;  %v5860_v11 = vld [vmem:[%s5822_s30 + $0x1c] sm:$0xf] }
  0x1a   : > { %356 = vst.msk [vmem:[#allocation2 + $0xac] sm:$0xf] %vm312_vm0, %v9467_v0  ;;  %357 = vst.msk [vmem:[#allocation2 + $0xb0] sm:$0xf] %vm312_vm0, %v9467_v0  ;;  %v5865_v12 = vld [vmem:[%s5822_s30 + $0x20] sm:$0xf] }
  0x1b   : > { %358 = vst.msk [vmem:[#allocation2 + $0xb4] sm:$0xf] %vm312_vm0, %v9467_v0  ;;  %359 = vst.msk [vmem:[#allocation2 + $0xb8] sm:$0xf] %vm312_vm0, %v9467_v0  ;;  %v5868_v13 = vld [vmem:[%s5822_s30 + $0x24] sm:$0xf] }
  0x1c   : > { %362 = vst.msk [vmem:[#allocation2 + $0xc4] sm:$0xf] %vm312_vm0, %v9467_v0  ;;  %363 = vst.msk [vmem:[#allocation2 + $0xc8] sm:$0xf] %vm312_vm0, %v9467_v0  ;;  %v5877_v14 = vld [vmem:[%s5822_s30 + $0x28] sm:$0xf] }
  0x1d   : > { %364 = vst.msk [vmem:[#allocation2 + $0xcc] sm:$0xf] %vm312_vm0, %v9467_v0  ;;  %365 = vst.msk [vmem:[#allocation2 + $0xd0] sm:$0xf] %vm312_vm0, %v9467_v0  ;;  %v5880_v15 = vld [vmem:[%s5822_s30 + $0x2c] sm:$0xf] }
  0x1e   : > { %368 = vst.msk [vmem:[#allocation2 + $0xdc] sm:$0xf] %vm312_vm0, %v9467_v0  ;;  %369 = vst.msk [vmem:[#allocation2 + $0xe0] sm:$0xf] %vm312_vm0, %v9467_v0  ;;  %v5883_v16 = vld [vmem:[%s5822_s30 + $0x30] sm:$0xf] }
  0x1f   : > { %370 = vst.msk [vmem:[#allocation2 + $0xe4] sm:$0xf] %vm312_vm0, %v9467_v0  ;;  %371 = vst.msk [vmem:[#allocation2 + $0xe8] sm:$0xf] %vm312_vm0, %v9467_v0  ;;  %v671_v17 = vshrl.u32 %v5857_v10, 16  ;;  %v674_v18 = vshll.u32 %v5857_v10, 16 }
  0x20   : > { %374 = vst.msk [vmem:[#allocation2 + $0xf4] sm:$0xf] %vm312_vm0, %v9467_v0  ;;  %375 = vst.msk [vmem:[#allocation2 + $0xf8] sm:$0xf] %vm312_vm0, %v9467_v0  ;;  %v5892_v19 = vld [vmem:[%s5822_s30 + $0x34] sm:$0xf] }
  0x21   : > { %376 = vst.msk [vmem:[#allocation2 + $0xfc] sm:$0xf] %vm312_vm0, %v9467_v0  ;;  %377 = vst.msk [vmem:[#allocation2 + $0x100] sm:$0xf] %vm312_vm0, %v9467_v0  ;;  %v5897_v20 = vld [vmem:[%s5822_s30 + $0x38] sm:$0xf] }
  0x22   : > { %380 = vst.msk [vmem:[#allocation2 + $0x10c] sm:$0xf] %vm312_vm0, %v9467_v0  ;;  %381 = vst.msk [vmem:[#allocation2 + $0x110] sm:$0xf] %vm312_vm0, %v9467_v0  ;;  %v5902_v21 = vld [vmem:[%s5822_s30 + $0x3c] sm:$0xf] }
  0x23   : > { %382 = vst.msk [vmem:[#allocation2 + $0x114] sm:$0xf] %vm312_vm0, %v9467_v0  ;;  %383 = vst.msk [vmem:[#allocation2 + $0x118] sm:$0xf] %vm312_vm0, %v9467_v0  ;;  %v5907_v22 = vld [vmem:[%s5822_s30 + $0x40] sm:$0xf] }
  0x24   : > { %386 = vst.msk [vmem:[#allocation2 + $0x124] sm:$0xf] %vm312_vm0, %v9467_v0  ;;  %387 = vst.msk [vmem:[#allocation2 + $0x128] sm:$0xf] %vm312_vm0, %v9467_v0  ;;  %v5910_v23 = vld [vmem:[%s5822_s30 + $0x44] sm:$0xf] }
  0x25   : > { %388 = vst.msk [vmem:[#allocation2 + $0x12c] sm:$0xf] %vm312_vm0, %v9467_v0  ;;  %389 = vst.msk [vmem:[#allocation2 + $0x130] sm:$0xf] %vm312_vm0, %v9467_v0  ;;  %v673_v24 = vrot.slane %v671_v17, 4  ;;  %v676_v25 = vrot.slane %v674_v18, 5 }
  0x26   : > { %392 = vst.msk [vmem:[#allocation2 + $0x13c] sm:$0xf] %vm312_vm0, %v9467_v0  ;;  %393 = vst.msk [vmem:[#allocation2 + $0x140] sm:$0xf] %vm312_vm0, %v9467_v0  ;;  %v5919_v26 = vld [vmem:[%s5822_s30 + $0x48] sm:$0xf] }
  0x27   : > { %394 = vst.msk [vmem:[#allocation2 + $0x144] sm:$0xf] %vm312_vm0, %v9467_v0  ;;  %395 = vst.msk [vmem:[#allocation2 + $0x148] sm:$0xf] %vm312_vm0, %v9467_v0  ;;  %v5922_v27 = vld [vmem:[%s5822_s30 + $0x4c] sm:$0xf]  ;;  %v677_v31 = vor.u32 %v676_v25, %v673_v24 }
  0x28   : > { %398 = vst.msk [vmem:[#allocation2 + $0x154] sm:$0xf] %vm312_vm0, %v9467_v0  ;;  %399 = vst.msk [vmem:[#allocation2 + $0x158] sm:$0xf] %vm312_vm0, %v9467_v0  ;;  %v5955_v39 = vld [vmem:[%s5822_s30 + $0x50] sm:$0xf] }
  0x29   : > { %400 = vst.msk [vmem:[#allocation2 + $0x15c] sm:$0xf] %vm312_vm0, %v9467_v0  ;;  %401 = vst.msk [vmem:[#allocation2 + $0x160] sm:$0xf] %vm312_vm0, %v9467_v0  ;;  %v5958_v40 = vld [vmem:[%s5822_s30 + $0x54] sm:$0xf]  ;;  %798 = vrot.lane.b32.xlu0 %v677_v31, %s5602_s8 }
  0x2a   : > { %404 = vst.msk [vmem:[#allocation2 + $0x16c] sm:$0xf] %vm312_vm0, %v9467_v0  ;;  %405 = vst.msk [vmem:[#allocation2 + $0x170] sm:$0xf] %vm312_vm0, %v9467_v0  ;;  %s5608_s20 = smov 28   ;;  %s5609_s21 = smov 32  }
  0x2b   : > { %406 = vst.msk [vmem:[#allocation2 + $0x174] sm:$0xf] %vm312_vm0, %v9467_v0  ;;  %407 = vst.msk [vmem:[#allocation2 + $0x178] sm:$0xf] %vm312_vm0, %v9467_v0  ;;  %vm1438_vm4 = vcmask 64512   ;;  %vm1503_vm5 = vcmask 97280  }
  0x2c   : > { %410 = vst.msk [vmem:[#allocation2 + $0x184] sm:$0xf] %vm312_vm0, %v9467_v0  ;;  %411 = vst.msk [vmem:[#allocation2 + $0x188] sm:$0xf] %vm312_vm0, %v9467_v0  ;;  %vm1568_vm6 = vcmask 130048   ;;  %vm1617_vm7 = vcmask 162816  }
  0x2d   : > { %412 = vst.msk [vmem:[#allocation2 + $0x18c] sm:$0xf] %vm312_vm0, %v9467_v0  ;;  %413 = vst.msk [vmem:[#allocation2 + $0x190] sm:$0xf] %vm312_vm0, %v9467_v0  ;;  %vm1682_vm8 = vcmask 195584   ;;  %vm1747_vm9 = vcmask 228352  }
  0x2e   : > { %416 = vst.msk [vmem:[#allocation2 + $0x19c] sm:$0xf] %vm312_vm0, %v9467_v0  ;;  %417 = vst.msk [vmem:[#allocation2 + $0x1a0] sm:$0xf] %vm312_vm0, %v9467_v0  ;;  %vm1796_vm10 = vcmask 261120   ;;  %vm2129_vm12 = vcmask 293888  }
  0x2f   : > { %418 = vst.msk [vmem:[#allocation2 + $0x1a4] sm:$0xf] %vm312_vm0, %v9467_v0  ;;  %419 = vst.msk [vmem:[#allocation2 + $0x1a8] sm:$0xf] %vm312_vm0, %v9467_v0  ;;  %vm1861_vm11 = vsmask.f32 4352 }
  0x30   : > { %9634 = vst [vmem:[#allocation4_spill] sm:$0xff] %v5825_v1  ;;  %9635 = vst [vmem:[#allocation5_spill] sm:$0xff] %v5828_v2  ;;  %vm2675_vm13 = vcmask 60416   ;;  %s5610_s26 = smov 40   ;;  %s5611_s29 = smov 48   ;;  %vm4679_vm14 = vcmask 1043456  }
  0x31   : > { %9636 = vst [vmem:[#allocation6_spill] sm:$0xff] %v5831_v3  ;;  %424 = vst.msk [vmem:[#allocation2 + $0x38] sm:$0xf] %vm312_vm0, %v5825_v1  ;;  %vm4103_vm15 = vcmask 326656   ;;  %s5258_s23 = sshll.u32 %s10022_s25, 8 }
  0x32   : > { %425 = vst.msk [vmem:[#allocation2 + $0x3c] sm:$0xf] %vm312_vm0, %v5828_v2  ;;  %9637 = vst [vmem:[#allocation7_spill] sm:$0xff] %v5838_v4  ;;  %s9191_s25 = scalar_lea.vmem %s9466_s7, %s5258_s23 }
  0x33   : > { %422 = vst.msk [vmem:[#allocation2 + $0x20] sm:$0xf] %vm312_vm0, %v5831_v3  ;;  %9638 = vst [vmem:[#allocation8_spill] sm:$0xff] %v5843_v5 }
  0x34   : > { %9639 = vst [vmem:[#allocation9_spill] sm:$0xff] %v5846_v6  ;;  %423 = vst.msk [vmem:[#allocation2 + $0x24] sm:$0xf] %vm312_vm0, %v5838_v4 }
  0x35   : > { %426 = vst.msk [vmem:[#allocation2 + $0x50] sm:$0xf] %vm312_vm0, %v5843_v5  ;;  %427 = vst.msk [vmem:[#allocation2 + $0x54] sm:$0xf] %vm312_vm0, %v5846_v6  ;;  %v6065_v6 = vld [vmem:[%s5822_s30 + $0x5c] sm:$0xf] }
  0x36   : > { %9640 = vst [vmem:[#allocation10_spill] sm:$0xff] %v5855_v9  ;;  %9641 = vst [vmem:[#allocation11_spill] sm:$0xff] %v5860_v11 }
  0x37   : > { %428 = vst.msk [vmem:[#allocation2 + $0x68] sm:$0xf] %vm312_vm0, %v5855_v9  ;;  %9642 = vst [vmem:[#allocation12_spill] sm:$0xff] %v5865_v12 }
  0x38   : > { %9643 = vst [vmem:[#allocation13_spill] sm:$0xff] %v5868_v13  ;;  %429 = vst.msk [vmem:[#allocation2 + $0x6c] sm:$0xf] %vm312_vm0, %v5860_v11  ;;  %v5924_v28 = vld [vmem:[#allocation2 + $0x38] sm:$0xf] }
  0x39   : > { %430 = vst.msk [vmem:[#allocation2 + $0x80] sm:$0xf] %vm312_vm0, %v5865_v12  ;;  %431 = vst.msk [vmem:[#allocation2 + $0x84] sm:$0xf] %vm312_vm0, %v5868_v13  ;;  %v5926_v29 = vld [vmem:[#allocation2 + $0x3c] sm:$0xf] }
  0x3a   : > { %9644 = vst [vmem:[#allocation14_spill] sm:$0xff] %v5877_v14  ;;  %9645 = vst [vmem:[#allocation15_spill] sm:$0xff] %v5880_v15  ;;  %v5928_v30 = vld [vmem:[#allocation2 + $0x20] sm:$0xf]  ;;  %v5936_v32 = vcombine.low %v5924_v28, %v5926_v29 }
  0x3b   : > { %9646 = vst [vmem:[#allocation16_spill] sm:$0xff] %v5883_v16  ;;  %432 = vst.msk [vmem:[#allocation2 + $0x98] sm:$0xf] %vm312_vm0, %v5877_v14  ;;  %v5938_v33 = vld [vmem:[#allocation2 + $0x24] sm:$0xf] }
  0x3c   : > { %433 = vst.msk [vmem:[#allocation2 + $0x9c] sm:$0xf] %vm312_vm0, %v5880_v15  ;;  %9647 = vst [vmem:[#allocation17_spill] sm:$0xff] %v5892_v19  ;;  %v5940_v34 = vld [vmem:[#allocation2 + $0x50] sm:$0xf]  ;;  %v5946_v36 = vcombine.low %v5928_v30, %v5938_v33  ;;  %v687_v41 = vshrl.u32 %v5936_v32, 16 }
  0x3d   : > { %434 = vst.msk [vmem:[#allocation2 + $0xb0] sm:$0xf] %vm312_vm0, %v5883_v16  ;;  %9648 = vst [vmem:[#allocation18_spill] sm:$0xff] %v5897_v20  ;;  %v5942_v35 = vld [vmem:[#allocation2 + $0x54] sm:$0xf]  ;;  %v690_v42 = vshll.u32 %v5936_v32, 16 }
  0x3e   : > { %435 = vst.msk [vmem:[#allocation2 + $0xb4] sm:$0xf] %vm312_vm0, %v5892_v19  ;;  %9649 = vst [vmem:[#allocation19_spill] sm:$0xff] %v5902_v21  ;;  %v5950_v37 = vcombine.low %v5940_v34, %v5942_v35  ;;  %v5952_v38 = vld [vmem:[#allocation2 + $0x68] sm:$0xf]  ;;  %v679_v45 = vshrl.u32 %v5946_v36, 16 }
  0x3f   : > { %436 = vst.msk [vmem:[#allocation2 + $0xc8] sm:$0xf] %vm312_vm0, %v5897_v20  ;;  %9650 = vst [vmem:[#allocation20_spill] sm:$0xff] %v5907_v22  ;;  %v5963_v43 = vld [vmem:[#allocation2 + $0x6c] sm:$0xf]  ;;  %v682_v46 = vshll.u32 %v5946_v36, 16 }
  0x40   : > { %9651 = vst [vmem:[#allocation21_spill] sm:$0xff] %v5910_v23  ;;  %437 = vst.msk [vmem:[#allocation2 + $0xcc] sm:$0xf] %vm312_vm0, %v5902_v21  ;;  %v5965_v44 = vld [vmem:[#allocation2 + $0x80] sm:$0xf]  ;;  %v695_v47 = vshrl.u32 %v5950_v37, 16  ;;  %v5979_v52 = vcombine.low %v5952_v38, %v5963_v43 }
  0x41   : > { %438 = vst.msk [vmem:[#allocation2 + $0xe0] sm:$0xf] %vm312_vm0, %v5907_v22  ;;  %439 = vst.msk [vmem:[#allocation2 + $0xe4] sm:$0xf] %vm312_vm0, %v5910_v23  ;;  %v698_v48 = vshll.u32 %v5950_v37, 16  ;;  %v689_v50 = vrot.slane %v687_v41, 4 }
  0x42   : > { %9652 = vst [vmem:[#allocation22_spill] sm:$0xff] %v5919_v26  ;;  %9653 = vst [vmem:[#allocation23_spill] sm:$0xff] %v5922_v27  ;;  %v5975_v49 = vld [vmem:[#allocation2 + $0x84] sm:$0xf]  ;;  %v692_v51 = vrot.slane %v690_v42, 5  ;;  %v681_v56 = vrot.slane %v679_v45, 4 }
  0x43   : > { %440 = vst.msk [vmem:[#allocation2 + $0xf8] sm:$0xf] %vm312_vm0, %v5919_v26  ;;  %441 = vst.msk [vmem:[#allocation2 + $0xfc] sm:$0xf] %vm312_vm0, %v5922_v27  ;;  %v5983_v53 = vcombine.low %v5965_v44, %v5975_v49  ;;  %v5985_v54 = vld [vmem:[#allocation2 + $0x98] sm:$0xf] }
  0x44   : > { %9654 = vst [vmem:[#allocation24_spill] sm:$0xff] %v5955_v39  ;;  %9655 = vst [vmem:[#allocation25_spill] sm:$0xff] %v5958_v40  ;;  %v5987_v55 = vld [vmem:[#allocation2 + $0x9c] sm:$0xf]  ;;  %v684_v57 = vrot.slane %v682_v46, 5  ;;  %v697_v58 = vrot.slane %v695_v47, 4  ;;  %v5991_v61 = vor.u32 %v692_v51, %v689_v50 }
  0x45   : > { %442 = vst.msk [vmem:[#allocation2 + $0x110] sm:$0xf] %vm312_vm0, %v5955_v39  ;;  %443 = vst.msk [vmem:[#allocation2 + $0x114] sm:$0xf] %vm312_vm0, %v5958_v40  ;;  %v700_v59 = vrot.slane %v698_v48, 5  ;;  %v703_v62 = vshrl.u32 %v5979_v52, 16  ;;  %v6005_v25 = vcombine.low %v5985_v54, %v5987_v55 }
  0x46   : > { %v5989_v60 = vld [vmem:[#allocation2 + $0xb0] sm:$0xf]  ;;  %9656 = vst [vmem:[#allocation26_spill] sm:$0xff] %v5991_v61  ;;  %v706_v63 = vshll.u32 %v5979_v52, 16  ;;  %v711_v7 = vshrl.u32 %v5983_v53, 16  ;;  %v5998_v17 = vor.u32 %v684_v57, %v681_v56  ;;  %v714_v24 = vshll.u32 %v5983_v53, 16  ;;  %802 = vrot.lane.b32.xlu1 %v5991_v61, %s5602_s8 }
  0x47   : > { %v5996_v8 = vld [vmem:[#allocation2 + $0xb4] sm:$0xf]  ;;  %v6000_v18 = vor.u32 %v700_v59, %v697_v58  ;;  %v6007_v31 = vld [vmem:[#allocation2 + $0xc8] sm:$0xf]  ;;  %v6009_v41 = vld [vmem:[#allocation2 + $0xcc] sm:$0xf] }
  0x48   : > { %v705_v42 = vrot.slane %v703_v62, 4  ;;  %v708_v45 = vrot.slane %v706_v63, 5  ;;  %v713_v46 = vrot.slane %v711_v7, 4  ;;  %v6015_v47 = vcombine.low %v5989_v60, %v5996_v8  ;;  %v6017_v48 = vld [vmem:[#allocation2 + $0xe0] sm:$0xf]  ;;  %800 = vrot.lane.b32.xlu0 %v5998_v17, %s5602_s8  ;;  %9662 = vst [vmem:[#allocation32_spill] sm:$0xff] %v6065_v6 }
  0x49   : > { %9657 = vst [vmem:[#allocation27_spill] sm:$0xff] %v6000_v18  ;;  %v716_v50 = vrot.slane %v714_v24, 5  ;;  %v719_v51 = vshrl.u32 %v6005_v25, 16  ;;  %v722_v56 = vshll.u32 %v6005_v25, 16  ;;  %v6025_v57 = vcombine.low %v6007_v31, %v6009_v41  ;;  %v6027_v58 = vld [vmem:[#allocation2 + $0xe4] sm:$0xf] }
  0x4a   : > { %v6029_v59 = vor.u32 %v708_v45, %v705_v42  ;;  %v727_v62 = vshrl.u32 %v6015_v47, 16  ;;  %v730_v63 = vshll.u32 %v6015_v47, 16  ;;  %v6035_v7 = vcombine.low %v6017_v48, %v6027_v58  ;;  %v6037_v24 = vld [vmem:[#allocation2 + $0xf8] sm:$0xf]  ;;  %v6039_v0 = vld [vmem:[#allocation2 + $0xfc] sm:$0xf]  ;;  %804 = vrot.lane.b32.xlu1 %v6000_v18, %s5602_s8 }
  0x4b   : > { %v6041_v14 = vor.u32 %v716_v50, %v713_v46  ;;  %v721_v15 = vrot.slane %v719_v51, 4  ;;  %v724_v12 = vrot.slane %v722_v56, 5  ;;  %v735_v42 = vshrl.u32 %v6025_v57, 16  ;;  %445 = vst.msk [vmem:[#allocation2 + $0x12c] sm:$0xf] %vm312_vm0, %v6065_v6 }
  0x4c   : > { %9658 = vst [vmem:[#allocation28_spill] sm:$0xff] %v6029_v59  ;;  %v6044_v45 = vld [vmem:[#allocation2 + $0x110] sm:$0xf]  ;;  %v729_v13 = vrot.slane %v727_v62, 4  ;;  %v732_v9 = vrot.slane %v730_v63, 5  ;;  %v738_v11 = vshll.u32 %v6025_v57, 16  ;;  %806 = vrot.lane.b32.xlu0 %v6029_v59, %s5602_s8  ;;  %v6059_v62 = vcombine.low %v6037_v24, %v6039_v0 }
  0x4d   : > { %9659 = vst [vmem:[#allocation29_spill] sm:$0xff] %v6041_v14  ;;  %v743_v46 = vshrl.u32 %v6035_v7, 16  ;;  %v6050_v50 = vld [vmem:[#allocation2 + $0x114] sm:$0xf]  ;;  %v6054_v51 = vor.u32 %v724_v12, %v721_v15  ;;  %v737_v56 = vrot.slane %v735_v42, 4  ;;  %v746_v5 = vshll.u32 %v6035_v7, 16 }
  0x4e   : > { %v6062_v63 = vld [vmem:[%s5822_s30 + $0x58] sm:$0xf]  ;;  %v740_v1 = vrot.slane %v738_v11, 5  ;;  %v6069_v2 = vcombine.low %v6044_v45, %v6050_v50  ;;  %v6076_v12 = vld [vmem:[%s5822_s30 + $0x60] sm:$0xf]  ;;  %v751_v11 = vshrl.u32 %v6059_v62, 16  ;;  %808 = vrot.lane.b32.xlu1 %v6041_v14, %s5602_s8  ;;  %v6092_v6 = vor.u32 %v732_v9, %v729_v13 }
  0x4f   : > { %9660 = vst [vmem:[#allocation30_spill] sm:$0xff] %v6054_v51  ;;  %9661 = vst [vmem:[#allocation31_spill] sm:$0xff] %v6062_v63  ;;  %v6079_v15 = vld [vmem:[%s5822_s30 + $0x64] sm:$0xf]  ;;  %v745_v42 = vrot.slane %v743_v46, 4  ;;  %v748_v3 = vrot.slane %v746_v5, 5 }
  0x50   : > { %444 = vst.msk [vmem:[#allocation2 + $0x128] sm:$0xf] %vm312_vm0, %v6062_v63  ;;  %9663 = vst [vmem:[#allocation33_spill] sm:$0xff] %v6076_v12  ;;  %v754_v4 = vshll.u32 %v6059_v62, 16  ;;  %v6088_v63 = vld [vmem:[%s5822_s30 + $0x68] sm:$0xf]  ;;  %810 = vrot.lane.b32.xlu0 %v6054_v51, %s5602_s8 }
  0x51   : > { %9664 = vst [vmem:[#allocation34_spill] sm:$0xff] %v6079_v15  ;;  %446 = vst.msk [vmem:[#allocation2 + $0x140] sm:$0xf] %vm312_vm0, %v6076_v12  ;;  %v759_v5 = vshrl.u32 %v6069_v2, 16  ;;  %v762_v46 = vshll.u32 %v6069_v2, 16  ;;  %v753_v40 = vrot.slane %v751_v11, 4  ;;  %v6119_v13 = vor.u32 %v748_v3, %v745_v42 }
  0x52   : > { %447 = vst.msk [vmem:[#allocation2 + $0x144] sm:$0xf] %vm312_vm0, %v6079_v15  ;;  %9665 = vst [vmem:[#allocation35_spill] sm:$0xff] %v6088_v63  ;;  %v6097_v39 = vld [vmem:[%s5822_s30 + $0x6c] sm:$0xf]  ;;  %v6106_v15 = vor.u32 %v740_v1, %v737_v56  ;;  %v756_v26 = vrot.slane %v754_v4, 5  ;;  %812 = vrot.lane.b32.xlu1 %v6092_v6, %s5602_s8 }
  0x53   : > { %9666 = vst [vmem:[#allocation36_spill] sm:$0xff] %v6092_v6  ;;  %9667 = vst [vmem:[#allocation37_spill] sm:$0xff] %v6097_v39  ;;  %v6102_v12 = vld [vmem:[%s5822_s30 + $0x70] sm:$0xf]  ;;  %v6111_v9 = vld [vmem:[%s5822_s30 + $0x74] sm:$0xf] }
  0x54   : > { %448 = vst.msk [vmem:[#allocation2 + $0x158] sm:$0xf] %vm312_vm0, %v6088_v63  ;;  %9668 = vst [vmem:[#allocation38_spill] sm:$0xff] %v6102_v12  ;;  %v761_v1 = vrot.slane %v759_v5, 4  ;;  %v764_v56 = vrot.slane %v762_v46, 5  ;;  %814 = vrot.lane.b32.xlu0 %v6106_v15, %s5602_s8  ;;  %v6123_v4 = vor.u32 %v756_v26, %v753_v40 }
  0x55   : > { %9669 = vst [vmem:[#allocation39_spill] sm:$0xff] %v6106_v15  ;;  %449 = vst.msk [vmem:[#allocation2 + $0x15c] sm:$0xf] %vm312_vm0, %v6097_v39  ;;  %v6127_v63 = vld [vmem:[#allocation2 + $0x12c] sm:$0xf] }
  0x56   : > { %9670 = vst [vmem:[#allocation40_spill] sm:$0xff] %v6111_v9  ;;  %450 = vst.msk [vmem:[#allocation2 + $0x170] sm:$0xf] %vm312_vm0, %v6102_v12  ;;  %816 = vrot.lane.b32.xlu1 %v6119_v13, %s5602_s8  ;;  %v6145_v26 = vor.u32 %v764_v56, %v761_v1  ;;  %v5505_v18 = vld [vmem:[#allocation2 + $0x10] ss:$0 sps:$4 sm:$0xff]  }
  0x57   : > { %451 = vst.msk [vmem:[#allocation2 + $0x174] sm:$0xf] %vm312_vm0, %v6111_v9  ;;  %9671 = vst [vmem:[#allocation41_spill] sm:$0xff] %v6119_v13  ;;  %v6125_v11 = vld [vmem:[#allocation2 + $0x128] sm:$0xf] }
  0x58   : > { %9672 = vst [vmem:[#allocation42_spill] sm:$0xff] %v6123_v4  ;;  %v6131_v12 = vcombine.low %v6125_v11, %v6127_v63  ;;  %v6133_v9 = vld [vmem:[#allocation2 + $0x140] sm:$0xf]  ;;  %9673 = vst [vmem:[#allocation43_spill] sm:$0xff] %v6145_v26  ;;  %818 = vrot.lane.b32.xlu0 %v6123_v4, %s5602_s8 }
  0x59   : > { %v6135_v39 = vld [vmem:[#allocation2 + $0x144] sm:$0xf] }
  0x5a   : > { %v6139_v3 = vcombine.low %v6133_v9, %v6135_v39  ;;  %v767_v40 = vshrl.u32 %v6131_v12, 16  ;;  %v770_v5 = vshll.u32 %v6131_v12, 16  ;;  %820 = vrot.lane.b32.xlu1 %v6145_v26, %s5602_s8  ;;  %v5506_v26 = vld [vmem:[#allocation2 + $0x28] ss:$0 sps:$4 sm:$0xff]  }
  0x5b   : > { %v6141_v42 = vld [vmem:[#allocation2 + $0x158] sm:$0xf] }
  0x5c   : > { %v6149_v46 = vld [vmem:[#allocation2 + $0x15c] sm:$0xf]  ;;  %v775_v22 = vshrl.u32 %v6139_v3, 16  ;;  %v778_v23 = vshll.u32 %v6139_v3, 16  ;;  %v769_v56 = vrot.slane %v767_v40, 4  ;;  %v772_v21 = vrot.slane %v770_v5, 5 }
  0x5d   : > { %v6151_v27 = vld [vmem:[#allocation2 + $0x170] sm:$0xf]  ;;  %v6159_v20 = vcombine.low %v6141_v42, %v6149_v46 }
  0x5e   : > { %v6161_v1 = vld [vmem:[#allocation2 + $0x174] sm:$0xf]  ;;  %v777_v19 = vrot.slane %v775_v22, 4  ;;  %v780_v13 = vrot.slane %v778_v23, 5  ;;  %v6171_v6 = vor.u32 %v772_v21, %v769_v56  ;;  %v880_v56 = vrot.slane %v5505_v18, 5 }
  0x5f   : > { %v6165_v16 = vcombine.low %v6151_v27, %v6161_v1  ;;  %v783_v4 = vshrl.u32 %v6159_v20, 16  ;;  %v786_v15 = vshll.u32 %v6159_v20, 16  ;;  %v6193_v18 = vrot.slane %v5946_v36, 5 }
  0x60   : > { %v6175_v5 = vor.u32 %v780_v13, %v777_v19  ;;  %822 = vrot.lane.b32.xlu0 %v6171_v6, %s5602_s8  ;;  %v879_v19 = vrot.slane %v5857_v10, 5  ;;  %v5508_v13 = vld [vmem:[#allocation2 + $0x58] ss:$0 sps:$4 sm:$0xff]  }
  0x61   : > { %v791_v51 = vshrl.u32 %v6165_v16, 16  ;;  %v794_v40 = vshll.u32 %v6165_v16, 16  ;;  %v785_v14 = vrot.slane %v783_v4, 4  ;;  %v788_v59 = vrot.slane %v786_v15, 5 }
  0x62   : > { %824 = vrot.lane.b32.xlu1 %v6175_v5, %s5602_s8  ;;  %v6203_v4 = vrot.slane %v5936_v32, 5  ;;  %v6222_v32 = vld [vmem:[%s5822_s30 + $0x7c] sm:$0xf] }
  0x63   : > { %v793_v22 = vrot.slane %v791_v51, 4  ;;  %v796_v23 = vrot.slane %v794_v40, 5  ;;  %v6179_v61 = vor.u32 %v788_v59, %v785_v14  ;;  %v881_v51 = vsel %vm878_vm1, %v879_v19, %v880_v56  ;;  %v5507_v59 = vld [vmem:[#allocation2 + $0x40] ss:$0 sps:$4 sm:$0xff]   ;;  %v5509_v40 = vld [vmem:[#allocation2 + $0x70] ss:$0 sps:$4 sm:$0xff]  }
  0x64   : > { %v883_v14 = vrot.slane %v5506_v26, 5  ;;  %v886_v15 = vrot.slane %v5507_v59, 5  ;;  %v889_v26 = vrot.slane %v5508_v13, 5  ;;  %9675 = vst [vmem:[#allocation45_spill] sm:$0xff] %v6222_v32  ;;  %453 = vst.msk [vmem:[#allocation2 + $0x18c] sm:$0xf] %vm312_vm0, %v6222_v32 }
  0x65   : > { %v6183_v21 = vor.u32 %v796_v23, %v793_v22  ;;  %826 = vrot.lane.b32.xlu0 %v6179_v61, %s5602_s8  ;;  %v6212_v22 = vld [vmem:[%s5822_s30 + $0x78] sm:$0xf]  ;;  %v6217_v23 = vrot.slane %v5950_v37, 5  ;;  %v6235_v37 = vrot.slane %v5979_v52, 5  ;;  %v6246_v13 = vrot.slane %v5983_v53, 5  ;;  %s5612_s30 = smov 56  }
  0x66   : > { %v6198_v10 = vsel %vm878_vm1, %v6193_v18, %v883_v14  ;;  %v6209_v36 = vsel %vm878_vm1, %v6203_v4, %v886_v15  ;;  %9674 = vst [vmem:[#allocation44_spill] sm:$0xff] %v6212_v22  ;;  %452 = vst.msk [vmem:[#allocation2 + $0x188] sm:$0xf] %vm312_vm0, %v6212_v22  ;;  %v5511_v15 = vld [vmem:[#allocation2 + $0xa0] ss:$0 sps:$4 sm:$0xff]   ;;  %vm4168_vm0 = vcmask 392192  }
  0x67   : > { %828 = vrot.lane.b32.xlu1 %v6183_v21, %s5602_s8  ;;  %v6230_v56 = vsel %vm878_vm1, %v6217_v23, %v889_v26  ;;  %v898_v26 = vrot.slane %v5511_v15, 5  ;;  %v5513_v22 = vld [vmem:[#allocation2 + $0xd0] ss:$0 sps:$4 sm:$0xff]   ;;  %v5514_v32 = vld [vmem:[#allocation2 + $0xe8] ss:$0 sps:$4 sm:$0xff]   ;;  %s5613_s8 = smov 64  }
  0x68   : > { %v904_v15 = vrot.slane %v5513_v22, 5  ;;  %v6290_v22 = vrot.slane %v6035_v7, 5 }
  0x69   : > { %927 = vrot.lane.b32.xlu0 %v879_v19, %s5603_s9  ;;  %v892_v19 = vrot.slane %v5509_v40, 5  ;;  %v5512_v40 = vld [vmem:[#allocation2 + $0xb8] ss:$0 sps:$4 sm:$0xff]  }
  0x6b   : > { %929 = vrot.lane.b32.xlu1 %v881_v51, %s5603_s9  ;;  %v5510_v51 = vld [vmem:[#allocation2 + $0x88] ss:$0 sps:$4 sm:$0xff]   ;;  %v6241_v14 = vsel %vm878_vm1, %v6235_v37, %v892_v19  ;;  %v6257_v19 = vrot.slane %v6005_v25, 5 }
  0x6c   : > { %v895_v59 = vrot.slane %v5510_v51, 5  ;;  %v901_v51 = vrot.slane %v5512_v40, 5  ;;  %v907_v40 = vrot.slane %v5514_v32, 5  ;;  %v6301_v32 = vrot.slane %v6059_v62, 5 }
  0x6d   : > { %931 = vrot.lane.b32.xlu0 %v6193_v18, %s5603_s9  ;;  %v6263_v53 = vsel %vm878_vm1, %v6257_v19, %v898_v26  ;;  %v6279_v26 = vrot.slane %v6025_v57, 5 }
  0x6e   : > { %v6252_v52 = vsel %vm878_vm1, %v6246_v13, %v895_v59  ;;  %9676 = vst [vmem:[#allocation46_spill] sm:$0xff] %v6263_v53  ;;  %v6268_v59 = vrot.slane %v6015_v47, 5  ;;  %v6296_v57 = vsel %vm878_vm1, %v6290_v22, %v907_v40 }
  0x6f   : > { %933 = vrot.lane.b32.xlu1 %v6198_v10, %s5603_s9  ;;  %v6285_v47 = vsel %vm878_vm1, %v6279_v26, %v904_v15  ;;  %9679 = vst [vmem:[#allocation49_spill] sm:$0xff] %v6296_v57 }
  0x70   : > { %v6274_v25 = vsel %vm878_vm1, %v6268_v59, %v901_v51  ;;  %9678 = vst [vmem:[#allocation48_spill] sm:$0xff] %v6285_v47 }
  0x71   : > { %935 = vrot.lane.b32.xlu0 %v6203_v4, %s5603_s9  ;;  %9677 = vst [vmem:[#allocation47_spill] sm:$0xff] %v6274_v25 }
  0x73   : > { %937 = vrot.lane.b32.xlu1 %v6209_v36, %s5603_s9 }
  0x75   : > { %939 = vrot.lane.b32.xlu0 %v6217_v23, %s5603_s9 }
  0x77   : > { %941 = vrot.lane.b32.xlu1 %v6230_v56, %s5603_s9 }
  0x79   : > { %943 = vrot.lane.b32.xlu0 %v6235_v37, %s5603_s9 }
  0x7b   : > { %945 = vrot.lane.b32.xlu1 %v6241_v14, %s5603_s9 }
  0x7d   : > { %947 = vrot.lane.b32.xlu0 %v6246_v13, %s5603_s9 }
  0x7f   : > { %949 = vrot.lane.b32.xlu1 %v6252_v52, %s5603_s9 }
  0x81   : > { %951 = vrot.lane.b32.xlu0 %v6257_v19, %s5603_s9 }
  0x83   : > { %953 = vrot.lane.b32.xlu1 %v6263_v53, %s5603_s9  ;;  %v5515_v53 = vld [vmem:[#allocation2 + $0x100] ss:$0 sps:$4 sm:$0xff]  }
  0x84   : > { %v910_v51 = vrot.slane %v5515_v53, 5  ;;  %v6312_v53 = vrot.slane %v6069_v2, 5 }
  0x85   : > { %955 = vrot.lane.b32.xlu0 %v6268_v59, %s5603_s9 }
  0x86   : > { %v6307_v7 = vsel %vm878_vm1, %v6301_v32, %v910_v51 }
  0x87   : > { %957 = vrot.lane.b32.xlu1 %v6274_v25, %s5603_s9  ;;  %v5516_v25 = vld [vmem:[#allocation2 + $0x118] ss:$0 sps:$4 sm:$0xff]   ;;  %9680 = vst [vmem:[#allocation50_spill] sm:$0xff] %v6307_v7 }
  0x88   : > { %v913_v15 = vrot.slane %v5516_v25, 5  ;;  %v6323_v25 = vrot.slane %v6131_v12, 5 }
  0x89   : > { %959 = vrot.lane.b32.xlu0 %v6279_v26, %s5603_s9 }
  0x8a   : > { %v6318_v62 = vsel %vm878_vm1, %v6312_v53, %v913_v15  ;;  %9682 = vst [vmem:[#allocation52_spill] sm:$0xff] %v6323_v25 }
  0x8b   : > { %961 = vrot.lane.b32.xlu1 %v6285_v47, %s5603_s9  ;;  %v5517_v47 = vld [vmem:[#allocation2 + $0x130] ss:$0 sps:$4 sm:$0xff]   ;;  %9681 = vst [vmem:[#allocation51_spill] sm:$0xff] %v6318_v62 }
  0x8c   : > { %v916_v40 = vrot.slane %v5517_v47, 5  ;;  %v6334_v47 = vrot.slane %v6139_v3, 5 }
  0x8d   : > { %963 = vrot.lane.b32.xlu0 %v6290_v22, %s5603_s9 }
  0x8e   : > { %v6329_v2 = vsel %vm878_vm1, %v6323_v25, %v916_v40  ;;  %9684 = vst [vmem:[#allocation54_spill] sm:$0xff] %v6334_v47 }
  0x8f   : > { %965 = vrot.lane.b32.xlu1 %v6296_v57, %s5603_s9  ;;  %v5518_v57 = vld [vmem:[#allocation2 + $0x148] ss:$0 sps:$4 sm:$0xff]   ;;  %9683 = vst [vmem:[#allocation53_spill] sm:$0xff] %v6329_v2 }
  0x90   : > { %v919_v51 = vrot.slane %v5518_v57, 5  ;;  %v6345_v57 = vrot.slane %v6159_v20, 5 }
  0x91   : > { %967 = vrot.lane.b32.xlu0 %v6301_v32, %s5603_s9 }
  0x92   : > { %v6340_v12 = vsel %vm878_vm1, %v6334_v47, %v919_v51  ;;  %9686 = vst [vmem:[#allocation56_spill] sm:$0xff] %v6345_v57  ;;  %v458_v51 = vld [vmem:[#allocation2 + $0x1c] sm:$0xf] }
  0x93   : > { %969 = vrot.lane.b32.xlu1 %v6307_v7, %s5603_s9  ;;  %v5519_v7 = vld [vmem:[#allocation2 + $0x160] ss:$0 sps:$4 sm:$0xff]   ;;  %9685 = vst [vmem:[#allocation55_spill] sm:$0xff] %v6340_v12 }
  0x94   : > { %v922_v15 = vrot.slane %v5519_v7, 5  ;;  %v6356_v7 = vrot.slane %v6165_v16, 5  ;;  %v6373_v16 = vcombine.low %v5938_v33, %v5938_v33 }
  0x95   : > { %971 = vrot.lane.b32.xlu0 %v6312_v53, %s5603_s9 }
  0x96   : > { %v6351_v3 = vsel %vm878_vm1, %v6345_v57, %v922_v15  ;;  %9688 = vst [vmem:[#allocation58_spill] sm:$0xff] %v6356_v7  ;;  %v6367_v15 = vcombine.low %v458_v51, %v5928_v30  ;;  %v6384_v30 = vcombine.low %v5926_v29, %v5926_v29  ;;  %v470_v51 = vld [vmem:[#allocation2 + $0x64] sm:$0xf] }
  0x97   : > { %973 = vrot.lane.b32.xlu1 %v6318_v62, %s5603_s9  ;;  %v5520_v62 = vld [vmem:[#allocation2 + $0x178] ss:$0 sps:$4 sm:$0xff]   ;;  %9687 = vst [vmem:[#allocation57_spill] sm:$0xff] %v6351_v3  ;;  %v6400_v29 = vcombine.low %v470_v51, %v5952_v38  ;;  %v6417_v38 = vcombine.low %v5975_v49, %v5975_v49 }
  0x98   : > { %v925_v40 = vrot.slane %v5520_v62, 5  ;;  %v462_v62 = vld [vmem:[#allocation2 + $0x34] sm:$0xf] }
  0x99   : > { %975 = vrot.lane.b32.xlu0 %v6323_v25, %s5603_s9  ;;  %v9747_v25 = vld [vmem:[#allocation42_spill] sm:$0xff] }
  0x9a   : > { %v6362_v20 = vsel %vm878_vm1, %v6356_v7, %v925_v40  ;;  %v6378_v40 = vcombine.low %v462_v62, %v5924_v28  ;;  %v6395_v28 = vcombine.low %v5942_v35, %v5942_v35  ;;  %v474_v62 = vld [vmem:[#allocation2 + $0x7c] sm:$0xf] }
  0x9b   : > { %977 = vrot.lane.b32.xlu1 %v6329_v2, %s5603_s9  ;;  %9689 = vst [vmem:[#allocation59_spill] sm:$0xff] %v6362_v20  ;;  %v6411_v35 = vcombine.low %v474_v62, %v5965_v44  ;;  %v6419_v51 = vpop.permute.xlu0 %798  ;;  %v6430_v44 = vcombine.low %v5987_v55, %v5987_v55  ;;  %v9744_v2 = vld [vmem:[#allocation41_spill] sm:$0xff] }
  0x9d   : > { %979 = vrot.lane.b32.xlu0 %v6334_v47, %s5603_s9 }
  0x9f   : > { %981 = vrot.lane.b32.xlu1 %v6340_v12, %s5603_s9  ;;  %v6460_v12 = vcombine.low %v6009_v41, %v6009_v41 }
  0xa1   : > { %983 = vrot.lane.b32.xlu0 %v6345_v57, %s5603_s9  ;;  %9694 = vst [vmem:[#allocation64_spill] sm:$0xff] %v6460_v12 }
  0xa3   : > { %985 = vrot.lane.b32.xlu1 %v6351_v3, %s5603_s9  ;;  %v466_v3 = vld [vmem:[#allocation2 + $0x4c] sm:$0xf] }
  0xa4   : > { %v6389_v33 = vcombine.low %v466_v3, %v5940_v34  ;;  %v6406_v34 = vcombine.low %v5963_v43, %v5963_v43  ;;  %v478_v3 = vld [vmem:[#allocation2 + $0x94] sm:$0xf] }
  0xa5   : > { %987 = vrot.lane.b32.xlu0 %v6356_v7, %s5603_s9  ;;  %v6424_v43 = vcombine.low %v478_v3, %v5985_v54  ;;  %v486_v54 = vld [vmem:[#allocation2 + $0xc4] sm:$0xf]  ;;  %v6445_v3 = vcombine.low %v5996_v8, %v5996_v8 }
  0xa6   : > { %v6452_v57 = vcombine.low %v486_v54, %v6007_v31  ;;  %v494_v54 = vld [vmem:[#allocation2 + $0xf4] sm:$0xf] }
  0xa7   : > { %989 = vrot.lane.b32.xlu1 %v6362_v20, %s5603_s9  ;;  %v482_v20 = vld [vmem:[#allocation2 + $0xac] sm:$0xf] }
  0xa8   : > { %v6437_v62 = vcombine.low %v482_v20, %v5989_v60  ;;  %9692 = vst [vmem:[#allocation62_spill] sm:$0xff] %v6452_v57  ;;  %v490_v20 = vld [vmem:[#allocation2 + $0xdc] sm:$0xf] }
  0xa9   : > { %999 = vrot.lane.b32.xlu0 %v6367_v15, %s5604_s10  ;;  %v6467_v47 = vcombine.low %v490_v20, %v6017_v48  ;;  %v498_v20 = vld [vmem:[#allocation2 + $0x10c] sm:$0xf] }
  0xab   : > { %1001 = vrot.lane.b32.xlu1 %v6373_v16, %s5604_s10  ;;  %9696 = vst [vmem:[#allocation66_spill] sm:$0xff] %v6467_v47 }
  0xad   : > { %1003 = vrot.lane.b32.xlu0 %v6378_v40, %s5604_s10 }
  0xaf   : > { %1005 = vrot.lane.b32.xlu1 %v6384_v30, %s5604_s10 }
  0xb1   : > { %1007 = vrot.lane.b32.xlu0 %v6389_v33, %s5604_s10 }
  0xb3   : > { %1009 = vrot.lane.b32.xlu1 %v6395_v28, %s5604_s10 }
  0xb5   : > { %1011 = vrot.lane.b32.xlu0 %v6400_v29, %s5604_s10 }
  0xb7   : > { %1013 = vrot.lane.b32.xlu1 %v6406_v34, %s5604_s10 }
  0xb8   : > { %v6434_v49 = vpop.permute.xlu1 %802 }
  0xb9   : > { %1015 = vrot.lane.b32.xlu0 %v6411_v35, %s5604_s10  ;;  %9690 = vst [vmem:[#allocation60_spill] sm:$0xff] %v6434_v49  ;;  %v520_v49 = vld [vmem:[#allocation2 + $0x18c] sm:$0xf] }
  0xba   : > { %v6439_v7 = vpop.permute.xlu0 %800 }
  0xbb   : > { %1017 = vrot.lane.b32.xlu1 %v6417_v38, %s5604_s10 }
  0xbc   : > { %v6449_v55 = vpop.permute.xlu1 %804 }
  0xbd   : > { %1019 = vrot.lane.b32.xlu0 %v6424_v43, %s5604_s10  ;;  %9691 = vst [vmem:[#allocation61_spill] sm:$0xff] %v6449_v55 }
  0xbe   : > { %v6454_v60 = vpop.permute.xlu0 %806 }
  0xbf   : > { %1021 = vrot.lane.b32.xlu1 %v6430_v44, %s5604_s10  ;;  %9693 = vst [vmem:[#allocation63_spill] sm:$0xff] %v6454_v60  ;;  %v6475_v60 = vcombine.low %v6027_v58, %v6027_v58 }
  0xc0   : > { %v6464_v8 = vpop.permute.xlu1 %808 }
  0xc1   : > { %1023 = vrot.lane.b32.xlu0 %v6437_v62, %s5604_s10  ;;  %9695 = vst [vmem:[#allocation65_spill] sm:$0xff] %v6464_v8  ;;  %9698 = vst [vmem:[#allocation68_spill] sm:$0xff] %v6475_v60  ;;  %v6482_v8 = vcombine.low %v494_v54, %v6037_v24  ;;  %v502_v54 = vld [vmem:[#allocation2 + $0x124] sm:$0xf] }
  0xc2   : > { %v6469_v31 = vpop.permute.xlu0 %810 }
  0xc3   : > { %1025 = vrot.lane.b32.xlu1 %v6445_v3, %s5604_s10  ;;  %9697 = vst [vmem:[#allocation67_spill] sm:$0xff] %v6469_v31  ;;  %9700 = vst [vmem:[#allocation70_spill] sm:$0xff] %v6482_v8  ;;  %v6490_v31 = vcombine.low %v6039_v0, %v6039_v0 }
  0xc4   : > { %v6479_v41 = vpop.permute.xlu1 %812 }
  0xc5   : > { %1027 = vrot.lane.b32.xlu0 %v6452_v57, %s5604_s10  ;;  %9699 = vst [vmem:[#allocation69_spill] sm:$0xff] %v6479_v41  ;;  %9702 = vst [vmem:[#allocation72_spill] sm:$0xff] %v6490_v31  ;;  %v6497_v41 = vcombine.low %v498_v20, %v6044_v45  ;;  %v506_v45 = vld [vmem:[#allocation2 + $0x13c] sm:$0xf]  ;;  %v6516_v20 = vcombine.low %v6127_v63, %v6127_v63  ;;  %v6535_v63 = vcombine.low %v6135_v39, %v6135_v39 }
  0xc6   : > { %v6484_v48 = vpop.permute.xlu0 %814 }
  0xc7   : > { %1029 = vrot.lane.b32.xlu1 %v6460_v12, %s5604_s10  ;;  %9701 = vst [vmem:[#allocation71_spill] sm:$0xff] %v6484_v48  ;;  %9704 = vst [vmem:[#allocation74_spill] sm:$0xff] %v6497_v41  ;;  %v6505_v48 = vcombine.low %v6050_v50, %v6050_v50  ;;  %v6525_v50 = vcombine.low %v506_v45, %v6133_v9 }
  0xc8   : > { %v6494_v58 = vpop.permute.xlu1 %816  ;;  %9709 = vst [vmem:[#allocation79_spill] sm:$0xff] %v6516_v20  ;;  %9714 = vst [vmem:[#allocation84_spill] sm:$0xff] %v6535_v63 }
  0xc9   : > { %1031 = vrot.lane.b32.xlu0 %v6467_v47, %s5604_s10  ;;  %9703 = vst [vmem:[#allocation73_spill] sm:$0xff] %v6494_v58  ;;  %9706 = vst [vmem:[#allocation76_spill] sm:$0xff] %v6505_v48  ;;  %v6512_v58 = vcombine.low %v502_v54, %v6125_v11  ;;  %v510_v11 = vld [vmem:[#allocation2 + $0x154] sm:$0xf] }
  0xca   : > { %v6499_v24 = vpop.permute.xlu0 %818  ;;  %9711 = vst [vmem:[#allocation81_spill] sm:$0xff] %v6525_v50 }
  0xcb   : > { %1033 = vrot.lane.b32.xlu1 %v6475_v60, %s5604_s10  ;;  %9705 = vst [vmem:[#allocation75_spill] sm:$0xff] %v6499_v24  ;;  %9708 = vst [vmem:[#allocation78_spill] sm:$0xff] %v6512_v58 }
  0xcc   : > { %v6509_v0 = vpop.permute.xlu1 %820 }
  0xcd   : > { %1035 = vrot.lane.b32.xlu0 %v6482_v8, %s5604_s10  ;;  %9707 = vst [vmem:[#allocation77_spill] sm:$0xff] %v6509_v0 }
  0xcf   : > { %1037 = vrot.lane.b32.xlu1 %v6490_v31, %s5604_s10 }
  0xd1   : > { %1039 = vrot.lane.b32.xlu0 %v6497_v41, %s5604_s10 }
  0xd2   : > { %v6518_v24 = vpop.permute.xlu0 %822 }
  0xd3   : > { %9710 = vst [vmem:[#allocation80_spill] sm:$0xff] %v6518_v24  ;;  %1041 = vrot.lane.b32.xlu1 %v6505_v48, %s5604_s10  ;;  %v6538_v24 = vcombine.low %v510_v11, %v6141_v42  ;;  %v518_v42 = vld [vmem:[#allocation2 + $0x184] sm:$0xf]  ;;  %v519_v11 = vld [vmem:[#allocation2 + $0x188] sm:$0xf] }
  0xd4   : > { %v6527_v0 = vpop.permute.xlu1 %824 }
  0xd5   : > { %1043 = vrot.lane.b32.xlu0 %v6512_v58, %s5604_s10  ;;  %9712 = vst [vmem:[#allocation82_spill] sm:$0xff] %v6527_v0  ;;  %9715 = vst [vmem:[#allocation85_spill] sm:$0xff] %v6538_v24  ;;  %v6550_v0 = vcombine.low %v6149_v46, %v6149_v46  ;;  %v6565_v46 = vcombine.low %v6161_v1, %v6161_v1  ;;  %v9743_v58 = vld [vmem:[#allocation39_spill] sm:$0xff] }
  0xd7   : > { %v6529_v54 = vpop.permute.xlu0 %826  ;;  %1045 = vrot.lane.b32.xlu1 %v6516_v20, %s5604_s10  ;;  %9717 = vst [vmem:[#allocation87_spill] sm:$0xff] %v6550_v0  ;;  %9721 = vst [vmem:[#allocation91_spill] sm:$0xff] %v6565_v46 }
  0xd8   : > { %9713 = vst [vmem:[#allocation83_spill] sm:$0xff] %v6529_v54  ;;  %v514_v54 = vld [vmem:[#allocation2 + $0x16c] sm:$0xf] }
  0xd9   : > { %1047 = vrot.lane.b32.xlu0 %v6525_v50, %s5604_s10  ;;  %v6542_v9 = vpop.permute.xlu1 %828  ;;  %v6557_v55 = vcombine.low %v514_v54, %v6151_v27  ;;  %v6577_v27 = vcombine.low %v520_v49, %v520_v49 }
  0xda   : > { %9716 = vst [vmem:[#allocation86_spill] sm:$0xff] %v6542_v9 }
  0xdb   : > { %v6544_v45 = vpop.permute.xlu0 %927  ;;  %1049 = vrot.lane.b32.xlu1 %v6535_v63, %s5604_s10  ;;  %9719 = vst [vmem:[#allocation89_spill] sm:$0xff] %v6557_v55  ;;  %v6571_v63 = vcombine.low %v518_v42, %v519_v11  ;;  %9725 = vst [vmem:[#allocation95_spill] sm:$0xff] %v6577_v27 }
  0xdd   : > { %1051 = vrot.lane.b32.xlu0 %v6538_v24, %s5604_s10  ;;  %v6554_v39 = vpop.permute.xlu1 %929  ;;  %9723 = vst [vmem:[#allocation93_spill] sm:$0xff] %v6571_v63 }
  0xde   : > { %9718 = vst [vmem:[#allocation88_spill] sm:$0xff] %v6554_v39 }
  0xdf   : > { %v6559_v9 = vpop.permute.xlu0 %931  ;;  %1053 = vrot.lane.b32.xlu1 %v6550_v0, %s5604_s10 }
  0xe0   : > { %9720 = vst [vmem:[#allocation90_spill] sm:$0xff] %v6559_v9 }
  0xe1   : > { %1055 = vrot.lane.b32.xlu0 %v6557_v55, %s5604_s10  ;;  %v6569_v24 = vpop.permute.xlu1 %933 }
  0xe2   : > { %9722 = vst [vmem:[#allocation92_spill] sm:$0xff] %v6569_v24 }
  0xe3   : > { %v6573_v50 = vpop.permute.xlu0 %935  ;;  %1057 = vrot.lane.b32.xlu1 %v6565_v46, %s5604_s10  ;;  %v9730_v46 = vld [vmem:[#allocation26_spill] sm:$0xff] }
  0xe4   : > { %9724 = vst [vmem:[#allocation94_spill] sm:$0xff] %v6573_v50  ;;  %v9739_v50 = vld [vmem:[#allocation36_spill] sm:$0xff] }
  0xe5   : > { %1059 = vrot.lane.b32.xlu0 %v6571_v63, %s5604_s10  ;;  %v6581_v54 = vpop.permute.xlu1 %937  ;;  %v9731_v63 = vld [vmem:[#allocation27_spill] sm:$0xff] }
  0xe6   : > { %9726 = vst [vmem:[#allocation96_spill] sm:$0xff] %v6581_v54  ;;  %v9735_v54 = vld [vmem:[#allocation29_spill] sm:$0xff] }
  0xe7   : > { %v6583_v1 = vpop.permute.xlu0 %939  ;;  %1061 = vrot.lane.b32.xlu1 %v6577_v27, %s5604_s10  ;;  %v9734_v27 = vld [vmem:[#allocation28_spill] sm:$0xff] }
  0xe8   : > { %9727 = vst [vmem:[#allocation97_spill] sm:$0xff] %v6583_v1 }
  0xe9   : > { %1072 = vrot.lane.b32.xlu0 %v5998_v17, %s5605_s11  ;;  %v6589_v42 = vpop.permute.xlu1 %941 }
  0xea   : > { %9728 = vst [vmem:[#allocation98_spill] sm:$0xff] %v6589_v42 }
  0xeb   : > { %v6591_v55 = vpop.permute.xlu0 %943  ;;  %1074 = vrot.lane.b32.xlu1 %v9730_v46, %s5605_s11 }
  0xec   : > { %9729 = vst [vmem:[#allocation99_spill] sm:$0xff] %v6591_v55  ;;  %v9738_v55 = vld [vmem:[#allocation30_spill] sm:$0xff] }
  0xed   : > { %1076 = vrot.lane.b32.xlu0 %v9731_v63, %s5605_s11  ;;  %v6597_v0 = vpop.permute.xlu1 %945 }
  0xee   : > { %9732 = vst [vmem:[#allocation26_spill] sm:$0xff] %v6597_v0  ;;  %v6615_v0 = vcombine.low %v519_v11, %v520_v49  ;;  %v9748_v11 = vld [vmem:[#allocation43_spill] sm:$0xff] }
  0xef   : > { %v6599_v1 = vpop.permute.xlu0 %947  ;;  %1078 = vrot.lane.b32.xlu1 %v9734_v27, %s5605_s11 }
  0xf0   : > { %9733 = vst [vmem:[#allocation27_spill] sm:$0xff] %v6599_v1  ;;  %9741 = vst [vmem:[#allocation36_spill] sm:$0xff] %v6615_v0  ;;  %v1065_v24 = vshrl.u32 %v6615_v0, 16  ;;  %v1068_v49 = vshll.u32 %v6615_v0, 16 }
  0xf1   : > { %1080 = vrot.lane.b32.xlu0 %v9735_v54, %s5605_s11  ;;  %v6605_v17 = vpop.permute.xlu1 %949 }
  0xf2   : > { %9736 = vst [vmem:[#allocation28_spill] sm:$0xff] %v6605_v17  ;;  %v1070_v9 = vrot.slane %v1068_v49, 5 }
  0xf3   : > { %v6607_v42 = vpop.permute.xlu0 %951  ;;  %1082 = vrot.lane.b32.xlu1 %v9738_v55, %s5605_s11 }
  0xf4   : > { %9737 = vst [vmem:[#allocation29_spill] sm:$0xff] %v6607_v42 }
  0xf5   : > { %1084 = vrot.lane.b32.xlu0 %v9739_v50, %s5605_s11  ;;  %v6613_v20 = vpop.permute.xlu1 %953 }
  0xf6   : > { %9740 = vst [vmem:[#allocation30_spill] sm:$0xff] %v6613_v20 }
  0xf7   : > { %v6617_v1 = vpop.permute.xlu0 %955  ;;  %1086 = vrot.lane.b32.xlu1 %v9743_v58, %s5605_s11 }
  0xf8   : > { %9742 = vst [vmem:[#allocation100_spill] sm:$0xff] %v6617_v1 }
  0xf9   : > { %1088 = vrot.lane.b32.xlu0 %v9744_v2, %s5605_s11  ;;  %v6623_v17 = vpop.permute.xlu1 %957 }
  0xfa   : > { %9745 = vst [vmem:[#allocation39_spill] sm:$0xff] %v6623_v17  ;;  %v1067_v17 = vrot.slane %v1065_v24, 4 }
  0xfb   : > { %v6625_v42 = vpop.permute.xlu0 %959  ;;  %1090 = vrot.lane.b32.xlu1 %v9747_v25, %s5605_s11 }
  0xfc   : > { %9746 = vst [vmem:[#allocation41_spill] sm:$0xff] %v6625_v42  ;;  %v6647_v0 = vor.u32 %v1070_v9, %v1067_v17 }
  0xfd   : > { %1092 = vrot.lane.b32.xlu0 %v9748_v11, %s5605_s11  ;;  %v6633_v1 = vpop.permute.xlu1 %961 }
  0xfe   : > { %9749 = vst [vmem:[#allocation42_spill] sm:$0xff] %v6633_v1  ;;  %9753 = vst [vmem:[#allocation103_spill] sm:$0xff] %v6647_v0 }
  0xff   : > { %v6635_v20 = vpop.permute.xlu0 %963  ;;  %1094 = vrot.lane.b32.xlu1 %v6171_v6, %s5605_s11 }
 0x100   : > { %9750 = vst [vmem:[#allocation43_spill] sm:$0xff] %v6635_v20 }
 0x101   : > { %1096 = vrot.lane.b32.xlu0 %v6175_v5, %s5605_s11  ;;  %v6641_v42 = vpop.permute.xlu1 %965 }
 0x102   : > { %9751 = vst [vmem:[#allocation101_spill] sm:$0xff] %v6641_v42 }
 0x103   : > { %v6643_v39 = vpop.permute.xlu0 %967  ;;  %1098 = vrot.lane.b32.xlu1 %v6179_v61, %s5605_s11 }
 0x104   : > { %9752 = vst [vmem:[#allocation102_spill] sm:$0xff] %v6643_v39 }
 0x105   : > { %1100 = vrot.lane.b32.xlu0 %v6183_v21, %s5605_s11  ;;  %v6651_v20 = vpop.permute.xlu1 %969 }
 0x106   : > { %9754 = vst [vmem:[#allocation104_spill] sm:$0xff] %v6651_v20 }
 0x107   : > { %v6653_v1 = vpop.permute.xlu0 %971  ;;  %1102 = vrot.lane.b32.xlu1 %v6647_v0, %s5605_s11 }
 0x108   : > { %9755 = vst [vmem:[#allocation105_spill] sm:$0xff] %v6653_v1 }
 0x109   : > { %1110 = vrot.lane.b32.xlu0 %v6193_v18, %s5606_s12  ;;  %v6659_v24 = vpop.permute.xlu1 %973 }
 0x10a   : > { %9756 = vst [vmem:[#allocation106_spill] sm:$0xff] %v6659_v24 }
 0x10b   : > { %v6661_v49 = vpop.permute.xlu0 %975  ;;  %1112 = vrot.lane.b32.xlu1 %v6198_v10, %s5606_s12 }
 0x10c   : > { %9757 = vst [vmem:[#allocation107_spill] sm:$0xff] %v6661_v49 }
 0x10d   : > { %1114 = vrot.lane.b32.xlu0 %v6203_v4, %s5606_s12  ;;  %v6667_v9 = vpop.permute.xlu1 %977 }
 0x10e   : > { %9758 = vst [vmem:[#allocation108_spill] sm:$0xff] %v6667_v9 }
 0x10f   : > { %v6669_v17 = vpop.permute.xlu0 %979  ;;  %1116 = vrot.lane.b32.xlu1 %v6209_v36, %s5606_s12 }
 0x110   : > { %9759 = vst [vmem:[#allocation109_spill] sm:$0xff] %v6669_v17  ;;  %v5525_v17 = vld [vmem:[%s9460_s1 + $0x10] ss:$0 sps:$4 sm:$0x33]  }
 0x111   : > { %1118 = vrot.lane.b32.xlu0 %v6217_v23, %s5606_s12  ;;  %v6675_v18 = vpop.permute.xlu1 %981  ;;  %5464 = vmatprep.subr.msk.bf16.mxu0 %vm2178_vm2, %v5525_v17 }
 0x112   : > { %9760 = vst [vmem:[#allocation110_spill] sm:$0xff] %v6675_v18 }
 0x113   : > { %v6677_v24 = vpop.permute.xlu0 %983  ;;  %1120 = vrot.lane.b32.xlu1 %v6230_v56, %s5606_s12 }
 0x114   : > { %9761 = vst [vmem:[#allocation111_spill] sm:$0xff] %v6677_v24  ;;  %v2180_v24 = vsel %vm2178_vm2, %v5525_v17, 0 }
 0x115   : > { %1122 = vrot.lane.b32.xlu0 %v6235_v37, %s5606_s12  ;;  %v6683_v10 = vpop.permute.xlu1 %985  ;;  %5349 = vmatpush3.bf16.msra.mxu0 %v2180_v24  ;;  %v5527_v24 = vld [vmem:[%s9460_s1] sm:$0xff]  }
 0x116   : > { %9762 = vst [vmem:[#allocation112_spill] sm:$0xff] %v6683_v10  ;;  %v5526_v10 = vld [vmem:[%s9460_s1 + $0x8] sm:$0xff]  }
 0x117   : > { %v6688_v9 = vpop.permute.xlu0 %987  ;;  %1182 = vrot.lane.b32.xlu1 %v6378_v40, %s5607_s15  ;;  %5350 = vmatprep.subr.bf16.mxu0 %v5526_v10 }
 0x118   : > { %9763 = vst [vmem:[#allocation113_spill] sm:$0xff] %v6688_v9 }
 0x119   : > { %1184 = vrot.lane.b32.xlu0 %v6384_v30, %s5607_s15  ;;  %v6696_v18 = vpop.permute.xlu1 %989  ;;  %5351 = vmatpush3.bf16.msra.mxu0 %v5526_v10 }
 0x11a   : > { %9764 = vst [vmem:[#allocation114_spill] sm:$0xff] %v6696_v18  ;;  %5352 = vmatprep.subr.bf16.mxu0 %v5527_v24 }
 0x11b   : > { %v6701_v9 = vpop.permute.xlu0 %999  ;;  %1186 = vrot.lane.b32.xlu1 %v6389_v33, %s5607_s15 }
 0x11d   : > { %1188 = vrot.lane.b32.xlu0 %v6395_v28, %s5607_s15  ;;  %v6707_v17 = vpop.permute.xlu1 %1001  ;;  %5353 = vmatpush3.bf16.msra.mxu0 %v5527_v24 }
 0x11f   : > { %v6712_v18 = vpop.permute.xlu0 %1003  ;;  %1255 = vrot.lane.b32.xlu1 %v9730_v46, %s5608_s20 }
 0x121   : > { %1257 = vrot.lane.b32.xlu0 %v9731_v63, %s5608_s20  ;;  %v6718_v49 = vpop.permute.xlu1 %1005 }
 0x123   : > { %v6720_v1 = vpop.permute.xlu0 %1007  ;;  %1293 = vrot.lane.b32.xlu1 %v6203_v4, %s5609_s21 }
 0x125   : > { %1295 = vrot.lane.b32.xlu0 %v6209_v36, %s5609_s21  ;;  %v6726_v10 = vpop.permute.xlu1 %1009 }
 0x127   : > { %v6728_v20 = vpop.permute.xlu0 %1011  ;;  %1297 = vrot.lane.b32.xlu1 %v6217_v23, %s5609_s21 }
 0x129   : > { %1299 = vrot.lane.b32.xlu0 %v6230_v56, %s5609_s21  ;;  %v6734_v63 = vpop.permute.xlu1 %1013 }
 0x12b   : > { %v6736_v46 = vpop.permute.xlu0 %1015  ;;  %1124 = vrot.lane.b32.xlu1 %v6241_v14, %s5606_s12 }
 0x12d   : > { %1190 = vrot.lane.b32.xlu0 %v6400_v29, %s5607_s15  ;;  %v6742_v4 = vpop.permute.xlu1 %1017 }
 0x12f   : > { %v6744_v36 = vpop.permute.xlu0 %1019  ;;  %1192 = vrot.lane.b32.xlu1 %v6406_v34, %s5607_s15 }
 0x131   : > { %1194 = vrot.lane.b32.xlu0 %v6411_v35, %s5607_s15  ;;  %v6750_v23 = vpop.permute.xlu1 %1021 }
 0x133   : > { %v6752_v56 = vpop.permute.xlu0 %1023  ;;  %1196 = vrot.lane.b32.xlu1 %v6417_v38, %s5607_s15 }
 0x135   : > { %1259 = vrot.lane.b32.xlu0 %v9734_v27, %s5608_s20  ;;  %v6758_v24 = vpop.permute.xlu1 %1025 }
 0x136   : > { %9765 = vst [vmem:[#allocation115_spill] sm:$0xff] %v6758_v24 }
 0x137   : > { %v6760_v39 = vpop.permute.xlu0 %1027  ;;  %1261 = vrot.lane.b32.xlu1 %v9735_v54, %s5608_s20 }
 0x139   : > { %1301 = vrot.lane.b32.xlu0 %v6235_v37, %s5609_s21  ;;  %v6766_v42 = vpop.permute.xlu1 %1029 }
 0x13a   : > { %9766 = vst [vmem:[#allocation116_spill] sm:$0xff] %v6766_v42  ;;  %v9800_v42 = vld [vmem:[#allocation51_spill] sm:$0xff] }
 0x13b   : > { %v6768_v0 = vpop.permute.xlu0 %1031  ;;  %1303 = vrot.lane.b32.xlu1 %v6241_v14, %s5609_s21 }
 0x13c   : > { %9767 = vst [vmem:[#allocation117_spill] sm:$0xff] %v6768_v0 }
 0x13d   : > { %1305 = vrot.lane.b32.xlu0 %v6246_v13, %s5609_s21  ;;  %v6774_v27 = vpop.permute.xlu1 %1033 }
 0x13e   : > { %9768 = vst [vmem:[#allocation118_spill] sm:$0xff] %v6774_v27 }
 0x13f   : > { %v6776_v24 = vpop.permute.xlu0 %1035  ;;  %1307 = vrot.lane.b32.xlu1 %v6252_v52, %s5609_s21 }
 0x140   : > { %9769 = vst [vmem:[#allocation119_spill] sm:$0xff] %v6776_v24  ;;  %v9774_v24 = vld [vmem:[#allocation46_spill] sm:$0xff] }
 0x141   : > { %1126 = vrot.lane.b32.xlu0 %v6246_v13, %s5606_s12  ;;  %v6782_v37 = vpop.permute.xlu1 %1037 }
 0x142   : > { %9770 = vst [vmem:[#allocation120_spill] sm:$0xff] %v6782_v37 }
 0x143   : > { %v6784_v54 = vpop.permute.xlu0 %1039  ;;  %1128 = vrot.lane.b32.xlu1 %v6252_v52, %s5606_s12 }
 0x144   : > { %9771 = vst [vmem:[#allocation121_spill] sm:$0xff] %v6784_v54 }
 0x145   : > { %1130 = vrot.lane.b32.xlu0 %v6257_v19, %s5606_s12  ;;  %v6790_v14 = vpop.permute.xlu1 %1041 }
 0x146   : > { %9772 = vst [vmem:[#allocation122_spill] sm:$0xff] %v6790_v14 }
 0x147   : > { %v6792_v27 = vpop.permute.xlu0 %1043  ;;  %1132 = vrot.lane.b32.xlu1 %v9774_v24, %s5606_s12 }
 0x148   : > { %9773 = vst [vmem:[#allocation123_spill] sm:$0xff] %v6792_v27 }
 0x149   : > { %1198 = vrot.lane.b32.xlu0 %v6424_v43, %s5607_s15  ;;  %v6798_v13 = vpop.permute.xlu1 %1045 }
 0x14a   : > { %9775 = vst [vmem:[#allocation46_spill] sm:$0xff] %v6798_v13 }
 0x14b   : > { %v6800_v37 = vpop.permute.xlu0 %1047  ;;  %1200 = vrot.lane.b32.xlu1 %v6430_v44, %s5607_s15 }
 0x14c   : > { %9776 = vst [vmem:[#allocation124_spill] sm:$0xff] %v6800_v37 }
 0x14d   : > { %1202 = vrot.lane.b32.xlu0 %v6437_v62, %s5607_s15  ;;  %v6806_v52 = vpop.permute.xlu1 %1049 }
 0x14e   : > { %9777 = vst [vmem:[#allocation125_spill] sm:$0xff] %v6806_v52 }
 0x14f   : > { %v6808_v14 = vpop.permute.xlu0 %1051  ;;  %1204 = vrot.lane.b32.xlu1 %v6445_v3, %s5607_s15 }
 0x150   : > { %9778 = vst [vmem:[#allocation126_spill] sm:$0xff] %v6808_v14 }
 0x151   : > { %1263 = vrot.lane.b32.xlu0 %v9738_v55, %s5608_s20  ;;  %v6814_v27 = vpop.permute.xlu1 %1053 }
 0x152   : > { %9779 = vst [vmem:[#allocation127_spill] sm:$0xff] %v6814_v27 }
 0x153   : > { %v6816_v13 = vpop.permute.xlu0 %1055  ;;  %1265 = vrot.lane.b32.xlu1 %v9739_v50, %s5608_s20 }
 0x154   : > { %9780 = vst [vmem:[#allocation128_spill] sm:$0xff] %v6816_v13  ;;  %v9784_v13 = vld [vmem:[#allocation47_spill] sm:$0xff] }
 0x155   : > { %1309 = vrot.lane.b32.xlu0 %v6257_v19, %s5609_s21  ;;  %v6822_v37 = vpop.permute.xlu1 %1057 }
 0x156   : > { %9781 = vst [vmem:[#allocation129_spill] sm:$0xff] %v6822_v37 }
 0x157   : > { %v6824_v52 = vpop.permute.xlu0 %1059  ;;  %1311 = vrot.lane.b32.xlu1 %v9774_v24, %s5609_s21 }
 0x158   : > { %9782 = vst [vmem:[#allocation130_spill] sm:$0xff] %v6824_v52  ;;  %v9785_v52 = vld [vmem:[#allocation48_spill] sm:$0xff] }
 0x159   : > { %1313 = vrot.lane.b32.xlu0 %v6268_v59, %s5609_s21  ;;  %v6830_v55 = vpop.permute.xlu1 %1061 }
 0x15a   : > { %9783 = vst [vmem:[#allocation131_spill] sm:$0xff] %v6830_v55 }
 0x15b   : > { %v6832_v27 = vpop.permute.xlu0 %1072  ;;  %1315 = vrot.lane.b32.xlu1 %v9784_v13, %s5609_s21 }
 0x15d   : > { %1134 = vrot.lane.b32.xlu0 %v6268_v59, %s5606_s12  ;;  %v6838_v19 = vpop.permute.xlu1 %1074 }
 0x15f   : > { %v6840_v50 = vpop.permute.xlu0 %1076  ;;  %1136 = vrot.lane.b32.xlu1 %v9784_v13, %s5606_s12 }
 0x161   : > { %1138 = vrot.lane.b32.xlu0 %v6279_v26, %s5606_s12  ;;  %v6846_v24 = vpop.permute.xlu1 %1078 }
 0x163   : > { %v6848_v55 = vpop.permute.xlu0 %1080  ;;  %1140 = vrot.lane.b32.xlu1 %v9785_v52, %s5606_s12 }
 0x165   : > { %1206 = vrot.lane.b32.xlu0 %v6452_v57, %s5607_s15  ;;  %v6854_v59 = vpop.permute.xlu1 %1082 }
 0x167   : > { %v6856_v37 = vpop.permute.xlu0 %1084  ;;  %1208 = vrot.lane.b32.xlu1 %v6460_v12, %s5607_s15 }
 0x169   : > { %1210 = vrot.lane.b32.xlu0 %v6467_v47, %s5607_s15  ;;  %v6862_v13 = vpop.permute.xlu1 %1086 }
 0x16a   : > { %9786 = vst [vmem:[#allocation47_spill] sm:$0xff] %v6862_v13 }
 0x16b   : > { %v6864_v14 = vpop.permute.xlu0 %1088  ;;  %1212 = vrot.lane.b32.xlu1 %v6475_v60, %s5607_s15  ;;  %v5580_v60 = vld [vmem:[#allocation2 + $0x8] sm:$0xf] }
 0x16c   : > { %9787 = vst [vmem:[#allocation48_spill] sm:$0xff] %v6864_v14 }
 0x16d   : > { %1267 = vrot.lane.b32.xlu0 %v9743_v58, %s5608_s20  ;;  %v6870_v54 = vpop.permute.xlu1 %1090 }
 0x16e   : > { %9788 = vst [vmem:[#allocation132_spill] sm:$0xff] %v6870_v54 }
 0x16f   : > { %v6872_v0 = vpop.permute.xlu0 %1092  ;;  %1269 = vrot.lane.b32.xlu1 %v9744_v2, %s5608_s20 }
 0x170   : > { %9789 = vst [vmem:[#allocation133_spill] sm:$0xff] %v6872_v0  ;;  %v9794_v0 = vld [vmem:[#allocation49_spill] sm:$0xff] }
 0x171   : > { %1317 = vrot.lane.b32.xlu0 %v6279_v26, %s5609_s21  ;;  %v6878_v47 = vpop.permute.xlu1 %1094 }
 0x172   : > { %9790 = vst [vmem:[#allocation134_spill] sm:$0xff] %v6878_v47 }
 0x173   : > { %v6880_v12 = vpop.permute.xlu0 %1096  ;;  %1319 = vrot.lane.b32.xlu1 %v9785_v52, %s5609_s21 }
 0x174   : > { %9791 = vst [vmem:[#allocation135_spill] sm:$0xff] %v6880_v12 }
 0x175   : > { %1321 = vrot.lane.b32.xlu0 %v6290_v22, %s5609_s21  ;;  %v6886_v58 = vpop.permute.xlu1 %1098 }
 0x176   : > { %9792 = vst [vmem:[#allocation136_spill] sm:$0xff] %v6886_v58  ;;  %v9796_v58 = vld [vmem:[#allocation50_spill] sm:$0xff] }
 0x177   : > { %v6888_v54 = vpop.permute.xlu0 %1100  ;;  %1323 = vrot.lane.b32.xlu1 %v9794_v0, %s5609_s21 }
 0x178   : > { %9793 = vst [vmem:[#allocation137_spill] sm:$0xff] %v6888_v54 }
 0x179   : > { %1142 = vrot.lane.b32.xlu0 %v6290_v22, %s5606_s12  ;;  %v6894_v26 = vpop.permute.xlu1 %1102 }
 0x17a   : > { %9795 = vst [vmem:[#allocation49_spill] sm:$0xff] %v6894_v26  ;;  %v454_v26 = vld [vmem:[#allocation2 + $0x4] sm:$0xf] }
 0x17b   : > { %v1111_v2 = vpop.permute.xlu0 %1110  ;;  %1144 = vrot.lane.b32.xlu1 %v9794_v0, %s5606_s12  ;;  %v5004_v14 = vcombine.low %v454_v26, %v5580_v60  ;;  %v9799_v26 = vld [vmem:[#allocation92_spill] sm:$0xff] }
 0x17d   : > { %1146 = vrot.lane.b32.xlu0 %v6301_v32, %s5606_s12  ;;  %v1113_v52 = vpop.permute.xlu1 %1112 }
 0x17f   : > { %v1115_v12 = vpop.permute.xlu0 %1114  ;;  %1148 = vrot.lane.b32.xlu1 %v9796_v58, %s5606_s12 }
 0x181   : > { %1214 = vrot.lane.b32.xlu0 %v6482_v8, %s5607_s15  ;;  %v1117_v54 = vpop.permute.xlu1 %1116 }
 0x183   : > { %v6904_v47 = vpop.permute.xlu0 %1118  ;;  %1216 = vrot.lane.b32.xlu1 %v6490_v31, %s5607_s15  ;;  %v5581_v31 = vld [vmem:[#allocation2 + $0xc] sm:$0xf] }
 0x185   : > { %1218 = vrot.lane.b32.xlu0 %v6497_v41, %s5607_s15  ;;  %v6910_v22 = vpop.permute.xlu1 %1120  ;;  %v5005_v41 = vcombine.low %v5581_v31, %v5581_v31 }
 0x187   : > { %v6912_v0 = vpop.permute.xlu0 %1122  ;;  %1220 = vrot.lane.b32.xlu1 %v6505_v48, %s5607_s15  ;;  %v1360_v48 = vsel %vm1357_vm3, %v5004_v14, %v6419_v51  ;;  %v1362_v60 = vsel %vm1357_vm3, %v5005_v41, %v6419_v51  ;;  %v9797_v41 = vld [vmem:[#allocation88_spill] sm:$0xff] }
 0x188   : > { %v1440_v31 = vsel %vm1438_vm4, %v1360_v48, %v6544_v45  ;;  %v1442_v48 = vsel %vm1438_vm4, %v1362_v60, %v9797_v41  ;;  %v9798_v45 = vld [vmem:[#allocation90_spill] sm:$0xff] }
 0x189   : > { %1271 = vrot.lane.b32.xlu0 %v9747_v25, %s5608_s20  ;;  %v1183_v8 = vpop.permute.xlu1 %1182  ;;  %v1505_v14 = vsel %vm1503_vm5, %v1440_v31, %v6701_v9 }
 0x18b   : > { %v1185_v57 = vpop.permute.xlu0 %1184  ;;  %1273 = vrot.lane.b32.xlu1 %v9748_v11, %s5608_s20  ;;  %v1367_v11 = vsel %vm1357_vm3, %v6373_v16, %v6439_v7  ;;  %v1507_v16 = vsel %vm1503_vm5, %v1442_v48, %v6707_v17 }
 0x18d   : > { %1325 = vrot.lane.b32.xlu0 %v6301_v32, %s5609_s21  ;;  %v1187_v13 = vpop.permute.xlu1 %1186  ;;  %v1365_v32 = vsel %vm1357_vm3, %v6367_v15, %v6439_v7  ;;  %v1570_v15 = vsel %vm1568_vm6, %v1505_v14, %v6832_v27  ;;  %v1446_v7 = vsel %vm1438_vm4, %v1367_v11, %v9799_v26  ;;  %v1571_v14 = vsel %vm1568_vm6, %v1507_v16, %v6832_v27 }
 0x18e   : > { %v1619_v9 = vsel %vm1617_vm7, %v1570_v15, %v1111_v2  ;;  %v1621_v41 = vsel %vm1617_vm7, %v1571_v14, %v1113_v52 }
 0x18f   : > { %v1189_v25 = vpop.permute.xlu0 %1188  ;;  %1327 = vrot.lane.b32.xlu1 %v9796_v58, %s5609_s21  ;;  %v1444_v58 = vsel %vm1438_vm4, %v1365_v32, %v9798_v45  ;;  %v1511_v32 = vsel %vm1503_vm5, %v1446_v7, %v6718_v49  ;;  %v1684_v11 = vsel %vm1682_vm8, %v1619_v9, %v1183_v8  ;;  %v1686_v8 = vsel %vm1682_vm8, %v1621_v41, %v1185_v57 }
 0x190   : > { %v1509_v60 = vsel %vm1503_vm5, %v1444_v58, %v6712_v18  ;;  %v1574_v2 = vsel %vm1568_vm6, %v1511_v32, %v6838_v19 }
 0x191   : > { %1329 = vrot.lane.b32.xlu0 %v6312_v53, %s5609_s21  ;;  %v1256_v51 = vpop.permute.xlu1 %1255  ;;  %v1573_v17 = vsel %vm1568_vm6, %v1509_v60, %v6838_v19  ;;  %v1625_v27 = vsel %vm1617_vm7, %v1574_v2, %v1117_v54  ;;  %v9802_v2 = vld [vmem:[#allocation53_spill] sm:$0xff] }
 0x192   : > { %v1749_v48 = vsel %vm1747_vm9, %v1684_v11, %v1256_v51  ;;  %v1623_v49 = vsel %vm1617_vm7, %v1573_v17, %v1115_v12  ;;  %v1750_v19 = vsel %vm1747_vm9, %v1686_v8, %v1256_v51 }
 0x193   : > { %v1258_v31 = vpop.permute.xlu0 %1257  ;;  %1331 = vrot.lane.b32.xlu1 %v9800_v42, %s5609_s21  ;;  %v1688_v58 = vsel %vm1682_vm8, %v1623_v49, %v1187_v13  ;;  %v9801_v13 = vld [vmem:[#allocation52_spill] sm:$0xff] }
 0x194   : > { %v1752_v12 = vsel %vm1747_vm9, %v1688_v58, %v1258_v31 }
 0x195   : > { %1150 = vrot.lane.b32.xlu0 %v6312_v53, %s5606_s12  ;;  %v1294_v18 = vpop.permute.xlu1 %1293  ;;  %v1690_v53 = vsel %vm1682_vm8, %v1625_v27, %v1189_v25 }
 0x196   : > { %v1798_v45 = vsel %vm1796_vm10, %v1749_v48, %v1294_v18  ;;  %v1753_v60 = vsel %vm1747_vm9, %v1690_v53, %v1258_v31  ;;  %v9803_v31 = vld [vmem:[#allocation78_spill] sm:$0xff]  ;;  %v9804_v53 = vld [vmem:[#allocation79_spill] sm:$0xff] }
 0x197   : > { %v1862_v15 = vshrl.u32 %v1798_v45, 16  ;;  %v1865_v52 = vshll.u32 %v1798_v45, 16  ;;  %v1296_v26 = vpop.permute.xlu0 %1295  ;;  %1152 = vrot.lane.b32.xlu1 %v9800_v42, %s5606_s12 }
 0x198   : > { %v1800_v54 = vsel %vm1796_vm10, %v1750_v19, %v1296_v26 }
 0x199   : > { %v1864_v7 = vrot.slane %v1862_v15, 3  ;;  %v1867_v57 = vrot.slane %v1865_v52, 4  ;;  %v1869_v16 = vshrl.u32 %v1800_v54, 16  ;;  %v1872_v9 = vshll.u32 %v1800_v54, 16  ;;  %1154 = vrot.lane.b32.xlu0 %v9801_v13, %s5606_s12  ;;  %v1298_v51 = vpop.permute.xlu1 %1297 }
 0x19a   : > { %v1802_v32 = vsel %vm1796_vm10, %v1752_v12, %v1298_v51  ;;  %v9806_v51 = vld [vmem:[#allocation84_spill] sm:$0xff] }
 0x19b   : > { %v1871_v14 = vrot.slane %v1869_v16, 3  ;;  %v1874_v42 = vrot.slane %v1872_v9, 4  ;;  %v1877_v11 = vshrl.u32 %v1802_v32, 16  ;;  %v1880_v25 = vshll.u32 %v1802_v32, 16  ;;  %v1300_v17 = vpop.permute.xlu0 %1299  ;;  %1156 = vrot.lane.b32.xlu1 %v9802_v2, %s5606_s12 }
 0x19c   : > { %v1804_v41 = vsel %vm1796_vm10, %v1753_v60, %v1300_v17  ;;  %v1868_v48 = vor.u32 %v1867_v57, %v1864_v7  ;;  %v9805_v7 = vld [vmem:[#allocation81_spill] sm:$0xff]  ;;  %v9807_v60 = vld [vmem:[#allocation60_spill] sm:$0xff] }
 0x19d   : > { %v1879_v18 = vrot.slane %v1877_v11, 3  ;;  %v1882_v49 = vrot.slane %v1880_v25, 4  ;;  %v1884_v27 = vshrl.u32 %v1804_v41, 16  ;;  %v1887_v8 = vshll.u32 %v1804_v41, 16  ;;  %1222 = vrot.lane.b32.xlu0 %v9803_v31, %s5607_s15  ;;  %v1125_v45 = vpop.permute.xlu1 %1124 }
 0x19e   : > { %v1875_v58 = vor.u32 %v1874_v42, %v1871_v14  ;;  %v1370_v32 = vsel %vm1357_vm3, %v6378_v40, %v9807_v60  ;;  %v9808_v42 = vld [vmem:[#allocation94_spill] sm:$0xff]  ;;  %v1372_v25 = vsel %vm1357_vm3, %v6384_v30, %v9807_v60 }
 0x19f   : > { %v1883_v19 = vor.u32 %v1882_v49, %v1879_v18  ;;  %v1886_v15 = vrot.slane %v1884_v27, 3  ;;  %v1889_v52 = vrot.slane %v1887_v8, 4  ;;  %v1191_v26 = vpop.permute.xlu0 %1190  ;;  %1224 = vrot.lane.b32.xlu1 %v9804_v53, %s5607_s15  ;;  %v1448_v11 = vsel %vm1438_vm4, %v1370_v32, %v9808_v42  ;;  %v9811_v27 = vld [vmem:[#allocation97_spill] sm:$0xff]  ;;  %v9813_v42 = vld [vmem:[#allocation54_spill] sm:$0xff] }
 0x1a0   : > { %v1876_v12 = vsel %vm1861_vm11, %v1868_v48, %v1875_v58  ;;  %v1513_v17 = vsel %vm1503_vm5, %v1448_v11, %v6720_v1  ;;  %v9809_v48 = vld [vmem:[#allocation61_spill] sm:$0xff]  ;;  %v9812_v58 = vld [vmem:[#allocation98_spill] sm:$0xff] }
 0x1a1   : > { %v1890_v54 = vor.u32 %v1889_v52, %v1886_v15  ;;  %5354 = vmatprep.mubr.msk.bf16.mxu0 %vm2129_vm12, %v1876_v12  ;;  %1226 = vrot.lane.b32.xlu0 %v9805_v7, %s5607_s15  ;;  %v1193_v57 = vpop.permute.xlu1 %1192  ;;  %v1375_v40 = vsel %vm1357_vm3, %v6389_v33, %v9809_v48  ;;  %v1576_v49 = vsel %vm1568_vm6, %v1513_v17, %v6840_v50 }
 0x1a2   : > { %v1377_v30 = vsel %vm1357_vm3, %v6395_v28, %v9809_v48  ;;  %v1452_v1 = vsel %vm1438_vm4, %v1375_v40, %v9811_v27  ;;  %v1627_v8 = vsel %vm1617_vm7, %v1576_v49, %v6904_v47 }
 0x1a3   : > { %v1195_v16 = vpop.permute.xlu0 %1194  ;;  %v1891_v9 = vsel %vm1861_vm11, %v1883_v19, %v1890_v54  ;;  %1228 = vrot.lane.b32.xlu1 %v9806_v51, %s5607_s15  ;;  %v1454_v19 = vsel %vm1438_vm4, %v1377_v30, %v9812_v58  ;;  %v1517_v15 = vsel %vm1503_vm5, %v1452_v1, %v6728_v20  ;;  %v1692_v52 = vsel %vm1682_vm8, %v1627_v8, %v1191_v26 }
 0x1a4   : > { %5355 = vmatmul.mubr.msk.bf16.vlgmr.msra.gmra.mxu0 %vm2129_vm12, %v1891_v9  ;;  %v1579_v47 = vsel %vm1568_vm6, %v1517_v15, %v6846_v24 }
 0x1a5   : > { %1275 = vrot.lane.b32.xlu0 %v6171_v6, %s5608_s20  ;;  %v1197_v14 = vpop.permute.xlu1 %1196  ;;  %v9810_v6 = vld [vmem:[#allocation96_spill] sm:$0xff] }
 0x1a6   : > { %v1450_v18 = vsel %vm1438_vm4, %v1372_v25, %v9810_v6 }
 0x1a7   : > { %v1260_v41 = vpop.permute.xlu0 %1259  ;;  %1277 = vrot.lane.b32.xlu1 %v6175_v5, %s5608_s20  ;;  %v1515_v5 = vsel %vm1503_vm5, %v1450_v18, %v6726_v10  ;;  %v1519_v10 = vsel %vm1503_vm5, %v1454_v19, %v6734_v63 }
 0x1a8   : > { %v1577_v28 = vsel %vm1568_vm6, %v1515_v5, %v6840_v50  ;;  %v1755_v12 = vsel %vm1747_vm9, %v1692_v52, %v1260_v41  ;;  %v1580_v20 = vsel %vm1568_vm6, %v1519_v10, %v6846_v24  ;;  %v1631_v50 = vsel %vm1617_vm7, %v1579_v47, %v6912_v0  ;;  %v9815_v47 = vld [vmem:[#allocation56_spill] sm:$0xff] }
 0x1a9   : > { %1333 = vrot.lane.b32.xlu0 %v9801_v13, %s5609_s21  ;;  %v1262_v33 = vpop.permute.xlu1 %1261  ;;  %v1629_v13 = vsel %vm1617_vm7, %v1577_v28, %v6910_v22  ;;  %v1696_v9 = vsel %vm1682_vm8, %v1631_v50, %v1195_v16  ;;  %v1633_v11 = vsel %vm1617_vm7, %v1580_v20, %v1125_v45  ;;  %v9814_v16 = vld [vmem:[#allocation55_spill] sm:$0xff] }
 0x1aa   : > { %v1694_v63 = vsel %vm1682_vm8, %v1629_v13, %v1193_v57  ;;  %v1758_v24 = vsel %vm1747_vm9, %v1696_v9, %v1262_v33 }
 0x1ab   : > { %v1302_v54 = vpop.permute.xlu0 %1301  ;;  %1335 = vrot.lane.b32.xlu1 %v9802_v2, %s5609_s21  ;;  %v1756_v22 = vsel %vm1747_vm9, %v1694_v63, %v1260_v41  ;;  %v1698_v41 = vsel %vm1682_vm8, %v1633_v11, %v1197_v14  ;;  %v9816_v63 = vld [vmem:[#allocation57_spill] sm:$0xff] }
 0x1ac   : > { %v1806_v26 = vsel %vm1796_vm10, %v1755_v12, %v1302_v54  ;;  %v1759_v18 = vsel %vm1747_vm9, %v1698_v41, %v1262_v33 }
 0x1ad   : > { %v1892_v60 = vshrl.u32 %v1806_v26, 16  ;;  %v1895_v32 = vshll.u32 %v1806_v26, 16  ;;  %1337 = vrot.lane.b32.xlu0 %v9813_v42, %s5609_s21  ;;  %v1304_v2 = vpop.permute.xlu1 %1303  ;;  %v9817_v26 = vld [vmem:[#allocation85_spill] sm:$0xff] }
 0x1ae   : > { %v1808_v0 = vsel %vm1796_vm10, %v1756_v22, %v1304_v2 }
 0x1af   : > { %v1894_v25 = vrot.slane %v1892_v60, 3  ;;  %v1897_v57 = vrot.slane %v1895_v32, 4  ;;  %v1899_v17 = vshrl.u32 %v1808_v0, 16  ;;  %v1902_v48 = vshll.u32 %v1808_v0, 16  ;;  %v1306_v40 = vpop.permute.xlu0 %1305  ;;  %1339 = vrot.lane.b32.xlu1 %v9814_v16, %s5609_s21  ;;  %v9818_v32 = vld [vmem:[#allocation87_spill] sm:$0xff] }
 0x1b0   : > { %v1810_v6 = vsel %vm1796_vm10, %v1758_v24, %v1306_v40  ;;  %v9820_v24 = vld [vmem:[#allocation91_spill] sm:$0xff] }
 0x1b1   : > { %v1901_v49 = vrot.slane %v1899_v17, 3  ;;  %v1904_v45 = vrot.slane %v1902_v48, 4  ;;  %v1907_v30 = vshrl.u32 %v1810_v6, 16  ;;  %1158 = vrot.lane.b32.xlu0 %v9813_v42, %s5606_s12  ;;  %v1308_v27 = vpop.permute.xlu1 %1307  ;;  %v1898_v1 = vor.u32 %v1897_v57, %v1894_v25  ;;  %v9819_v42 = vld [vmem:[#allocation89_spill] sm:$0xff]  ;;  %v9821_v0 = vld [vmem:[#allocation63_spill] sm:$0xff] }
 0x1b2   : > { %v1910_v5 = vshll.u32 %v1810_v6, 16  ;;  %v1812_v8 = vsel %vm1796_vm10, %v1759_v18, %v1308_v27  ;;  %v1380_v25 = vsel %vm1357_vm3, %v6400_v29, %v9821_v0  ;;  %v9822_v17 = vld [vmem:[#allocation99_spill] sm:$0xff]  ;;  %v1382_v40 = vsel %vm1357_vm3, %v6406_v34, %v9821_v0  ;;  %v9823_v6 = vld [vmem:[#allocation65_spill] sm:$0xff]  ;;  %v9826_v27 = vld [vmem:[#allocation28_spill] sm:$0xff] }
 0x1b3   : > { %v1905_v58 = vor.u32 %v1904_v45, %v1901_v49  ;;  %v1909_v19 = vrot.slane %v1907_v30, 3  ;;  %v1914_v15 = vshrl.u32 %v1812_v8, 16  ;;  %v1917_v28 = vshll.u32 %v1812_v8, 16  ;;  %v1127_v14 = vpop.permute.xlu0 %1126  ;;  %1160 = vrot.lane.b32.xlu1 %v9814_v16, %s5606_s12  ;;  %v9825_v45 = vld [vmem:[#allocation27_spill] sm:$0xff] }
 0x1b4   : > { %v1912_v33 = vrot.slane %v1910_v5, 4  ;;  %v1456_v48 = vsel %vm1438_vm4, %v1380_v25, %v9822_v17  ;;  %v1385_v29 = vsel %vm1357_vm3, %v6411_v35, %v9823_v6  ;;  %v1387_v34 = vsel %vm1357_vm3, %v6417_v38, %v9823_v6  ;;  %v524_v25 = vld [vmem:[#allocation2 + $0x1a4] sm:$0xf] }
 0x1b5   : > { %v1916_v52 = vrot.slane %v1914_v15, 3  ;;  %v1919_v10 = vrot.slane %v1917_v28, 4  ;;  %1162 = vrot.lane.b32.xlu0 %v9815_v47, %s5606_s12  ;;  %v1129_v13 = vpop.permute.xlu1 %1128  ;;  %v1906_v12 = vsel %vm1861_vm11, %v1898_v1, %v1905_v58  ;;  %v1521_v16 = vsel %vm1503_vm5, %v1456_v48, %v6736_v46 }
 0x1b6   : > { %5358 = vmatprep.mubr.msk.bf16.mxu0 %vm2129_vm12, %v1906_v12  ;;  %v1913_v54 = vor.u32 %v1912_v33, %v1909_v19  ;;  %v1582_v49 = vsel %vm1568_vm6, %v1521_v16, %v6848_v55  ;;  %v1460_v46 = vsel %vm1438_vm4, %v1385_v29, %v9825_v45  ;;  %v1462_v1 = vsel %vm1438_vm4, %v1387_v34, %v9826_v27  ;;  %v5528_v33 = vld [vmem:[#allocation2 + $0x190] ss:$0 sps:$4 sm:$0xff]  }
 0x1b7   : > { %v1920_v20 = vor.u32 %v1919_v10, %v1916_v52  ;;  %v1131_v50 = vpop.permute.xlu0 %1130  ;;  %1164 = vrot.lane.b32.xlu1 %v9816_v63, %s5606_s12  ;;  %v1635_v30 = vsel %vm1617_vm7, %v1582_v49, %v1127_v14  ;;  %v1525_v5 = vsel %vm1503_vm5, %v1460_v46, %v6744_v36  ;;  %v9827_v12 = vld [vmem:[#allocation58_spill] sm:$0xff]  ;;  %v523_v49 = vld [vmem:[#allocation2 + $0x1a0] sm:$0xf] }
 0x1b8   : > { %v1585_v58 = vsel %vm1568_vm6, %v1525_v5, %v6854_v59  ;;  %v7154_v46 = vcombine.low %v523_v49, %v524_v25 }
 0x1b9   : > { %1230 = vrot.lane.b32.xlu0 %v9817_v26, %s5607_s15  ;;  %v1133_v9 = vpop.permute.xlu1 %1132  ;;  %v1921_v22 = vsel %vm1861_vm11, %v1913_v54, %v1920_v20 }
 0x1ba   : > { %5359 = vmatmul.mubr.msk.bf16.gmra.mxu0 %vm2129_vm12, %v1921_v22 }
 0x1bb   : > { %v1199_v60 = vpop.permute.xlu0 %1198  ;;  %1232 = vrot.lane.b32.xlu1 %v9818_v32, %s5607_s15 }
 0x1bc   : > { %v1700_v8 = vsel %vm1682_vm8, %v1635_v30, %v1199_v60 }
 0x1bd   : > { %1234 = vrot.lane.b32.xlu0 %v9819_v42, %s5607_s15  ;;  %v1201_v2 = vpop.permute.xlu1 %1200 }
 0x1bf   : > { %v1203_v11 = vpop.permute.xlu0 %1202  ;;  %1236 = vrot.lane.b32.xlu1 %v9820_v24, %s5607_s15 }
 0x1c1   : > { %1279 = vrot.lane.b32.xlu0 %v6179_v61, %s5608_s20  ;;  %v1205_v57 = vpop.permute.xlu1 %1204  ;;  %v9824_v61 = vld [vmem:[#allocation26_spill] sm:$0xff] }
 0x1c2   : > { %v1458_v18 = vsel %vm1438_vm4, %v1382_v40, %v9824_v61  ;;  %v9829_v40 = vld [vmem:[#allocation36_spill] sm:$0xff] }
 0x1c3   : > { %v1264_v41 = vpop.permute.xlu0 %1263  ;;  %1281 = vrot.lane.b32.xlu1 %v6183_v21, %s5608_s20  ;;  %v1523_v21 = vsel %vm1503_vm5, %v1458_v18, %v6742_v4  ;;  %v1527_v4 = vsel %vm1503_vm5, %v1462_v1, %v6750_v23  ;;  %v7148_v16 = vrot.slane %v9829_v40, 5 }
 0x1c4   : > { %v1583_v38 = vsel %vm1568_vm6, %v1523_v21, %v6848_v55  ;;  %v1761_v15 = vsel %vm1747_vm9, %v1700_v8, %v1264_v41  ;;  %v1586_v36 = vsel %vm1568_vm6, %v1527_v4, %v6854_v59  ;;  %v1639_v55 = vsel %vm1617_vm7, %v1585_v58, %v1131_v50 }
 0x1c5   : > { %1341 = vrot.lane.b32.xlu0 %v9815_v47, %s5609_s21  ;;  %v1266_v35 = vpop.permute.xlu1 %1265  ;;  %v1637_v19 = vsel %vm1617_vm7, %v1583_v38, %v1129_v13  ;;  %v1704_v52 = vsel %vm1682_vm8, %v1639_v55, %v1203_v11  ;;  %v1641_v20 = vsel %vm1617_vm7, %v1586_v36, %v1133_v9  ;;  %v9828_v11 = vld [vmem:[#allocation59_spill] sm:$0xff]  ;;  %v1108_v9 = vrot.slane %v5528_v33, 5  ;;  %v9830_v33 = vld [vmem:[#allocation93_spill] sm:$0xff] }
 0x1c6   : > { %v1702_v14 = vsel %vm1682_vm8, %v1637_v19, %v1201_v2  ;;  %v1764_v59 = vsel %vm1747_vm9, %v1704_v52, %v1266_v35  ;;  %v1706_v17 = vsel %vm1682_vm8, %v1641_v20, %v1205_v57 }
 0x1c7   : > { %v1310_v28 = vpop.permute.xlu0 %1309  ;;  %1343 = vrot.lane.b32.xlu1 %v9816_v63, %s5609_s21  ;;  %v1762_v10 = vsel %vm1747_vm9, %v1702_v14, %v1264_v41  ;;  %v1765_v41 = vsel %vm1747_vm9, %v1706_v17, %v1266_v35  ;;  %v1109_v38 = vsel %vm878_vm1, %v7148_v16, %v1108_v9  ;;  %v1248_v14 = vshrl.u32 %v7154_v46, 16  ;;  %v9835_v9 = vld [vmem:[#allocation69_spill] sm:$0xff] }
 0x1c8   : > { %v1814_v23 = vsel %vm1796_vm10, %v1761_v15, %v1310_v28  ;;  %v522_v15 = vld [vmem:[#allocation2 + $0x19c] sm:$0xf] }
 0x1c9   : > { %v1922_v47 = vshrl.u32 %v1814_v23, 16  ;;  %v1925_v13 = vshll.u32 %v1814_v23, 16  ;;  %1345 = vrot.lane.b32.xlu0 %v9827_v12, %s5609_s21  ;;  %v1312_v54 = vpop.permute.xlu1 %1311  ;;  %v1251_v23 = vshll.u32 %v7154_v46, 16  ;;  %v1250_v20 = vrot.slane %v1248_v14, 4 }
 0x1ca   : > { %v1816_v50 = vsel %vm1796_vm10, %v1762_v10, %v1312_v54  ;;  %v5073_v54 = vcombine.low %v524_v25, %v524_v25 }
 0x1cb   : > { %v1924_v63 = vrot.slane %v1922_v47, 3  ;;  %v1927_v22 = vrot.slane %v1925_v13, 4  ;;  %v1929_v60 = vshrl.u32 %v1816_v50, 16  ;;  %v1932_v2 = vshll.u32 %v1816_v50, 16  ;;  %v1314_v0 = vpop.permute.xlu0 %1313  ;;  %1347 = vrot.lane.b32.xlu1 %v9828_v11, %s5609_s21 }
 0x1cc   : > { %v1818_v48 = vsel %vm1796_vm10, %v1764_v59, %v1314_v0  ;;  %v5072_v47 = vcombine.low %v522_v15, %v523_v49  ;;  %v1253_v59 = vrot.slane %v1251_v23, 5  ;;  %v9841_v15 = vld [vmem:[#allocation47_spill] sm:$0xff] }
 0x1cd   : > { %v1931_v6 = vrot.slane %v1929_v60, 3  ;;  %v1934_v29 = vrot.slane %v1932_v2, 4  ;;  %v1937_v61 = vshrl.u32 %v1818_v48, 16  ;;  %1166 = vrot.lane.b32.xlu0 %v9827_v12, %s5606_s12  ;;  %v1316_v18 = vpop.permute.xlu1 %1315  ;;  %v1928_v34 = vor.u32 %v1927_v22, %v1924_v63  ;;  %v9831_v12 = vld [vmem:[#allocation95_spill] sm:$0xff]  ;;  %v5532_v60 = vld [vmem:[#allocation2 + $0x1a8] ss:$0 sps:$4 sm:$0xff]  }
 0x1ce   : > { %v1940_v45 = vshll.u32 %v1818_v48, 16  ;;  %v1820_v57 = vsel %vm1796_vm10, %v1765_v41, %v1316_v18  ;;  %v1254_v22 = vor.u32 %v1253_v59, %v1250_v20  ;;  %v9832_v2 = vld [vmem:[#allocation67_spill] sm:$0xff]  ;;  %v9834_v48 = vld [vmem:[#allocation29_spill] sm:$0xff]  ;;  %v1395_v41 = vsel %vm1357_vm3, %v6437_v62, %v9835_v9  ;;  %v9836_v18 = vld [vmem:[#allocation30_spill] sm:$0xff] }
 0x1cf   : > { %v1935_v21 = vor.u32 %v1934_v29, %v1931_v6  ;;  %v1939_v30 = vrot.slane %v1937_v61, 3  ;;  %v1944_v27 = vshrl.u32 %v1820_v57, 16  ;;  %v1947_v1 = vshll.u32 %v1820_v57, 16  ;;  %v1135_v5 = vpop.permute.xlu0 %1134  ;;  %1168 = vrot.lane.b32.xlu1 %v9828_v11, %s5606_s12  ;;  %v9833_v11 = vld [vmem:[#allocation103_spill] sm:$0xff] }
 0x1d0   : > { %v1942_v35 = vrot.slane %v1940_v45, 4  ;;  %v1390_v0 = vsel %vm1357_vm3, %v6424_v43, %v9832_v2  ;;  %v1392_v40 = vsel %vm1357_vm3, %v6430_v44, %v9832_v2  ;;  %v1291_v43 = vrot.slane %v5532_v60, 5  ;;  %v9838_v45 = vld [vmem:[#allocation39_spill] sm:$0xff] }
 0x1d1   : > { %v1946_v8 = vrot.slane %v1944_v27, 3  ;;  %v1949_v4 = vrot.slane %v1947_v1, 4  ;;  %1170 = vrot.lane.b32.xlu0 %v7148_v16, %s5606_s12  ;;  %v1137_v58 = vpop.permute.xlu1 %1136  ;;  %v1936_v19 = vsel %vm1861_vm11, %v1928_v34, %v1935_v21  ;;  %v1464_v25 = vsel %vm1438_vm4, %v1390_v0, %v9834_v48  ;;  %v9837_v34 = vld [vmem:[#allocation100_spill] sm:$0xff]  ;;  %v9839_v57 = vld [vmem:[#allocation115_spill] sm:$0xff] }
 0x1d2   : > { %5362 = vmatprep.mubr.msk.bf16.mxu0 %vm2129_vm12, %v1936_v19  ;;  %v1943_v28 = vor.u32 %v1942_v35, %v1939_v30  ;;  %v1529_v6 = vsel %vm1503_vm5, %v1464_v25, %v6752_v56  ;;  %v1397_v61 = vsel %vm1357_vm3, %v6445_v3, %v9835_v9  ;;  %v1466_v49 = vsel %vm1438_vm4, %v1392_v40, %v9836_v18  ;;  %v9840_v35 = vld [vmem:[#allocation116_spill] sm:$0xff] }
 0x1d3   : > { %v1950_v36 = vor.u32 %v1949_v4, %v1946_v8  ;;  %v1139_v55 = vpop.permute.xlu0 %1138  ;;  %1172 = vrot.lane.b32.xlu1 %v1109_v38, %s5606_s12  ;;  %v1468_v44 = vsel %vm1438_vm4, %v1395_v41, %v9837_v34  ;;  %v1588_v62 = vsel %vm1568_vm6, %v1529_v6, %v6856_v37  ;;  %v1470_v56 = vsel %vm1438_vm4, %v1397_v61, %v9838_v45 }
 0x1d4   : > { %v1531_v21 = vsel %vm1503_vm5, %v1466_v49, %v9839_v57  ;;  %v1643_v30 = vsel %vm1617_vm7, %v1588_v62, %v1135_v5  ;;  %v1290_v27 = vrot.slane %v7154_v46, 5  ;;  %v1533_v1 = vsel %vm1503_vm5, %v1468_v44, %v6760_v39 }
 0x1d5   : > { %1238 = vrot.lane.b32.xlu0 %v9830_v33, %s5607_s15  ;;  %v1141_v52 = vpop.permute.xlu1 %1140  ;;  %v1951_v10 = vsel %vm1861_vm11, %v1943_v28, %v1950_v36  ;;  %v1535_v8 = vsel %vm1503_vm5, %v1470_v56, %v9840_v35  ;;  %v1589_v4 = vsel %vm1568_vm6, %v1531_v21, %v6856_v37  ;;  %v1591_v5 = vsel %vm1568_vm6, %v1533_v1, %v9841_v15 }
 0x1d6   : > { %5363 = vmatmul.mubr.msk.bf16.gmra.mxu0 %vm2129_vm12, %v1951_v10  ;;  %v1645_v28 = vsel %vm1617_vm7, %v1589_v4, %v1137_v58  ;;  %v1292_v39 = vsel %vm878_vm1, %v1290_v27, %v1291_v43  ;;  %v1592_v46 = vsel %vm1568_vm6, %v1535_v8, %v9841_v15  ;;  %v1647_v14 = vsel %vm1617_vm7, %v1591_v5, %v1139_v55 }
 0x1d7   : > { %v1207_v13 = vpop.permute.xlu0 %1206  ;;  %1240 = vrot.lane.b32.xlu1 %v9831_v12, %s5607_s15  ;;  %v9842_v25 = vmov 0  }
 0x1d8   : > { %v1708_v19 = vsel %vm1682_vm8, %v1643_v30, %v1207_v13  ;;  %v1649_v13 = vsel %vm1617_vm7, %v1592_v46, %v1141_v52  ;;  %2690 = vst.msk [vmem:[#allocation3 + $0x38] sm:$0xf] %vm2675_vm13, %v9842_v25  ;;  %2677 = vst.msk [vmem:[#allocation3 + $0x4] sm:$0xf] %vm2675_vm13, %v9842_v25 }
 0x1d9   : > { %1242 = vrot.lane.b32.xlu0 %v5072_v47, %s5607_s15  ;;  %v1209_v50 = vpop.permute.xlu1 %1208  ;;  %2678 = vst.msk [vmem:[#allocation3 + $0x8] sm:$0xf] %vm2675_vm13, %v9842_v25  ;;  %2679 = vst.msk [vmem:[#allocation3 + $0xc] sm:$0xf] %vm2675_vm13, %v9842_v25 }
 0x1da   : > { %v1710_v37 = vsel %vm1682_vm8, %v1645_v28, %v1209_v50  ;;  %2680 = vst.msk [vmem:[#allocation3 + $0x10] sm:$0xf] %vm2675_vm13, %v9842_v25  ;;  %2683 = vst.msk [vmem:[#allocation3 + $0x1c] sm:$0xf] %vm2675_vm13, %v9842_v25 }
 0x1db   : > { %v1211_v63 = vpop.permute.xlu0 %1210  ;;  %1244 = vrot.lane.b32.xlu1 %v5073_v54, %s5607_s15  ;;  %2684 = vst.msk [vmem:[#allocation3 + $0x20] sm:$0xf] %vm2675_vm13, %v9842_v25  ;;  %2685 = vst.msk [vmem:[#allocation3 + $0x24] sm:$0xf] %vm2675_vm13, %v9842_v25 }
 0x1dc   : > { %v1712_v33 = vsel %vm1682_vm8, %v1647_v14, %v1211_v63  ;;  %2686 = vst.msk [vmem:[#allocation3 + $0x28] sm:$0xf] %vm2675_vm13, %v9842_v25  ;;  %2689 = vst.msk [vmem:[#allocation3 + $0x34] sm:$0xf] %vm2675_vm13, %v9842_v25 }
 0x1dd   : > { %1283 = vrot.lane.b32.xlu0 %v9833_v11, %s5608_s20  ;;  %v1213_v17 = vpop.permute.xlu1 %1212  ;;  %2691 = vst.msk [vmem:[#allocation3 + $0x3c] sm:$0xf] %vm2675_vm13, %v9842_v25  ;;  %2692 = vst.msk [vmem:[#allocation3 + $0x40] sm:$0xf] %vm2675_vm13, %v9842_v25 }
 0x1de   : > { %2695 = vst.msk [vmem:[#allocation3 + $0x4c] sm:$0xf] %vm2675_vm13, %v9842_v25  ;;  %2696 = vst.msk [vmem:[#allocation3 + $0x50] sm:$0xf] %vm2675_vm13, %v9842_v25 }
 0x1df   : > { %v1268_v29 = vpop.permute.xlu0 %1267  ;;  %1285 = vrot.lane.b32.xlu1 %v1254_v22, %s5608_s20  ;;  %v1714_v22 = vsel %vm1682_vm8, %v1649_v13, %v1213_v17  ;;  %2697 = vst.msk [vmem:[#allocation3 + $0x54] sm:$0xf] %vm2675_vm13, %v9842_v25  ;;  %2698 = vst.msk [vmem:[#allocation3 + $0x58] sm:$0xf] %vm2675_vm13, %v9842_v25  ;;  %v9848_v13 = vld [vmem:[#allocation73_spill] sm:$0xff] }
 0x1e0   : > { %v1768_v58 = vsel %vm1747_vm9, %v1710_v37, %v1268_v29  ;;  %2701 = vst.msk [vmem:[#allocation3 + $0x64] sm:$0xf] %vm2675_vm13, %v9842_v25  ;;  %2702 = vst.msk [vmem:[#allocation3 + $0x68] sm:$0xf] %vm2675_vm13, %v9842_v25  ;;  %v9845_v37 = vld [vmem:[#allocation41_spill] sm:$0xff] }
 0x1e1   : > { %1349 = vrot.lane.b32.xlu0 %v7148_v16, %s5609_s21  ;;  %v1270_v3 = vpop.permute.xlu1 %1269  ;;  %v1767_v16 = vsel %vm1747_vm9, %v1708_v19, %v1268_v29  ;;  %2703 = vst.msk [vmem:[#allocation3 + $0x6c] sm:$0xf] %vm2675_vm13, %v9842_v25  ;;  %2704 = vst.msk [vmem:[#allocation3 + $0x70] sm:$0xf] %vm2675_vm13, %v9842_v25 }
 0x1e2   : > { %v1770_v12 = vsel %vm1747_vm9, %v1712_v33, %v1270_v3  ;;  %v7242_v52 = vsel %vm1747_vm9, %v1714_v22, %v1270_v3  ;;  %2707 = vst.msk [vmem:[#allocation3 + $0x7c] sm:$0xf] %vm2675_vm13, %v9842_v25  ;;  %2708 = vst.msk [vmem:[#allocation3 + $0x80] sm:$0xf] %vm2675_vm13, %v9842_v25  ;;  %v2946_v3 = vld [vmem:[#allocation3 + $0x8] sm:$0xf] }
 0x1e3   : > { %v1318_v36 = vpop.permute.xlu0 %1317  ;;  %1351 = vrot.lane.b32.xlu1 %v1109_v38, %s5609_s21  ;;  %2709 = vst.msk [vmem:[#allocation3 + $0x84] sm:$0xf] %vm2675_vm13, %v9842_v25  ;;  %2710 = vst.msk [vmem:[#allocation3 + $0x88] sm:$0xf] %vm2675_vm13, %v9842_v25  ;;  %v9846_v33 = vld [vmem:[#allocation64_spill] sm:$0xff] }
 0x1e4   : > { %v1822_v23 = vsel %vm1796_vm10, %v1767_v16, %v1318_v36  ;;  %2713 = vst.msk [vmem:[#allocation3 + $0x94] sm:$0xf] %vm2675_vm13, %v9842_v25  ;;  %2714 = vst.msk [vmem:[#allocation3 + $0x98] sm:$0xf] %vm2675_vm13, %v9842_v25  ;;  %v9843_v36 = vld [vmem:[#allocation71_spill] sm:$0xff] }
 0x1e5   : > { %v1952_v10 = vshrl.u32 %v1822_v23, 16  ;;  %v1955_v47 = vshll.u32 %v1822_v23, 16  ;;  %1353 = vrot.lane.b32.xlu0 %v1290_v27, %s5609_s21  ;;  %v1320_v38 = vpop.permute.xlu1 %1319  ;;  %2715 = vst.msk [vmem:[#allocation3 + $0x9c] sm:$0xf] %vm2675_vm13, %v9842_v25  ;;  %2716 = vst.msk [vmem:[#allocation3 + $0xa0] sm:$0xf] %vm2675_vm13, %v9842_v25 }
 0x1e6   : > { %v1824_v54 = vsel %vm1796_vm10, %v1768_v58, %v1320_v38  ;;  %2719 = vst.msk [vmem:[#allocation3 + $0xac] sm:$0xf] %vm2675_vm13, %v9842_v25  ;;  %2720 = vst.msk [vmem:[#allocation3 + $0xb0] sm:$0xf] %vm2675_vm13, %v9842_v25  ;;  %v2947_v27 = vld [vmem:[#allocation3 + $0xc] sm:$0xf]  ;;  %v1402_v58 = vsel %vm1357_vm3, %v9846_v33, %v9843_v36 }
 0x1e7   : > { %v7232_v55 = vrot.slane %v1952_v10, 3  ;;  %v7234_v20 = vrot.slane %v1955_v47, 4  ;;  %v1959_v59 = vshrl.u32 %v1824_v54, 16  ;;  %v1962_v50 = vshll.u32 %v1824_v54, 16  ;;  %v1322_v63 = vpop.permute.xlu0 %1321  ;;  %1355 = vrot.lane.b32.xlu1 %v1292_v39, %s5609_s21  ;;  %2721 = vst.msk [vmem:[#allocation3 + $0xb4] sm:$0xf] %vm2675_vm13, %v9842_v25 }
 0x1e8   : > { %v7239_v60 = vsel %vm1796_vm10, %v1770_v12, %v1322_v63  ;;  %2722 = vst.msk [vmem:[#allocation3 + $0xb8] sm:$0xf] %vm2675_vm13, %v9842_v25  ;;  %2725 = vst.msk [vmem:[#allocation3 + $0xc4] sm:$0xf] %vm2675_vm13, %v9842_v25  ;;  %v7409_v1 = vcombine.low %v2946_v3, %v2947_v27  ;;  %v9844_v39 = vld [vmem:[#allocation62_spill] sm:$0xff]  ;;  %v9847_v10 = vld [vmem:[#allocation117_spill] sm:$0xff] }
 0x1e9   : > { %v7244_v2 = vrot.slane %v1959_v59, 3  ;;  %v7246_v0 = vrot.slane %v1962_v50, 4  ;;  %v1967_v11 = vshrl.u32 %v7239_v60, 16  ;;  %v7249_v48 = vpop.permute.xlu1 %1323  ;;  %2726 = vst.msk [vmem:[#allocation3 + $0xc8] sm:$0xf] %vm2675_vm13, %v9842_v25  ;;  %v1958_v17 = vor.u32 %v7234_v20, %v7232_v55  ;;  %v9849_v12 = vld [vmem:[#allocation66_spill] sm:$0xff] }
 0x1ea   : > { %2727 = vst.msk [vmem:[#allocation3 + $0xcc] sm:$0xf] %vm2675_vm13, %v9842_v25  ;;  %2728 = vst.msk [vmem:[#allocation3 + $0xd0] sm:$0xf] %vm2675_vm13, %v9842_v25  ;;  %v1970_v40 = vshll.u32 %v7239_v60, 16  ;;  %v1828_v9 = vsel %vm1796_vm10, %v7242_v52, %v7249_v48  ;;  %v3162_v8 = vshrl.u32 %v7409_v1, 16  ;;  %v1400_v46 = vsel %vm1357_vm3, %v9844_v39, %v9843_v36 }
 0x1eb   : > { %2731 = vst.msk [vmem:[#allocation3 + $0xdc] sm:$0xf] %vm2675_vm13, %v9842_v25  ;;  %2732 = vst.msk [vmem:[#allocation3 + $0xe0] sm:$0xf] %vm2675_vm13, %v9842_v25  ;;  %v1965_v41 = vor.u32 %v7246_v0, %v7244_v2  ;;  %v1969_v6 = vrot.slane %v1967_v11, 3  ;;  %v1974_v29 = vshrl.u32 %v1828_v9, 16  ;;  %v1143_v61 = vpop.permute.xlu0 %1142  ;;  %v1472_v23 = vsel %vm1438_vm4, %v1400_v46, %v9845_v37 }
 0x1ec   : > { %2733 = vst.msk [vmem:[#allocation3 + $0xe4] sm:$0xf] %vm2675_vm13, %v9842_v25  ;;  %2734 = vst.msk [vmem:[#allocation3 + $0xe8] sm:$0xf] %vm2675_vm13, %v9842_v25  ;;  %v1977_v43 = vshll.u32 %v1828_v9, 16  ;;  %v1972_v18 = vrot.slane %v1970_v40, 4  ;;  %v1537_v47 = vsel %vm1503_vm5, %v1472_v23, %v9847_v10  ;;  %v1405_v54 = vsel %vm1357_vm3, %v9849_v12, %v9848_v13 }
 0x1ed   : > { %2737 = vst.msk [vmem:[#allocation3 + $0xf4] sm:$0xf] %vm2675_vm13, %v9842_v25  ;;  %2738 = vst.msk [vmem:[#allocation3 + $0xf8] sm:$0xf] %vm2675_vm13, %v9842_v25  ;;  %v1976_v49 = vrot.slane %v1974_v29, 3  ;;  %v1145_v44 = vpop.permute.xlu1 %1144  ;;  %v1966_v62 = vsel %vm1861_vm11, %v1958_v17, %v1965_v41  ;;  %v3165_v4 = vshll.u32 %v7409_v1, 16 }
 0x1ee   : > { %2739 = vst.msk [vmem:[#allocation3 + $0xfc] sm:$0xf] %vm2675_vm13, %v9842_v25  ;;  %2740 = vst.msk [vmem:[#allocation3 + $0x100] sm:$0xf] %vm2675_vm13, %v9842_v25  ;;  %v1979_v34 = vrot.slane %v1977_v43, 4  ;;  %5366 = vmatprep.mubr.msk.bf16.mxu0 %vm2129_vm12, %v1966_v62  ;;  %v1973_v45 = vor.u32 %v1972_v18, %v1969_v6  ;;  %v3164_v15 = vrot.slane %v3162_v8, 4 }
 0x1ef   : > { %2743 = vst.msk [vmem:[#allocation3 + $0x10c] sm:$0xf] %vm2675_vm13, %v9842_v25  ;;  %2744 = vst.msk [vmem:[#allocation3 + $0x110] sm:$0xf] %vm2675_vm13, %v9842_v25  ;;  %v1147_v57 = vpop.permute.xlu0 %1146  ;;  %v3167_v5 = vrot.slane %v3165_v4, 5  ;;  %v9850_v55 = vld [vmem:[#allocation42_spill] sm:$0xff] }
 0x1f0   : > { %2745 = vst.msk [vmem:[#allocation3 + $0x114] sm:$0xf] %vm2675_vm13, %v9842_v25  ;;  %2746 = vst.msk [vmem:[#allocation3 + $0x118] sm:$0xf] %vm2675_vm13, %v9842_v25  ;;  %v1980_v56 = vor.u32 %v1979_v34, %v1976_v49  ;;  %v1474_v20 = vsel %vm1438_vm4, %v1402_v58, %v9850_v55  ;;  %v9851_v59 = vld [vmem:[#allocation48_spill] sm:$0xff]  ;;  %v9853_v60 = vld [vmem:[#allocation43_spill] sm:$0xff] }
 0x1f1   : > { %2749 = vst.msk [vmem:[#allocation3 + $0x124] sm:$0xf] %vm2675_vm13, %v9842_v25  ;;  %2750 = vst.msk [vmem:[#allocation3 + $0x128] sm:$0xf] %vm2675_vm13, %v9842_v25  ;;  %v1149_v21 = vpop.permute.xlu1 %1148  ;;  %v3168_v16 = vor.u32 %v3167_v5, %v3164_v15  ;;  %v1594_v50 = vsel %vm1568_vm6, %v1537_v47, %v9851_v59  ;;  %v9852_v63 = vld [vmem:[#allocation68_spill] sm:$0xff]  ;;  %v1476_v52 = vsel %vm1438_vm4, %v1405_v54, %v9853_v60  ;;  %v9854_v2 = vld [vmem:[#allocation118_spill] sm:$0xff] }
 0x1f2   : > { %2751 = vst.msk [vmem:[#allocation3 + $0x12c] sm:$0xf] %vm2675_vm13, %v9842_v25  ;;  %2752 = vst.msk [vmem:[#allocation3 + $0x130] sm:$0xf] %vm2675_vm13, %v9842_v25  ;;  %v1981_v30 = vsel %vm1861_vm11, %v1973_v45, %v1980_v56  ;;  %v1407_v22 = vsel %vm1357_vm3, %v9852_v63, %v9848_v13  ;;  %v1539_v0 = vsel %vm1503_vm5, %v1474_v20, %v9854_v2  ;;  %v9856_v40 = vld [vmem:[#allocation119_spill] sm:$0xff]  ;;  %v9857_v29 = vld [vmem:[#allocation120_spill] sm:$0xff] }
 0x1f3   : > { %2755 = vst.msk [vmem:[#allocation3 + $0x13c] sm:$0xf] %vm2675_vm13, %v9842_v25  ;;  %2756 = vst.msk [vmem:[#allocation3 + $0x140] sm:$0xf] %vm2675_vm13, %v9842_v25  ;;  %5367 = vmatmul.mubr.msk.bf16.gmra.mxu0 %vm2129_vm12, %v1981_v30  ;;  %v1215_v35 = vpop.permute.xlu0 %1214  ;;  %3289 = vrot.lane.b32.xlu0 %v3168_v16, %s5603_s9  ;;  %v1651_v11 = vsel %vm1617_vm7, %v1594_v50, %v1143_v61  ;;  %v1541_v9 = vsel %vm1503_vm5, %v1476_v52, %v9856_v40  ;;  %v9858_v18 = vld [vmem:[#allocation132_spill] sm:$0xff] }
 0x1f4   : > { %2757 = vst.msk [vmem:[#allocation3 + $0x144] sm:$0xf] %vm2675_vm13, %v9842_v25  ;;  %2758 = vst.msk [vmem:[#allocation3 + $0x148] sm:$0xf] %vm2675_vm13, %v9842_v25  ;;  %v1595_v41 = vsel %vm1568_vm6, %v1539_v0, %v9851_v59  ;;  %v1716_v6 = vsel %vm1682_vm8, %v1651_v11, %v1215_v35  ;;  %v1597_v49 = vsel %vm1568_vm6, %v1541_v9, %v9858_v18  ;;  %v9859_v9 = vld [vmem:[#allocation75_spill] sm:$0xff] }
 0x1f5   : > { %2761 = vst.msk [vmem:[#allocation3 + $0x154] sm:$0xf] %vm2675_vm13, %v9842_v25  ;;  %2762 = vst.msk [vmem:[#allocation3 + $0x158] sm:$0xf] %vm2675_vm13, %v9842_v25  ;;  %v1217_v19 = vpop.permute.xlu1 %1216  ;;  %v1653_v61 = vsel %vm1617_vm7, %v1595_v41, %v1145_v44  ;;  %v1655_v56 = vsel %vm1617_vm7, %v1597_v49, %v1147_v57  ;;  %v9860_v41 = vld [vmem:[#allocation70_spill] sm:$0xff]  ;;  %v9862_v49 = vld [vmem:[#allocation72_spill] sm:$0xff] }
 0x1f6   : > { %2763 = vst.msk [vmem:[#allocation3 + $0x15c] sm:$0xf] %vm2675_vm13, %v9842_v25  ;;  %2764 = vst.msk [vmem:[#allocation3 + $0x160] sm:$0xf] %vm2675_vm13, %v9842_v25  ;;  %v1718_v30 = vsel %vm1682_vm8, %v1653_v61, %v1217_v19  ;;  %v1412_v61 = vsel %vm1357_vm3, %v9862_v49, %v9859_v9 }
 0x1f7   : > { %2767 = vst.msk [vmem:[#allocation3 + $0x16c] sm:$0xf] %vm2675_vm13, %v9842_v25  ;;  %2768 = vst.msk [vmem:[#allocation3 + $0x170] sm:$0xf] %vm2675_vm13, %v9842_v25  ;;  %v1219_v28 = vpop.permute.xlu0 %1218 }
 0x1f8   : > { %2769 = vst.msk [vmem:[#allocation3 + $0x174] sm:$0xf] %vm2675_vm13, %v9842_v25  ;;  %2770 = vst.msk [vmem:[#allocation3 + $0x178] sm:$0xf] %vm2675_vm13, %v9842_v25  ;;  %v1720_v27 = vsel %vm1682_vm8, %v1655_v56, %v1219_v28  ;;  %v9864_v56 = vld [vmem:[#allocation77_spill] sm:$0xff] }
 0x1f9   : > { %2773 = vst.msk [vmem:[#allocation3 + $0x184] sm:$0xf] %vm2675_vm13, %v9842_v25  ;;  %2774 = vst.msk [vmem:[#allocation3 + $0x188] sm:$0xf] %vm2675_vm13, %v9842_v25  ;;  %v1221_v14 = vpop.permute.xlu1 %1220 }
 0x1fa   : > { %2775 = vst.msk [vmem:[#allocation3 + $0x18c] sm:$0xf] %vm2675_vm13, %v9842_v25  ;;  %2776 = vst.msk [vmem:[#allocation3 + $0x190] sm:$0xf] %vm2675_vm13, %v9842_v25 }
 0x1fb   : > { %2779 = vst.msk [vmem:[#allocation3 + $0x19c] sm:$0xf] %vm2675_vm13, %v9842_v25  ;;  %2780 = vst.msk [vmem:[#allocation3 + $0x1a0] sm:$0xf] %vm2675_vm13, %v9842_v25  ;;  %v1272_v38 = vpop.permute.xlu0 %1271 }
 0x1fc   : > { %2781 = vst.msk [vmem:[#allocation3 + $0x1a4] sm:$0xf] %vm2675_vm13, %v9842_v25  ;;  %2782 = vst.msk [vmem:[#allocation3 + $0x1a8] sm:$0xf] %vm2675_vm13, %v9842_v25  ;;  %v9855_v25 = vld [vmem:[#allocation101_spill] sm:$0xff]  ;;  %v1773_v34 = vsel %vm1747_vm9, %v1716_v6, %v1272_v38  ;;  %v1774_v35 = vsel %vm1747_vm9, %v1718_v30, %v1272_v38  ;;  %v1410_v6 = vsel %vm1357_vm3, %v9860_v41, %v9859_v9  ;;  %v9865_v30 = vld [vmem:[#allocation74_spill] sm:$0xff] }
 0x1fd   : > { %v1274_v48 = vpop.permute.xlu1 %1273  ;;  %v1478_v17 = vsel %vm1438_vm4, %v1407_v22, %v9855_v25 }
 0x1fe   : > { %v1543_v43 = vsel %vm1503_vm5, %v1478_v17, %v9857_v29  ;;  %v1776_v5 = vsel %vm1747_vm9, %v1720_v27, %v1274_v48  ;;  %v9866_v27 = vld [vmem:[#allocation104_spill] sm:$0xff] }
 0x1ff   : > { %v1326_v62 = vpop.permute.xlu0 %1325  ;;  %v1598_v45 = vsel %vm1568_vm6, %v1543_v43, %v9858_v18  ;;  %v9861_v43 = vld [vmem:[#allocation102_spill] sm:$0xff] }
 0x200   : > { %v1830_v3 = vsel %vm1796_vm10, %v1773_v34, %v1326_v62  ;;  %v1657_v44 = vsel %vm1617_vm7, %v1598_v45, %v1149_v21  ;;  %v1480_v18 = vsel %vm1438_vm4, %v1410_v6, %v9861_v43  ;;  %v9863_v34 = vld [vmem:[#allocation121_spill] sm:$0xff] }
 0x201   : > { %v1982_v8 = vshrl.u32 %v1830_v3, 16  ;;  %v1985_v4 = vshll.u32 %v1830_v3, 16  ;;  %v1328_v15 = vpop.permute.xlu1 %1327  ;;  %v1722_v37 = vsel %vm1682_vm8, %v1657_v44, %v1221_v14  ;;  %v1545_v62 = vsel %vm1503_vm5, %v1480_v18, %v9863_v34 }
 0x202   : > { %v1832_v16 = vsel %vm1796_vm10, %v1774_v35, %v1328_v15  ;;  %v1777_v23 = vsel %vm1747_vm9, %v1722_v37, %v1274_v48  ;;  %v1415_v3 = vsel %vm1357_vm3, %v9865_v30, %v9864_v56  ;;  %v1482_v35 = vsel %vm1438_vm4, %v1412_v61, %v9866_v27  ;;  %v9868_v15 = vld [vmem:[#allocation76_spill] sm:$0xff] }
 0x203   : > { %v1984_v36 = vrot.slane %v1982_v8, 3  ;;  %v1987_v39 = vrot.slane %v1985_v4, 4  ;;  %v1989_v57 = vshrl.u32 %v1832_v16, 16  ;;  %v1992_v46 = vshll.u32 %v1832_v16, 16  ;;  %v1330_v19 = vpop.permute.xlu0 %1329  ;;  %v9867_v8 = vld [vmem:[#allocation133_spill] sm:$0xff] }
 0x204   : > { %v1834_v28 = vsel %vm1796_vm10, %v1776_v5, %v1330_v19  ;;  %v1600_v4 = vsel %vm1568_vm6, %v1545_v62, %v9867_v8  ;;  %v1417_v44 = vsel %vm1357_vm3, %v9868_v15, %v9864_v56  ;;  %v9869_v5 = vld [vmem:[#allocation105_spill] sm:$0xff]  ;;  %v9871_v19 = vld [vmem:[#allocation106_spill] sm:$0xff] }
 0x205   : > { %v1991_v33 = vrot.slane %v1989_v57, 3  ;;  %v1994_v58 = vrot.slane %v1992_v46, 4  ;;  %v1997_v10 = vshrl.u32 %v1834_v28, 16  ;;  %v1332_v47 = vpop.permute.xlu1 %1331  ;;  %v1988_v21 = vor.u32 %v1987_v39, %v1984_v36  ;;  %v9870_v36 = vld [vmem:[#allocation122_spill] sm:$0xff] }
 0x206   : > { %v2000_v38 = vshll.u32 %v1834_v28, 16  ;;  %v1836_v13 = vsel %vm1796_vm10, %v1777_v23, %v1332_v47  ;;  %v1484_v16 = vsel %vm1438_vm4, %v1415_v3, %v9869_v5  ;;  %v1547_v39 = vsel %vm1503_vm5, %v1482_v35, %v9870_v36  ;;  %v9872_v28 = vld [vmem:[#allocation123_spill] sm:$0xff] }
 0x207   : > { %v1995_v12 = vor.u32 %v1994_v58, %v1991_v33  ;;  %v1999_v54 = vrot.slane %v1997_v10, 3  ;;  %v2004_v55 = vshrl.u32 %v1836_v13, 16  ;;  %v2007_v20 = vshll.u32 %v1836_v13, 16  ;;  %v1151_v59 = vpop.permute.xlu0 %1150  ;;  %v9873_v10 = vld [vmem:[#allocation46_spill] sm:$0xff] }
 0x208   : > { %v2002_v50 = vrot.slane %v2000_v38, 4  ;;  %v1659_v57 = vsel %vm1617_vm7, %v1600_v4, %v1151_v59  ;;  %v1486_v37 = vsel %vm1438_vm4, %v1417_v44, %v9871_v19  ;;  %v1549_v23 = vsel %vm1503_vm5, %v1484_v16, %v9872_v28 }
 0x209   : > { %v2006_v63 = vrot.slane %v2004_v55, 3  ;;  %v2009_v14 = vrot.slane %v2007_v20, 4  ;;  %v1153_v22 = vpop.permute.xlu1 %1152  ;;  %v1996_v60 = vsel %vm1861_vm11, %v1988_v21, %v1995_v12  ;;  %v1601_v33 = vsel %vm1568_vm6, %v1547_v39, %v9867_v8  ;;  %v9874_v21 = vld [vmem:[#allocation134_spill] sm:$0xff] }
 0x20a   : > { %5370 = vmatprep.mubr.msk.bf16.mxu0 %vm2129_vm12, %v1996_v60  ;;  %v2003_v52 = vor.u32 %v2002_v50, %v1999_v54  ;;  %v1551_v47 = vsel %vm1503_vm5, %v1486_v37, %v9873_v10  ;;  %v1603_v38 = vsel %vm1568_vm6, %v1549_v23, %v9874_v21  ;;  %v1661_v13 = vsel %vm1617_vm7, %v1601_v33, %v1153_v22  ;;  %v9875_v23 = vld [vmem:[#allocation80_spill] sm:$0xff]  ;;  %v9876_v10 = vld [vmem:[#allocation107_spill] sm:$0xff] }
 0x20b   : > { %v2010_v2 = vor.u32 %v2009_v14, %v2006_v63  ;;  %v1155_v0 = vpop.permute.xlu0 %1154  ;;  %v1604_v55 = vsel %vm1568_vm6, %v1551_v47, %v9874_v21  ;;  %v1420_v33 = vsel %vm1357_vm3, %v9803_v31, %v9875_v23  ;;  %v1422_v21 = vsel %vm1357_vm3, %v9804_v53, %v9875_v23  ;;  %v9880_v31 = vld [vmem:[#allocation135_spill] sm:$0xff] }
 0x20c   : > { %v1663_v20 = vsel %vm1617_vm7, %v1603_v38, %v1155_v0  ;;  %v1488_v47 = vsel %vm1438_vm4, %v1420_v33, %v9876_v10  ;;  %v9877_v38 = vld [vmem:[#allocation124_spill] sm:$0xff] }
 0x20d   : > { %v1157_v11 = vpop.permute.xlu1 %1156  ;;  %v2011_v48 = vsel %vm1861_vm11, %v2003_v52, %v2010_v2 }
 0x20e   : > { %5371 = vmatmul.mubr.msk.bf16.gmra.mxu0 %vm2129_vm12, %v2011_v48  ;;  %v1665_v22 = vsel %vm1617_vm7, %v1604_v55, %v1157_v11 }
 0x20f   : > { %v1223_v25 = vpop.permute.xlu0 %1222 }
 0x210   : > { %v1724_v58 = vsel %vm1682_vm8, %v1659_v57, %v1223_v25 }
 0x211   : > { %v1225_v17 = vpop.permute.xlu1 %1224 }
 0x212   : > { %v1726_v59 = vsel %vm1682_vm8, %v1661_v13, %v1225_v17  ;;  %v1553_v13 = vsel %vm1503_vm5, %v1488_v47, %v9877_v38 }
 0x213   : > { %v1227_v40 = vpop.permute.xlu0 %1226 }
 0x214   : > { %v1728_v63 = vsel %vm1682_vm8, %v1663_v20, %v1227_v40  ;;  %v9879_v20 = vld [vmem:[#allocation108_spill] sm:$0xff] }
 0x215   : > { %v1229_v29 = vpop.permute.xlu1 %1228 }
 0x216   : > { %v1730_v43 = vsel %vm1682_vm8, %v1665_v22, %v1229_v29 }
 0x217   : > { %v1276_v45 = vpop.permute.xlu0 %1275 }
 0x218   : > { %v1779_v12 = vsel %vm1747_vm9, %v1724_v58, %v1276_v45  ;;  %v1780_v14 = vsel %vm1747_vm9, %v1726_v59, %v1276_v45  ;;  %v1490_v59 = vsel %vm1438_vm4, %v1422_v21, %v9879_v20 }
 0x219   : > { %v1278_v46 = vpop.permute.xlu1 %1277 }
 0x21a   : > { %v1782_v48 = vsel %vm1747_vm9, %v1728_v63, %v1278_v46  ;;  %v1783_v18 = vsel %vm1747_vm9, %v1730_v43, %v1278_v46 }
 0x21b   : > { %v1334_v54 = vpop.permute.xlu0 %1333 }
 0x21c   : > { %v1838_v50 = vsel %vm1796_vm10, %v1779_v12, %v1334_v54  ;;  %v9878_v54 = vld [vmem:[#allocation82_spill] sm:$0xff] }
 0x21d   : > { %v2012_v60 = vshrl.u32 %v1838_v50, 16  ;;  %v2015_v52 = vshll.u32 %v1838_v50, 16  ;;  %v1336_v2 = vpop.permute.xlu1 %1335  ;;  %v1425_v55 = vsel %vm1357_vm3, %v9805_v7, %v9878_v54  ;;  %v1606_v50 = vsel %vm1568_vm6, %v1553_v13, %v9880_v31  ;;  %v9883_v7 = vld [vmem:[#allocation110_spill] sm:$0xff] }
 0x21e   : > { %v1840_v25 = vsel %vm1796_vm10, %v1780_v14, %v1336_v2  ;;  %v1427_v63 = vsel %vm1357_vm3, %v9806_v51, %v9878_v54  ;;  %v9881_v14 = vld [vmem:[#allocation109_spill] sm:$0xff] }
 0x21f   : > { %v2014_v9 = vrot.slane %v2012_v60, 3  ;;  %v2017_v41 = vrot.slane %v2015_v52, 4  ;;  %v2019_v0 = vshrl.u32 %v1840_v25, 16  ;;  %v2022_v6 = vshll.u32 %v1840_v25, 16  ;;  %v1338_v17 = vpop.permute.xlu0 %1337  ;;  %v9882_v60 = vld [vmem:[#allocation125_spill] sm:$0xff]  ;;  %v9884_v25 = vld [vmem:[#allocation126_spill] sm:$0xff] }
 0x220   : > { %v1842_v40 = vsel %vm1796_vm10, %v1782_v48, %v1338_v17  ;;  %v1492_v53 = vsel %vm1438_vm4, %v1425_v55, %v9881_v14  ;;  %v1555_v52 = vsel %vm1503_vm5, %v1490_v59, %v9882_v60  ;;  %v1494_v48 = vsel %vm1438_vm4, %v1427_v63, %v9883_v7  ;;  %v9886_v17 = vld [vmem:[#allocation136_spill] sm:$0xff] }
 0x221   : > { %v2021_v49 = vrot.slane %v2019_v0, 3  ;;  %v2024_v61 = vrot.slane %v2022_v6, 4  ;;  %v2027_v34 = vshrl.u32 %v1842_v40, 16  ;;  %v1340_v62 = vpop.permute.xlu1 %1339  ;;  %v2018_v11 = vor.u32 %v2017_v41, %v2014_v9  ;;  %v9885_v0 = vld [vmem:[#allocation127_spill] sm:$0xff] }
 0x222   : > { %v2030_v45 = vshll.u32 %v1842_v40, 16  ;;  %v1844_v56 = vsel %vm1796_vm10, %v1783_v18, %v1340_v62  ;;  %v1557_v9 = vsel %vm1503_vm5, %v1492_v53, %v9884_v25  ;;  %v1607_v41 = vsel %vm1568_vm6, %v1555_v52, %v9880_v31  ;;  %v9888_v25 = vld [vmem:[#allocation111_spill] sm:$0xff] }
 0x223   : > { %v2025_v30 = vor.u32 %v2024_v61, %v2021_v49  ;;  %v2029_v3 = vrot.slane %v2027_v34, 3  ;;  %v2034_v27 = vshrl.u32 %v1844_v56, 16  ;;  %v2037_v35 = vshll.u32 %v1844_v56, 16  ;;  %v1159_v8 = vpop.permute.xlu0 %1158 }
 0x224   : > { %v2032_v4 = vrot.slane %v2030_v45, 4  ;;  %v1667_v2 = vsel %vm1617_vm7, %v1606_v50, %v1159_v8  ;;  %v1559_v6 = vsel %vm1503_vm5, %v1494_v48, %v9885_v0  ;;  %v1609_v43 = vsel %vm1568_vm6, %v1557_v9, %v9886_v17 }
 0x225   : > { %v2036_v15 = vrot.slane %v2034_v27, 3  ;;  %v2039_v29 = vrot.slane %v2037_v35, 4  ;;  %v1161_v44 = vpop.permute.xlu1 %1160  ;;  %v2026_v5 = vsel %vm1861_vm11, %v2018_v11, %v2025_v30  ;;  %v1610_v61 = vsel %vm1568_vm6, %v1559_v6, %v9886_v17  ;;  %v9890_v17 = vld [vmem:[#allocation86_spill] sm:$0xff] }
 0x226   : > { %5374 = vmatprep.mubr.msk.bf16.mxu0 %vm2129_vm12, %v2026_v5  ;;  %v2033_v16 = vor.u32 %v2032_v4, %v2029_v3  ;;  %v1669_v40 = vsel %vm1617_vm7, %v1607_v41, %v1161_v44 }
 0x227   : > { %v2040_v36 = vor.u32 %v2039_v29, %v2036_v15  ;;  %v1163_v39 = vpop.permute.xlu0 %1162 }
 0x228   : > { %v1671_v34 = vsel %vm1617_vm7, %v1609_v43, %v1163_v39  ;;  %v1435_v43 = vsel %vm1357_vm3, %v9819_v42, %v9890_v17  ;;  %v9895_v42 = vld [vmem:[#allocation114_spill] sm:$0xff] }
 0x229   : > { %v1165_v57 = vpop.permute.xlu1 %1164  ;;  %v2041_v46 = vsel %vm1861_vm11, %v2033_v16, %v2040_v36 }
 0x22a   : > { %5375 = vmatmul.mubr.msk.bf16.gmra.mxu0 %vm2129_vm12, %v2041_v46  ;;  %v1673_v35 = vsel %vm1617_vm7, %v1610_v61, %v1165_v57  ;;  %v1437_v61 = vsel %vm1357_vm3, %v9820_v24, %v9890_v17 }
 0x22b   : > { %v1231_v19 = vpop.permute.xlu0 %1230 }
 0x22c   : > { %v1732_v51 = vsel %vm1682_vm8, %v1667_v2, %v1231_v19 }
 0x22d   : > { %v1233_v37 = vpop.permute.xlu1 %1232 }
 0x22e   : > { %v1734_v62 = vsel %vm1682_vm8, %v1669_v40, %v1233_v37  ;;  %v9891_v40 = vld [vmem:[#allocation112_spill] sm:$0xff] }
 0x22f   : > { %v1235_v28 = vpop.permute.xlu0 %1234 }
 0x230   : > { %v1736_v45 = vsel %vm1682_vm8, %v1671_v34, %v1235_v28  ;;  %v9893_v34 = vld [vmem:[#allocation113_spill] sm:$0xff] }
 0x231   : > { %v1237_v58 = vpop.permute.xlu1 %1236 }
 0x232   : > { %v1738_v36 = vsel %vm1682_vm8, %v1673_v35, %v1237_v58 }
 0x233   : > { %v1280_v12 = vpop.permute.xlu0 %1279 }
 0x234   : > { %v1785_v18 = vsel %vm1747_vm9, %v1732_v51, %v1280_v12  ;;  %v1786_v56 = vsel %vm1747_vm9, %v1734_v62, %v1280_v12  ;;  %v9889_v51 = vld [vmem:[#allocation128_spill] sm:$0xff]  ;;  %v9894_v62 = vld [vmem:[#allocation129_spill] sm:$0xff] }
 0x235   : > { %v1282_v22 = vpop.permute.xlu1 %1281 }
 0x236   : > { %v1788_v8 = vsel %vm1747_vm9, %v1736_v45, %v1282_v22  ;;  %v1789_v46 = vsel %vm1747_vm9, %v1738_v36, %v1282_v22  ;;  %v9887_v22 = vld [vmem:[#allocation83_spill] sm:$0xff] }
 0x237   : > { %v1342_v49 = vpop.permute.xlu0 %1341  ;;  %v1430_v7 = vsel %vm1357_vm3, %v9817_v26, %v9887_v22  ;;  %v1432_v41 = vsel %vm1357_vm3, %v9818_v32, %v9887_v22  ;;  %v9892_v26 = vld [vmem:[#allocation137_spill] sm:$0xff]  ;;  %v1500_v32 = vsel %vm1438_vm4, %v1435_v43, %v9893_v34  ;;  %v7640_v43 = vld [vmem:[%s9461_s2] ss:$0 sm:$0xff] }
 0x238   : > { %v1846_v11 = vsel %vm1796_vm10, %v1785_v18, %v1342_v49  ;;  %v1496_v9 = vsel %vm1438_vm4, %v1430_v7, %v9888_v25  ;;  %v1498_v18 = vsel %vm1438_vm4, %v1432_v41, %v9891_v40 }
 0x239   : > { %v2042_v30 = vshrl.u32 %v1846_v11, 16  ;;  %v2045_v3 = vshll.u32 %v1846_v11, 16  ;;  %v1344_v27 = vpop.permute.xlu1 %1343  ;;  %v1561_v0 = vsel %vm1503_vm5, %v1496_v9, %v9889_v51  ;;  %v1563_v11 = vsel %vm1503_vm5, %v1498_v18, %v9894_v62 }
 0x23a   : > { %v1848_v4 = vsel %vm1796_vm10, %v1786_v56, %v1344_v27  ;;  %v1612_v49 = vsel %vm1568_vm6, %v1561_v0, %v9892_v26  ;;  %v1613_v35 = vsel %vm1568_vm6, %v1563_v11, %v9892_v26 }
 0x23b   : > { %v2044_v15 = vrot.slane %v2042_v30, 3  ;;  %v2047_v29 = vrot.slane %v2045_v3, 4  ;;  %v2049_v44 = vshrl.u32 %v1848_v4, 16  ;;  %v2052_v5 = vshll.u32 %v1848_v4, 16  ;;  %v1346_v16 = vpop.permute.xlu0 %1345  ;;  %v9896_v3 = vld [vmem:[#allocation130_spill] sm:$0xff] }
 0x23c   : > { %v1850_v39 = vsel %vm1796_vm10, %v1788_v8, %v1346_v16  ;;  %v1502_v30 = vsel %vm1438_vm4, %v1437_v61, %v9895_v42  ;;  %v1565_v27 = vsel %vm1503_vm5, %v1500_v32, %v9896_v3  ;;  %v9897_v8 = vld [vmem:[#allocation131_spill] sm:$0xff] }
 0x23d   : > { %v2051_v19 = vrot.slane %v2049_v44, 3  ;;  %v2054_v37 = vrot.slane %v2052_v5, 4  ;;  %v2057_v28 = vshrl.u32 %v1850_v39, 16  ;;  %v1348_v23 = vpop.permute.xlu1 %1347  ;;  %v2048_v57 = vor.u32 %v2047_v29, %v2044_v15  ;;  %v9898_v15 = vld [vmem:[#allocation49_spill] sm:$0xff] }
 0x23e   : > { %v2060_v33 = vshll.u32 %v1850_v39, 16  ;;  %v1852_v10 = vsel %vm1796_vm10, %v1789_v46, %v1348_v23  ;;  %v1567_v4 = vsel %vm1503_vm5, %v1502_v30, %v9897_v8  ;;  %v1615_v29 = vsel %vm1568_vm6, %v1565_v27, %v9898_v15 }
 0x23f   : > { %v2055_v47 = vor.u32 %v2054_v37, %v2051_v19  ;;  %v2059_v21 = vrot.slane %v2057_v28, 3  ;;  %v2064_v38 = vshrl.u32 %v1852_v10, 16  ;;  %v2067_v13 = vshll.u32 %v1852_v10, 16  ;;  %v1167_v12 = vpop.permute.xlu0 %1166 }
 0x240   : > { %v2062_v54 = vrot.slane %v2060_v33, 4  ;;  %v1675_v45 = vsel %vm1617_vm7, %v1612_v49, %v1167_v12  ;;  %v1616_v36 = vsel %vm1568_vm6, %v1567_v4, %v9898_v15  ;;  %vm4630_vm5 = vcmask 588800  }
 0x241   : > { %v2066_v55 = vrot.slane %v2064_v38, 3  ;;  %v2069_v58 = vrot.slane %v2067_v13, 4  ;;  %v1169_v20 = vpop.permute.xlu1 %1168  ;;  %v2056_v59 = vsel %vm1861_vm11, %v2048_v57, %v2055_v47 }
 0x242   : > { %5378 = vmatprep.mubr.msk.bf16.mxu0 %vm2129_vm12, %v2056_v59  ;;  %v2063_v31 = vor.u32 %v2062_v54, %v2059_v21  ;;  %v1677_v44 = vsel %vm1617_vm7, %v1613_v35, %v1169_v20 }
 0x243   : > { %v2070_v50 = vor.u32 %v2069_v58, %v2066_v55  ;;  %v1171_v63 = vpop.permute.xlu0 %1170 }
 0x244   : > { %v1679_v39 = vsel %vm1617_vm7, %v1615_v29, %v1171_v63 }
 0x245   : > { %v1173_v14 = vpop.permute.xlu1 %1172  ;;  %v2071_v53 = vsel %vm1861_vm11, %v2063_v31, %v2070_v50 }
 0x246   : > { %5379 = vmatmul.mubr.msk.bf16.gmra.mxu0 %vm2129_vm12, %v2071_v53  ;;  %v1681_v10 = vsel %vm1617_vm7, %v1616_v36, %v1173_v14 }
 0x247   : > { %v1239_v60 = vpop.permute.xlu0 %1238 }
 0x248   : > { %v1740_v24 = vsel %vm1682_vm8, %v1675_v45, %v1239_v60 }
 0x249   : > { %v1241_v52 = vpop.permute.xlu1 %1240 }
 0x24a   : > { %v1742_v46 = vsel %vm1682_vm8, %v1677_v44, %v1241_v52 }
 0x24b   : > { %v1243_v2 = vpop.permute.xlu0 %1242 }
 0x24c   : > { %v1744_v37 = vsel %vm1682_vm8, %v1679_v39, %v1243_v2 }
 0x24d   : > { %v1245_v48 = vpop.permute.xlu1 %1244 }
 0x24e   : > { %v1746_v58 = vsel %vm1682_vm8, %v1681_v10, %v1245_v48 }
 0x24f   : > { %v1284_v6 = vpop.permute.xlu0 %1283 }
 0x250   : > { %v1791_v5 = vsel %vm1747_vm9, %v1740_v24, %v1284_v6  ;;  %v1792_v28 = vsel %vm1747_vm9, %v1742_v46, %v1284_v6 }
 0x251   : > { %v1286_v56 = vpop.permute.xlu1 %1285 }
 0x252   : > { %v1794_v47 = vsel %vm1747_vm9, %v1744_v37, %v1286_v56  ;;  %v1795_v59 = vsel %vm1747_vm9, %v1746_v58, %v1286_v56 }
 0x253   : > { %v1350_v16 = vpop.permute.xlu0 %1349 }
 0x254   : > { %v1854_v19 = vsel %vm1796_vm10, %v1791_v5, %v1350_v16 }
 0x255   : > { %v2072_v23 = vshrl.u32 %v1854_v19, 16  ;;  %v2075_v57 = vshll.u32 %v1854_v19, 16  ;;  %v1352_v33 = vpop.permute.xlu1 %1351 }
 0x256   : > { %v1856_v21 = vsel %vm1796_vm10, %v1792_v28, %v1352_v33 }
 0x257   : > { %v2074_v38 = vrot.slane %v2072_v23, 3  ;;  %v2077_v13 = vrot.slane %v2075_v57, 4  ;;  %v2079_v12 = vshrl.u32 %v1856_v21, 16  ;;  %v2082_v54 = vshll.u32 %v1856_v21, 16  ;;  %v1354_v55 = vpop.permute.xlu0 %1353 }
 0x258   : > { %v1858_v20 = vsel %vm1796_vm10, %v1794_v47, %v1354_v55 }
 0x259   : > { %v2081_v31 = vrot.slane %v2079_v12, 3  ;;  %v2084_v50 = vrot.slane %v2082_v54, 4  ;;  %v2087_v63 = vshrl.u32 %v1858_v20, 16  ;;  %v1356_v53 = vpop.permute.xlu1 %1355  ;;  %v2078_v14 = vor.u32 %v2077_v13, %v2074_v38 }
 0x25a   : > { %v2090_v60 = vshll.u32 %v1858_v20, 16  ;;  %v1860_v52 = vsel %vm1796_vm10, %v1795_v59, %v1356_v53 }
 0x25b   : > { %v2085_v2 = vor.u32 %v2084_v50, %v2081_v31  ;;  %v2089_v22 = vrot.slane %v2087_v63, 3  ;;  %v2094_v7 = vshrl.u32 %v1860_v52, 16  ;;  %v2097_v25 = vshll.u32 %v1860_v52, 16 }
 0x25c   : > { %v2092_v9 = vrot.slane %v2090_v60, 4 }
 0x25d   : > { %v2096_v41 = vrot.slane %v2094_v7, 3  ;;  %v2099_v51 = vrot.slane %v2097_v25, 4  ;;  %v2086_v48 = vsel %vm1861_vm11, %v2078_v14, %v2085_v2 }
 0x25e   : > { %5382 = vmatprep.mubr.msk.bf16.mxu0 %vm2129_vm12, %v2086_v48  ;;  %v2093_v0 = vor.u32 %v2092_v9, %v2089_v22 }
 0x25f   : > { %v2100_v6 = vor.u32 %v2099_v51, %v2096_v41 }
 0x261   : > { %v2101_v17 = vsel %vm1861_vm11, %v2093_v0, %v2100_v6 }
 0x262   : > { %5383 = vmatmul.mubr.msk.bf16.gmra.mxu0 %vm2129_vm12, %v2101_v17 }
 0x264   : > { %v5356_v40 = vpop.f32.mrf.mxu0 }
 0x265   : > { %v2225_v18 = vadd.f32 %v5356_v40, %v7640_v43 }
 0x266   : > { %v2216_v26 = vpop.f32.mrf.mxu0 }
 0x267   : > { %v2345_v49 = vmax.f32 %v2225_v18, 0.0  ;;  %v2217_v61 = vadd.f32 %v7640_v43, %v2216_v26 }
 0x268   : > { %v5357_v34 = vpop.f32.mrf.mxu0 }
 0x269   : > { %v5261_v32 = vpack.c.bf16 %v2345_v49, %v2345_v49  ;;  %v2343_v62 = vmax.f32 %v2217_v61, 0.0  ;;  %v2228_v11 = vadd.f32 %v5357_v34, %v7640_v43 }
 0x26a   : > { %v2219_v45 = vpop.f32.mrf.mxu0 }
 0x26b   : > { %2915 = vst.msk [vmem:[#allocation3 + $0x38] sm:$0xf] %vm2675_vm13, %v5261_v32  ;;  %v5259_v56 = vpack.c.bf16 %v2343_v62, %v2343_v62  ;;  %v2346_v42 = vmax.f32 %v2228_v11, 0.0  ;;  %v2220_v30 = vadd.f32 %v7640_v43, %v2219_v45 }
 0x26d   : > { %2913 = vst.msk [vmem:[#allocation3 + $0x20] sm:$0xf] %vm2675_vm13, %v5259_v56  ;;  %v5262_v3 = vpack.c.bf16 %v2346_v42, %v2346_v42  ;;  %v2344_v27 = vmax.f32 %v2220_v30, 0.0 }
 0x26f   : > { %2916 = vst.msk [vmem:[#allocation3 + $0x3c] sm:$0xf] %vm2675_vm13, %v5262_v3  ;;  %v5260_v35 = vpack.c.bf16 %v2344_v27, %v2344_v27 }
 0x271   : > { %2914 = vst.msk [vmem:[#allocation3 + $0x24] sm:$0xf] %vm2675_vm13, %v5260_v35 }
 0x272   : > { %v7651_v24 = vld [vmem:[#allocation3 + $0x38] sm:$0xf] }
 0x274   : > { %v7659_v15 = vld [vmem:[#allocation3 + $0x20] sm:$0xf] }
 0x276   : > { %v7653_v8 = vld [vmem:[#allocation3 + $0x3c] sm:$0xf] }
 0x277   : > { %v7657_v4 = vcombine.low %v7651_v24, %v7653_v8 }
 0x278   : > { %v7661_v29 = vld [vmem:[#allocation3 + $0x24] sm:$0xf] }
 0x279   : > { %v3178_v44 = vshrl.u32 %v7657_v4, 16  ;;  %v3181_v5 = vshll.u32 %v7657_v4, 16  ;;  %v7667_v16 = vcombine.low %v7659_v15, %v7661_v29 }
 0x27a   : > { %v5360_v36 = vpop.f32.mrf.mxu0 }
 0x27b   : > { %v2241_v39 = vadd.f32 %v5360_v36, %v7640_v43  ;;  %v3180_v46 = vrot.slane %v3178_v44, 4  ;;  %v3183_v19 = vrot.slane %v3181_v5, 5  ;;  %v3170_v37 = vshrl.u32 %v7667_v16, 16 }
 0x27c   : > { %v2232_v28 = vpop.f32.mrf.mxu0  ;;  %v3173_v23 = vshll.u32 %v7667_v16, 16 }
 0x27d   : > { %v2349_v57 = vmax.f32 %v2241_v39, 0.0  ;;  %v2233_v33 = vadd.f32 %v7640_v43, %v2232_v28  ;;  %v7673_v10 = vor.u32 %v3183_v19, %v3180_v46  ;;  %v3172_v47 = vrot.slane %v3170_v37, 4 }
 0x27e   : > { %v5361_v21 = vpop.f32.mrf.mxu0  ;;  %v3175_v38 = vrot.slane %v3173_v23, 5 }
 0x27f   : > { %v5265_v13 = vpack.c.bf16 %v2349_v57, %v2349_v57  ;;  %v2347_v12 = vmax.f32 %v2233_v33, 0.0  ;;  %3293 = vrot.lane.b32.xlu0 %v7673_v10, %s5603_s9  ;;  %v2244_v54 = vadd.f32 %v5361_v21, %v7640_v43 }
 0x280   : > { %v7678_v55 = vor.u32 %v3175_v38, %v3172_v47  ;;  %v2235_v58 = vpop.f32.mrf.mxu0 }
 0x281   : > { %2919 = vst.msk [vmem:[#allocation3 + $0x68] sm:$0xf] %vm2675_vm13, %v5265_v13  ;;  %v5263_v20 = vpack.c.bf16 %v2347_v12, %v2347_v12  ;;  %v2350_v59 = vmax.f32 %v2244_v54, 0.0  ;;  %v2236_v31 = vadd.f32 %v7640_v43, %v2235_v58 }
 0x282   : > { %3291 = vrot.lane.b32.xlu1 %v7678_v55, %s5603_s9 }
 0x283   : > { %2917 = vst.msk [vmem:[#allocation3 + $0x50] sm:$0xf] %vm2675_vm13, %v5263_v20  ;;  %v5266_v50 = vpack.c.bf16 %v2350_v59, %v2350_v59  ;;  %v2348_v63 = vmax.f32 %v2236_v31, 0.0 }
 0x285   : > { %2920 = vst.msk [vmem:[#allocation3 + $0x6c] sm:$0xf] %vm2675_vm13, %v5266_v50  ;;  %v5264_v53 = vpack.c.bf16 %v2348_v63, %v2348_v63 }
 0x287   : > { %2918 = vst.msk [vmem:[#allocation3 + $0x54] sm:$0xf] %vm2675_vm13, %v5264_v53 }
 0x288   : > { %v7687_v14 = vld [vmem:[#allocation3 + $0x68] sm:$0xf] }
 0x28a   : > { %v7695_v2 = vld [vmem:[#allocation3 + $0x50] sm:$0xf] }
 0x28c   : > { %v7689_v60 = vld [vmem:[#allocation3 + $0x6c] sm:$0xf] }
 0x28d   : > { %v7693_v52 = vcombine.low %v7687_v14, %v7689_v60 }
 0x28e   : > { %v7697_v22 = vld [vmem:[#allocation3 + $0x54] sm:$0xf] }
 0x28f   : > { %v3194_v7 = vshrl.u32 %v7693_v52, 16  ;;  %v3197_v25 = vshll.u32 %v7693_v52, 16  ;;  %v7703_v9 = vcombine.low %v7695_v2, %v7697_v22 }
 0x291   : > { %v3196_v41 = vrot.slane %v3194_v7, 4  ;;  %v3199_v51 = vrot.slane %v3197_v25, 5  ;;  %v3186_v48 = vshrl.u32 %v7703_v9, 16  ;;  %v3189_v0 = vshll.u32 %v7703_v9, 16 }
 0x293   : > { %v7707_v6 = vor.u32 %v3199_v51, %v3196_v41  ;;  %v3188_v17 = vrot.slane %v3186_v48, 4  ;;  %v3191_v40 = vrot.slane %v3189_v0, 5 }
 0x295   : > { %3297 = vrot.lane.b32.xlu0 %v7707_v6, %s5603_s9  ;;  %v7711_v18 = vor.u32 %v3191_v40, %v3188_v17 }
 0x296   : > { %v5364_v26 = vpop.f32.mrf.mxu0 }
 0x297   : > { %v2257_v49 = vadd.f32 %v5364_v26, %v7640_v43  ;;  %3295 = vrot.lane.b32.xlu1 %v7711_v18, %s5603_s9 }
 0x298   : > { %v2248_v61 = vpop.f32.mrf.mxu0 }
 0x299   : > { %v2353_v34 = vmax.f32 %v2257_v49, 0.0  ;;  %v2249_v32 = vadd.f32 %v7640_v43, %v2248_v61 }
 0x29a   : > { %v5365_v62 = vpop.f32.mrf.mxu0 }
 0x29b   : > { %v5269_v11 = vpack.c.bf16 %v2353_v34, %v2353_v34  ;;  %v2351_v45 = vmax.f32 %v2249_v32, 0.0  ;;  %v2260_v56 = vadd.f32 %v5365_v62, %v7640_v43 }
 0x29c   : > { %v2251_v42 = vpop.f32.mrf.mxu0 }
 0x29d   : > { %2923 = vst.msk [vmem:[#allocation3 + $0x98] sm:$0xf] %vm2675_vm13, %v5269_v11  ;;  %v5267_v30 = vpack.c.bf16 %v2351_v45, %v2351_v45  ;;  %v2354_v3 = vmax.f32 %v2260_v56, 0.0  ;;  %v2252_v27 = vadd.f32 %v7640_v43, %v2251_v42 }
 0x29f   : > { %2921 = vst.msk [vmem:[#allocation3 + $0x80] sm:$0xf] %vm2675_vm13, %v5267_v30  ;;  %v5270_v35 = vpack.c.bf16 %v2354_v3, %v2354_v3  ;;  %v2352_v44 = vmax.f32 %v2252_v27, 0.0 }
 0x2a1   : > { %2924 = vst.msk [vmem:[#allocation3 + $0x9c] sm:$0xf] %vm2675_vm13, %v5270_v35  ;;  %v5268_v5 = vpack.c.bf16 %v2352_v44, %v2352_v44 }
 0x2a3   : > { %2922 = vst.msk [vmem:[#allocation3 + $0x84] sm:$0xf] %vm2675_vm13, %v5268_v5 }
 0x2a4   : > { %v7723_v36 = vld [vmem:[#allocation3 + $0x98] sm:$0xf] }
 0x2a6   : > { %v7731_v19 = vld [vmem:[#allocation3 + $0x80] sm:$0xf] }
 0x2a8   : > { %v7725_v39 = vld [vmem:[#allocation3 + $0x9c] sm:$0xf] }
 0x2a9   : > { %v7729_v46 = vcombine.low %v7723_v36, %v7725_v39 }
 0x2aa   : > { %v7733_v37 = vld [vmem:[#allocation3 + $0x84] sm:$0xf] }
 0x2ab   : > { %v3210_v28 = vshrl.u32 %v7729_v46, 16  ;;  %v3213_v23 = vshll.u32 %v7729_v46, 16  ;;  %v7739_v57 = vcombine.low %v7731_v19, %v7733_v37 }
 0x2ad   : > { %v3212_v33 = vrot.slane %v3210_v28, 4  ;;  %v3215_v47 = vrot.slane %v3213_v23, 5  ;;  %v3202_v21 = vshrl.u32 %v7739_v57, 16  ;;  %v3205_v38 = vshll.u32 %v7739_v57, 16 }
 0x2af   : > { %v7743_v13 = vor.u32 %v3215_v47, %v3212_v33  ;;  %v3204_v12 = vrot.slane %v3202_v21, 4  ;;  %v3207_v54 = vrot.slane %v3205_v38, 5 }
 0x2b1   : > { %3301 = vrot.lane.b32.xlu0 %v7743_v13, %s5603_s9  ;;  %v7747_v58 = vor.u32 %v3207_v54, %v3204_v12 }
 0x2b3   : > { %v5368_v20 = vpop.f32.mrf.mxu0  ;;  %3299 = vrot.lane.b32.xlu1 %v7747_v58, %s5603_s9 }
 0x2b4   : > { %v2273_v59 = vadd.f32 %v5368_v20, %v7640_v43 }
 0x2b5   : > { %v2264_v31 = vpop.f32.mrf.mxu0 }
 0x2b6   : > { %v2357_v50 = vmax.f32 %v2273_v59, 0.0  ;;  %v2265_v63 = vadd.f32 %v7640_v43, %v2264_v31 }
 0x2b7   : > { %v5369_v53 = vpop.f32.mrf.mxu0 }
 0x2b8   : > { %v5273_v7 = vpack.c.bf16 %v2357_v50, %v2357_v50  ;;  %v2355_v25 = vmax.f32 %v2265_v63, 0.0  ;;  %v2276_v41 = vadd.f32 %v5369_v53, %v7640_v43 }
 0x2b9   : > { %v2267_v51 = vpop.f32.mrf.mxu0 }
 0x2ba   : > { %2927 = vst.msk [vmem:[#allocation3 + $0xc8] sm:$0xf] %vm2675_vm13, %v5273_v7  ;;  %v5271_v48 = vpack.c.bf16 %v2355_v25, %v2355_v25  ;;  %v2358_v0 = vmax.f32 %v2276_v41, 0.0  ;;  %v2268_v17 = vadd.f32 %v7640_v43, %v2267_v51 }
 0x2bc   : > { %2925 = vst.msk [vmem:[#allocation3 + $0xb0] sm:$0xf] %vm2675_vm13, %v5271_v48  ;;  %v5274_v40 = vpack.c.bf16 %v2358_v0, %v2358_v0  ;;  %v2356_v26 = vmax.f32 %v2268_v17, 0.0 }
 0x2be   : > { %2928 = vst.msk [vmem:[#allocation3 + $0xcc] sm:$0xf] %vm2675_vm13, %v5274_v40  ;;  %v5272_v49 = vpack.c.bf16 %v2356_v26, %v2356_v26 }
 0x2c0   : > { %2926 = vst.msk [vmem:[#allocation3 + $0xb4] sm:$0xf] %vm2675_vm13, %v5272_v49 }
 0x2c1   : > { %v7759_v61 = vld [vmem:[#allocation3 + $0xc8] sm:$0xf] }
 0x2c3   : > { %v7767_v62 = vld [vmem:[#allocation3 + $0xb0] sm:$0xf] }
 0x2c5   : > { %v7761_v34 = vld [vmem:[#allocation3 + $0xcc] sm:$0xf] }
 0x2c6   : > { %v7765_v32 = vcombine.low %v7759_v61, %v7761_v34 }
 0x2c7   : > { %v7769_v11 = vld [vmem:[#allocation3 + $0xb4] sm:$0xf] }
 0x2c8   : > { %v3226_v45 = vshrl.u32 %v7765_v32, 16  ;;  %v3229_v56 = vshll.u32 %v7765_v32, 16  ;;  %v7775_v42 = vcombine.low %v7767_v62, %v7769_v11 }
 0x2ca   : > { %v3228_v30 = vrot.slane %v3226_v45, 4  ;;  %v3231_v3 = vrot.slane %v3229_v56, 5  ;;  %v3218_v27 = vshrl.u32 %v7775_v42, 16  ;;  %v3221_v35 = vshll.u32 %v7775_v42, 16 }
 0x2cc   : > { %v7779_v44 = vor.u32 %v3231_v3, %v3228_v30  ;;  %v3220_v5 = vrot.slane %v3218_v27, 4  ;;  %v3223_v28 = vrot.slane %v3221_v35, 5 }
 0x2ce   : > { %3305 = vrot.lane.b32.xlu0 %v7779_v44, %s5603_s9  ;;  %v7783_v23 = vor.u32 %v3223_v28, %v3220_v5  ;;  %v5372_v33 = vpop.f32.mrf.mxu0 }
 0x2cf   : > { %v2289_v47 = vadd.f32 %v5372_v33, %v7640_v43 }
 0x2d0   : > { %3303 = vrot.lane.b32.xlu1 %v7783_v23, %s5603_s9  ;;  %v2280_v21 = vpop.f32.mrf.mxu0 }
 0x2d1   : > { %v2361_v38 = vmax.f32 %v2289_v47, 0.0  ;;  %v2281_v12 = vadd.f32 %v7640_v43, %v2280_v21 }
 0x2d2   : > { %v5373_v54 = vpop.f32.mrf.mxu0 }
 0x2d3   : > { %v5277_v20 = vpack.c.bf16 %v2361_v38, %v2361_v38  ;;  %v2359_v59 = vmax.f32 %v2281_v12, 0.0  ;;  %v2292_v31 = vadd.f32 %v5373_v54, %v7640_v43 }
 0x2d4   : > { %v2283_v50 = vpop.f32.mrf.mxu0 }
 0x2d5   : > { %2931 = vst.msk [vmem:[#allocation3 + $0xf8] sm:$0xf] %vm2675_vm13, %v5277_v20  ;;  %v5275_v63 = vpack.c.bf16 %v2359_v59, %v2359_v59  ;;  %v2362_v53 = vmax.f32 %v2292_v31, 0.0  ;;  %v2284_v7 = vadd.f32 %v7640_v43, %v2283_v50 }
 0x2d7   : > { %2929 = vst.msk [vmem:[#allocation3 + $0xe0] sm:$0xf] %vm2675_vm13, %v5275_v63  ;;  %v5278_v25 = vpack.c.bf16 %v2362_v53, %v2362_v53  ;;  %v2360_v41 = vmax.f32 %v2284_v7, 0.0 }
 0x2d9   : > { %2932 = vst.msk [vmem:[#allocation3 + $0xfc] sm:$0xf] %vm2675_vm13, %v5278_v25  ;;  %v5276_v51 = vpack.c.bf16 %v2360_v41, %v2360_v41 }
 0x2db   : > { %2930 = vst.msk [vmem:[#allocation3 + $0xe4] sm:$0xf] %vm2675_vm13, %v5276_v51 }
 0x2dc   : > { %v7795_v48 = vld [vmem:[#allocation3 + $0xf8] sm:$0xf] }
 0x2de   : > { %v7800_v40 = vld [vmem:[#allocation3 + $0xe0] sm:$0xf] }
 0x2e0   : > { %v2987_v0 = vld [vmem:[#allocation3 + $0xfc] sm:$0xf] }
 0x2e1   : > { %v7798_v17 = vcombine.low %v7795_v48, %v2987_v0 }
 0x2e2   : > { %v7802_v26 = vld [vmem:[#allocation3 + $0xe4] sm:$0xf] }
 0x2e3   : > { %v3242_v49 = vshrl.u32 %v7798_v17, 16  ;;  %v3245_v45 = vshll.u32 %v7798_v17, 16  ;;  %v7808_v56 = vcombine.low %v7800_v40, %v7802_v26 }
 0x2e5   : > { %v3244_v30 = vrot.slane %v3242_v49, 4  ;;  %v3247_v3 = vrot.slane %v3245_v45, 5  ;;  %v3234_v27 = vshrl.u32 %v7808_v56, 16  ;;  %v3237_v35 = vshll.u32 %v7808_v56, 16 }
 0x2e7   : > { %v7812_v5 = vor.u32 %v3247_v3, %v3244_v30  ;;  %v3236_v28 = vrot.slane %v3234_v27, 4  ;;  %v3239_v33 = vrot.slane %v3237_v35, 5 }
 0x2e9   : > { %3309 = vrot.lane.b32.xlu0 %v7812_v5, %s5603_s9  ;;  %v7816_v47 = vor.u32 %v3239_v33, %v3236_v28 }
 0x2ea   : > { %v5376_v21 = vpop.f32.mrf.mxu0 }
 0x2eb   : > { %v2305_v38 = vadd.f32 %v5376_v21, %v7640_v43  ;;  %3307 = vrot.lane.b32.xlu1 %v7816_v47, %s5603_s9 }
 0x2ec   : > { %v2296_v12 = vpop.f32.mrf.mxu0 }
 0x2ed   : > { %v2365_v54 = vmax.f32 %v2305_v38, 0.0  ;;  %v2297_v20 = vadd.f32 %v7640_v43, %v2296_v12 }
 0x2ee   : > { %v5377_v59 = vpop.f32.mrf.mxu0 }
 0x2ef   : > { %v5281_v31 = vpack.c.bf16 %v2365_v54, %v2365_v54  ;;  %v2363_v50 = vmax.f32 %v2297_v20, 0.0  ;;  %v2308_v63 = vadd.f32 %v5377_v59, %v7640_v43 }
 0x2f0   : > { %v2299_v53 = vpop.f32.mrf.mxu0 }
 0x2f1   : > { %2935 = vst.msk [vmem:[#allocation3 + $0x128] sm:$0xf] %vm2675_vm13, %v5281_v31  ;;  %v5279_v7 = vpack.c.bf16 %v2363_v50, %v2363_v50  ;;  %v2366_v25 = vmax.f32 %v2308_v63, 0.0  ;;  %v2300_v41 = vadd.f32 %v7640_v43, %v2299_v53 }
 0x2f3   : > { %2933 = vst.msk [vmem:[#allocation3 + $0x110] sm:$0xf] %vm2675_vm13, %v5279_v7  ;;  %v5282_v51 = vpack.c.bf16 %v2366_v25, %v2366_v25  ;;  %v2364_v0 = vmax.f32 %v2300_v41, 0.0 }
 0x2f5   : > { %2936 = vst.msk [vmem:[#allocation3 + $0x12c] sm:$0xf] %vm2675_vm13, %v5282_v51  ;;  %v5280_v49 = vpack.c.bf16 %v2364_v0, %v2364_v0 }
 0x2f7   : > { %2934 = vst.msk [vmem:[#allocation3 + $0x114] sm:$0xf] %vm2675_vm13, %v5280_v49 }
 0x2f8   : > { %v7828_v45 = vld [vmem:[#allocation3 + $0x128] sm:$0xf] }
 0x2fa   : > { %v7833_v27 = vld [vmem:[#allocation3 + $0x110] sm:$0xf] }
 0x2fc   : > { %v2995_v30 = vld [vmem:[#allocation3 + $0x12c] sm:$0xf] }
 0x2fd   : > { %v7831_v3 = vcombine.low %v7828_v45, %v2995_v30 }
 0x2fe   : > { %v2991_v35 = vld [vmem:[#allocation3 + $0x114] sm:$0xf] }
 0x2ff   : > { %v3258_v28 = vshrl.u32 %v7831_v3, 16  ;;  %v3261_v33 = vshll.u32 %v7831_v3, 16  ;;  %v7838_v21 = vcombine.low %v7833_v27, %v2991_v35 }
 0x301   : > { %v3260_v38 = vrot.slane %v3258_v28, 4  ;;  %v3263_v12 = vrot.slane %v3261_v33, 5  ;;  %v3250_v54 = vshrl.u32 %v7838_v21, 16  ;;  %v3253_v20 = vshll.u32 %v7838_v21, 16 }
 0x303   : > { %v7842_v59 = vor.u32 %v3263_v12, %v3260_v38  ;;  %v3252_v31 = vrot.slane %v3250_v54, 4  ;;  %v3255_v50 = vrot.slane %v3253_v20, 5 }
 0x305   : > { %9899 = vst [vmem:[#allocation50_spill] sm:$0xff] %v7842_v59  ;;  %3313 = vrot.lane.b32.xlu0 %v7842_v59, %s5603_s9  ;;  %v7846_v63 = vor.u32 %v3255_v50, %v3252_v31  ;;  %v9910_v59 = vld [vmem:[#allocation18_spill] sm:$0xff] }
 0x306   : > { %v5380_v53 = vpop.f32.mrf.mxu0 }
 0x307   : > { %9900 = vst [vmem:[#allocation88_spill] sm:$0xff] %v7846_v63  ;;  %v2321_v7 = vadd.f32 %v5380_v53, %v7640_v43  ;;  %3311 = vrot.lane.b32.xlu1 %v7846_v63, %s5603_s9 }
 0x308   : > { %v2312_v25 = vpop.f32.mrf.mxu0 }
 0x309   : > { %v2369_v41 = vmax.f32 %v2321_v7, 0.0  ;;  %v2313_v51 = vadd.f32 %v7640_v43, %v2312_v25 }
 0x30a   : > { %v5381_v0 = vpop.f32.mrf.mxu0 }
 0x30b   : > { %v5285_v49 = vpack.c.bf16 %v2369_v41, %v2369_v41  ;;  %v2367_v30 = vmax.f32 %v2313_v51, 0.0  ;;  %v2324_v35 = vadd.f32 %v5381_v0, %v7640_v43 }
 0x30c   : > { %v2315_v28 = vpop.f32.mrf.mxu0 }
 0x30d   : > { %2939 = vst.msk [vmem:[#allocation3 + $0x158] sm:$0xf] %vm2675_vm13, %v5285_v49  ;;  %v5283_v33 = vpack.c.bf16 %v2367_v30, %v2367_v30  ;;  %v2370_v38 = vmax.f32 %v2324_v35, 0.0  ;;  %v2316_v12 = vadd.f32 %v7640_v43, %v2315_v28 }
 0x30f   : > { %2937 = vst.msk [vmem:[#allocation3 + $0x140] sm:$0xf] %vm2675_vm13, %v5283_v33  ;;  %v5286_v54 = vpack.c.bf16 %v2370_v38, %v2370_v38  ;;  %v2368_v20 = vmax.f32 %v2316_v12, 0.0 }
 0x311   : > { %2940 = vst.msk [vmem:[#allocation3 + $0x15c] sm:$0xf] %vm2675_vm13, %v5286_v54  ;;  %v5284_v31 = vpack.c.bf16 %v2368_v20, %v2368_v20 }
 0x313   : > { %2938 = vst.msk [vmem:[#allocation3 + $0x144] sm:$0xf] %vm2675_vm13, %v5284_v31  ;;  %v3369_v31 = vrot.slane %v7409_v1, 5 }
 0x314   : > { %v3002_v50 = vld [vmem:[#allocation3 + $0x158] sm:$0xf] }
 0x316   : > { %v2998_v25 = vld [vmem:[#allocation3 + $0x140] sm:$0xf] }
 0x318   : > { %v3003_v53 = vld [vmem:[#allocation3 + $0x15c] sm:$0xf] }
 0x319   : > { %v7858_v7 = vcombine.low %v3002_v50, %v3003_v53 }
 0x31a   : > { %v2999_v41 = vld [vmem:[#allocation3 + $0x144] sm:$0xf] }
 0x31b   : > { %9901 = vst [vmem:[#allocation90_spill] sm:$0xff] %v7858_v7  ;;  %v3274_v51 = vshrl.u32 %v7858_v7, 16  ;;  %v3277_v0 = vshll.u32 %v7858_v7, 16  ;;  %v7862_v49 = vcombine.low %v2998_v25, %v2999_v41  ;;  %v9908_v7 = vld [vmem:[#allocation16_spill] sm:$0xff] }
 0x31d   : > { %9902 = vst [vmem:[#allocation92_spill] sm:$0xff] %v7862_v49  ;;  %v3276_v30 = vrot.slane %v3274_v51, 4  ;;  %v3279_v35 = vrot.slane %v3277_v0, 5  ;;  %v3266_v28 = vshrl.u32 %v7862_v49, 16  ;;  %v3269_v33 = vshll.u32 %v7862_v49, 16 }
 0x31f   : > { %v7866_v38 = vor.u32 %v3279_v35, %v3276_v30  ;;  %v3268_v12 = vrot.slane %v3266_v28, 4  ;;  %v3271_v54 = vrot.slane %v3269_v33, 5  ;;  %v7880_v33 = vrot.slane %v7667_v16, 5 }
 0x321   : > { %9903 = vst [vmem:[#allocation51_spill] sm:$0xff] %v7866_v38  ;;  %3317 = vrot.lane.b32.xlu0 %v7866_v38, %s5603_s9  ;;  %v7870_v20 = vor.u32 %v3271_v54, %v3268_v12  ;;  %v9907_v38 = vld [vmem:[#allocation17_spill] sm:$0xff] }
 0x322   : > { %v5384_v50 = vpop.f32.mrf.mxu0 }
 0x323   : > { %9904 = vst [vmem:[#allocation52_spill] sm:$0xff] %v7870_v20  ;;  %v2337_v53 = vadd.f32 %v5384_v50, %v7640_v43  ;;  %3315 = vrot.lane.b32.xlu1 %v7870_v20, %s5603_s9  ;;  %v5103_v20 = vcombine.low %v9908_v7, %v9907_v38  ;;  %v9913_v7 = vld [vmem:[#allocation20_spill] sm:$0xff] }
 0x324   : > { %v2328_v25 = vpop.f32.mrf.mxu0 }
 0x325   : > { %v2373_v41 = vmax.f32 %v2337_v53, 0.0  ;;  %v2329_v51 = vadd.f32 %v7640_v43, %v2328_v25  ;;  %3417 = vrot.lane.b32.xlu0 %v3369_v31, %s5605_s11  ;;  %5400 = vmatprep.mubr.msk.bf16.mxu1 %vm1357_vm3, %v5103_v20  ;;  %v9915_v20 = vld [vmem:[#allocation22_spill] sm:$0xff] }
 0x326   : > { %v5385_v0 = vpop.f32.mrf.mxu0 }
 0x327   : > { %v5289_v30 = vpack.c.bf16 %v2373_v41, %v2373_v41  ;;  %v2371_v35 = vmax.f32 %v2329_v51, 0.0  ;;  %v2340_v28 = vadd.f32 %v5385_v0, %v7640_v43  ;;  %v7888_v41 = vrot.slane %v7657_v4, 5 }
 0x328   : > { %v2331_v1 = vpop.f32.mrf.mxu0  ;;  %v7900_v51 = vrot.slane %v7693_v52, 5  ;;  %v7914_v52 = vrot.slane %v7729_v46, 5 }
 0x329   : > { %2943 = vst.msk [vmem:[#allocation3 + $0x188] sm:$0xf] %vm2675_vm13, %v5289_v30  ;;  %v5287_v12 = vpack.c.bf16 %v2371_v35, %v2371_v35  ;;  %v2374_v54 = vmax.f32 %v2340_v28, 0.0  ;;  %v2332_v50 = vadd.f32 %v7640_v43, %v2331_v1  ;;  %3421 = vrot.lane.b32.xlu0 %v7880_v33, %s5605_s11  ;;  %v7895_v43 = vrot.slane %v7703_v9, 5  ;;  %v5549_v28 = vld [vmem:[#allocation3 + $0x10] ss:$0 sps:$4 sm:$0xff]  }
 0x32a   : > { %v7905_v30 = vrot.slane %v7739_v57, 5 }
 0x32b   : > { %2941 = vst.msk [vmem:[#allocation3 + $0x170] sm:$0xf] %vm2675_vm13, %v5287_v12  ;;  %v5290_v53 = vpack.c.bf16 %v2374_v54, %v2374_v54  ;;  %v2372_v25 = vmax.f32 %v2332_v50, 0.0  ;;  %v3370_v50 = vrot.slane %v5549_v28, 5 }
 0x32d   : > { %2944 = vst.msk [vmem:[#allocation3 + $0x18c] sm:$0xf] %vm2675_vm13, %v5290_v53  ;;  %v5288_v16 = vpack.c.bf16 %v2372_v25, %v2372_v25  ;;  %3425 = vrot.lane.b32.xlu0 %v7888_v41, %s5605_s11  ;;  %v5550_v53 = vld [vmem:[#allocation3 + $0x28] ss:$0 sps:$4 sm:$0xff]   ;;  %v7923_v25 = vrot.slane %v7775_v42, 5 }
 0x32e   : > { %v3373_v46 = vrot.slane %v5550_v53, 5  ;;  %v5554_v53 = vld [vmem:[#allocation3 + $0x88] ss:$0 sps:$4 sm:$0xff]  }
 0x32f   : > { %2942 = vst.msk [vmem:[#allocation3 + $0x174] sm:$0xf] %vm2675_vm13, %v5288_v16  ;;  %v3371_v16 = vsel %vm878_vm1, %v3369_v31, %v3370_v50  ;;  %v7941_v31 = vrot.slane %v7808_v56, 5 }
 0x330   : > { %v7936_v28 = vsel %vm878_vm1, %v7880_v33, %v3373_v46  ;;  %v3385_v46 = vrot.slane %v5554_v53, 5  ;;  %v2953_v53 = vld [vmem:[#allocation3 + $0x34] sm:$0xf] }
 0x331   : > { %3429 = vrot.lane.b32.xlu0 %v7895_v43, %s5605_s11 }
 0x332   : > { %v3006_v4 = vld [vmem:[#allocation3 + $0x170] sm:$0xf] }
 0x335   : > { %3433 = vrot.lane.b32.xlu0 %v7900_v51, %s5605_s11 }
 0x336   : > { %v3007_v0 = vld [vmem:[#allocation3 + $0x174] sm:$0xf] }
 0x337   : > { %v7907_v35 = vcombine.low %v3006_v4, %v3007_v0  ;;  %v5551_v4 = vld [vmem:[#allocation3 + $0x40] ss:$0 sps:$4 sm:$0xff]   ;;  %v7930_v0 = vrot.slane %v7765_v32, 5 }
 0x338   : > { %v3376_v42 = vrot.slane %v5551_v4, 5  ;;  %v5555_v4 = vld [vmem:[#allocation3 + $0xa0] ss:$0 sps:$4 sm:$0xff]  }
 0x339   : > { %9905 = vst [vmem:[#allocation53_spill] sm:$0xff] %v7907_v35  ;;  %3437 = vrot.lane.b32.xlu0 %v7905_v30, %s5605_s11  ;;  %v3282_v9 = vshrl.u32 %v7907_v35, 16  ;;  %v3285_v1 = vshll.u32 %v7907_v35, 16  ;;  %v5557_v35 = vld [vmem:[#allocation3 + $0xd0] ss:$0 sps:$4 sm:$0xff]  }
 0x33a   : > { %v7947_v32 = vsel %vm878_vm1, %v7888_v41, %v3376_v42  ;;  %v7974_v42 = vrot.slane %v7831_v3, 5 }
 0x33b   : > { %v3284_v12 = vrot.slane %v3282_v9, 4  ;;  %v3287_v54 = vrot.slane %v3285_v1, 5  ;;  %v5552_v9 = vld [vmem:[#allocation3 + $0x58] ss:$0 sps:$4 sm:$0xff]  }
 0x33c   : > { %v3379_v1 = vrot.slane %v5552_v9, 5  ;;  %v2949_v9 = vld [vmem:[#allocation3 + $0x1c] sm:$0xf] }
 0x33d   : > { %3441 = vrot.lane.b32.xlu0 %v7914_v52, %s5605_s11  ;;  %v7918_v57 = vor.u32 %v3287_v54, %v3284_v12  ;;  %v5553_v12 = vld [vmem:[#allocation3 + $0x70] ss:$0 sps:$4 sm:$0xff]   ;;  %v7952_v54 = vrot.slane %v7798_v17, 5 }
 0x33e   : > { %v7958_v56 = vsel %vm878_vm1, %v7895_v43, %v3379_v1  ;;  %v3382_v50 = vrot.slane %v5553_v12, 5  ;;  %v3388_v1 = vrot.slane %v5555_v4, 5  ;;  %v5556_v12 = vld [vmem:[#allocation3 + $0xb8] ss:$0 sps:$4 sm:$0xff]   ;;  %v3394_v4 = vrot.slane %v5557_v35, 5 }
 0x33f   : > { %9906 = vst [vmem:[#allocation78_spill] sm:$0xff] %v7918_v57  ;;  %3319 = vrot.lane.b32.xlu1 %v7918_v57, %s5603_s9  ;;  %v3391_v57 = vrot.slane %v5556_v12, 5  ;;  %v5559_v12 = vld [vmem:[#allocation3 + $0x100] ss:$0 sps:$4 sm:$0xff]  }
 0x340   : > { %v7969_v17 = vsel %vm878_vm1, %v7900_v51, %v3382_v50  ;;  %v7983_v50 = vcombine.low %v2949_v9, %v7659_v15  ;;  %v7991_v3 = vsel %vm878_vm1, %v7914_v52, %v3388_v1  ;;  %v5558_v9 = vld [vmem:[#allocation3 + $0xe8] ss:$0 sps:$4 sm:$0xff]  }
 0x341   : > { %3445 = vrot.lane.b32.xlu0 %v7923_v25, %s5605_s11  ;;  %v8002_v15 = vsel %vm878_vm1, %v7923_v25, %v3391_v57  ;;  %v3397_v1 = vrot.slane %v5558_v9, 5  ;;  %v3400_v57 = vrot.slane %v5559_v12, 5  ;;  %v5561_v9 = vld [vmem:[#allocation3 + $0x130] ss:$0 sps:$4 sm:$0xff]   ;;  %v2957_v12 = vld [vmem:[#allocation3 + $0x4c] sm:$0xf] }
 0x342   : > { %v8045_v49 = vcombine.low %v2957_v12, %v7695_v2  ;;  %v9912_v2 = vld [vmem:[#allocation21_spill] sm:$0xff]  ;;  %v8078_v12 = vcombine.low %v7653_v8, %v7653_v8  ;;  %v9918_v8 = vld [vmem:[#allocation32_spill] sm:$0xff] }
 0x343   : > { %3419 = vrot.lane.b32.xlu1 %v3371_v16, %s5605_s11  ;;  %v7963_v16 = vrot.slane %v7838_v21, 5  ;;  %v7980_v21 = vsel %vm878_vm1, %v7905_v30, %v3385_v46  ;;  %v7994_v46 = vcombine.low %v2953_v53, %v7651_v24  ;;  %v8010_v24 = vsel %vm878_vm1, %v7930_v0, %v3394_v4  ;;  %v5560_v53 = vld [vmem:[#allocation3 + $0x118] ss:$0 sps:$4 sm:$0xff]  }
 0x344   : > { %v8018_v35 = vsel %vm878_vm1, %v7941_v31, %v3397_v1  ;;  %v3403_v4 = vrot.slane %v5560_v53, 5  ;;  %v3406_v53 = vrot.slane %v5561_v9, 5  ;;  %v5105_v38 = vcombine.low %v9913_v7, %v9912_v2  ;;  %v8063_v9 = vpop.permute.xlu0 %3289  ;;  %v9919_v7 = vld [vmem:[#allocation31_spill] sm:$0xff] }
 0x345   : > { %3449 = vrot.lane.b32.xlu0 %v7930_v0, %s5605_s11 }
 0x347   : > { %3423 = vrot.lane.b32.xlu1 %v7936_v28, %s5605_s11 }
 0x349   : > { %3453 = vrot.lane.b32.xlu0 %v7941_v31, %s5605_s11 }
 0x34b   : > { %3427 = vrot.lane.b32.xlu1 %v7947_v32, %s5605_s11 }
 0x34d   : > { %3457 = vrot.lane.b32.xlu0 %v7952_v54, %s5605_s11 }
 0x34f   : > { %3431 = vrot.lane.b32.xlu1 %v7958_v56, %s5605_s11 }
 0x351   : > { %3461 = vrot.lane.b32.xlu0 %v7963_v16, %s5605_s11 }
 0x353   : > { %3435 = vrot.lane.b32.xlu1 %v7969_v17, %s5605_s11 }
 0x355   : > { %3465 = vrot.lane.b32.xlu0 %v7974_v42, %s5605_s11 }
 0x357   : > { %3439 = vrot.lane.b32.xlu1 %v7980_v21, %s5605_s11 }
 0x359   : > { %3489 = vrot.lane.b32.xlu0 %v7983_v50, %s5607_s15 }
 0x35b   : > { %3443 = vrot.lane.b32.xlu1 %v7991_v3, %s5605_s11 }
 0x35d   : > { %3493 = vrot.lane.b32.xlu0 %v7994_v46, %s5607_s15 }
 0x35f   : > { %3447 = vrot.lane.b32.xlu1 %v8002_v15, %s5605_s11 }
 0x361   : > { %3562 = vrot.lane.b32.xlu0 %v7678_v55, %s5609_s21  ;;  %v8026_v55 = vsel %vm878_vm1, %v7952_v54, %v3400_v57  ;;  %v8040_v57 = vsel %vm878_vm1, %v7963_v16, %v3403_v4  ;;  %v8057_v4 = vsel %vm878_vm1, %v7974_v42, %v3406_v53  ;;  %v9916_v53 = vld [vmem:[#allocation25_spill] sm:$0xff] }
 0x362   : > { %9911 = vst [vmem:[#allocation79_spill] sm:$0xff] %v8057_v4 }
 0x363   : > { %3451 = vrot.lane.b32.xlu1 %v8010_v24, %s5605_s11 }
 0x365   : > { %3600 = vrot.lane.b32.xlu0 %v7880_v33, %s5610_s26  ;;  %v2375_v33 = vld [vmem:[%s9464_s5] sm:$0x3] }
 0x366   : > { %5466 = vmatprep.subr.msk.bf16.mxu1 %vm2178_vm2, %v2375_v33  ;;  %v2512_v1 = vsel %vm2178_vm2, %v2375_v33, 0  ;;  %5465 = vmatprep.subr.msk.bf16.mxu0 %vm2178_vm2, %v2375_v33  ;;  %v9909_v33 = vld [vmem:[#allocation19_spill] sm:$0xff]  ;;  %vm4233_vm2 = vcmask 457728  }
 0x367   : > { %3455 = vrot.lane.b32.xlu1 %v8018_v35, %s5605_s11  ;;  %5463 = vmatpush3.bf16.msra.mxu1 %v2512_v1  ;;  %v5104_v63 = vcombine.low %v9910_v59, %v9909_v33  ;;  %v8067_v59 = vcombine.low %v7661_v29, %v7661_v29  ;;  %v8083_v29 = vpop.permute.xlu0 %3293  ;;  %v9917_v33 = vld [vmem:[#allocation24_spill] sm:$0xff] }
 0x368   : > { %5387 = vmatpush3.bf16.msra.mxu0 %v2512_v1  ;;  %v5107_v2 = vcombine.low %v9917_v33, %v9916_v53  ;;  %v9922_v33 = vld [vmem:[#allocation33_spill] sm:$0xff] }
 0x369   : > { %3604 = vrot.lane.b32.xlu0 %v7888_v41, %s5610_s26 }
 0x36a   : > { %5401 = vmatmul.mubr.msk.bf16.vlgmr.msra.gmra.mxu1 %vm1357_vm3, %v5104_v63  ;;  %v9914_v63 = vld [vmem:[#allocation23_spill] sm:$0xff] }
 0x36b   : > { %3459 = vrot.lane.b32.xlu1 %v8026_v55, %s5605_s11  ;;  %5404 = vmatprep.mubr.msk.bf16.mxu1 %vm1357_vm3, %v5105_v38  ;;  %v5106_v1 = vcombine.low %v9915_v20, %v9914_v63  ;;  %v5108_v38 = vcombine.low %v9919_v7, %v9918_v8  ;;  %v8094_v63 = vpop.permute.xlu0 %3297  ;;  %v5564_v20 = vld [vmem:[%s9462_s3 + $0x20] ss:$0 sps:$4 sm:$0xff]  }
 0x36c   : > { %5467 = vmatprep.subr.msk.bf16.mxu1 %vm4679_vm14, %v5564_v20  ;;  %v4681_v8 = vsel %vm4679_vm14, %v5564_v20, 0 }
 0x36d   : > { %3672 = vrot.lane.b32.xlu0 %v7994_v46, %s5611_s29  ;;  %5421 = vmatpush3.bf16.msra.mxu1 %v4681_v8  ;;  %v9928_v8 = vld [vmem:[#allocation38_spill] sm:$0xff] }
 0x36f   : > { %3463 = vrot.lane.b32.xlu1 %v8040_v57, %s5605_s11  ;;  %v8107_v53 = vpop.permute.xlu0 %3301 }
 0x370   : > { %9920 = vst [vmem:[#allocation81_spill] sm:$0xff] %v8107_v53 }
 0x371   : > { %3676 = vrot.lane.b32.xlu0 %v8045_v49, %s5611_s29 }
 0x372   : > { %5405 = vmatmul.mubr.msk.bf16.gmra.mxu1 %vm1357_vm3, %v5106_v1 }
 0x373   : > { %3467 = vrot.lane.b32.xlu1 %v8057_v4, %s5605_s11  ;;  %5408 = vmatprep.mubr.msk.bf16.mxu1 %vm1357_vm3, %v5107_v2  ;;  %v8116_v7 = vpop.permute.xlu0 %3305 }
 0x374   : > { %9923 = vst [vmem:[#allocation84_spill] sm:$0xff] %v8116_v7 }
 0x375   : > { %3745 = vrot.lane.b32.xlu0 %v7673_v10, %s5612_s30 }
 0x377   : > { %3491 = vrot.lane.b32.xlu1 %v8067_v59, %s5607_s15  ;;  %v8128_v20 = vpop.permute.xlu0 %3309 }
 0x378   : > { %9926 = vst [vmem:[#allocation60_spill] sm:$0xff] %v8128_v20 }
 0x379   : > { %3783 = vrot.lane.b32.xlu0 %v7888_v41, %s5613_s8  ;;  %v2961_v41 = vld [vmem:[#allocation3 + $0x64] sm:$0xf] }
 0x37a   : > { %5409 = vmatmul.mubr.msk.bf16.gmra.mxu1 %vm1357_vm3, %v5108_v38  ;;  %v8105_v1 = vcombine.low %v2961_v41, %v7687_v14  ;;  %v9924_v14 = vld [vmem:[#allocation37_spill] sm:$0xff]  ;;  %v9925_v38 = vld [vmem:[#allocation35_spill] sm:$0xff] }
 0x37b   : > { %3495 = vrot.lane.b32.xlu1 %v8078_v12, %s5607_s15  ;;  %v5110_v41 = vcombine.low %v9925_v38, %v9924_v14  ;;  %v8143_v38 = vpop.permute.xlu0 %3313 }
 0x37c   : > { %9929 = vst [vmem:[#allocation94_spill] sm:$0xff] %v8143_v38 }
 0x37d   : > { %3787 = vrot.lane.b32.xlu0 %v7895_v43, %s5613_s8 }
 0x37f   : > { %3564 = vrot.lane.b32.xlu1 %v7673_v10, %s5609_s21  ;;  %v9921_v10 = vld [vmem:[#allocation34_spill] sm:$0xff] }
 0x380   : > { %v5109_v2 = vcombine.low %v9922_v33, %v9921_v10  ;;  %v5566_v10 = vld [vmem:[%s9462_s3 + $0x10] sm:$0xff]   ;;  %v8137_v33 = vcombine.low %v7697_v22, %v7697_v22  ;;  %v5567_v22 = vld [vmem:[%s9462_s3 + $0x8] sm:$0xff]  }
 0x381   : > { %3497 = vrot.lane.b32.xlu0 %v8045_v49, %s5607_s15 }
 0x382   : > { %5412 = vmatprep.mubr.msk.bf16.mxu1 %vm1357_vm3, %v5109_v2  ;;  %v9927_v2 = vld [vmem:[#allocation40_spill] sm:$0xff] }
 0x383   : > { %3602 = vrot.lane.b32.xlu1 %v7936_v28, %s5610_s26  ;;  %v5565_v28 = vld [vmem:[%s9462_s3 + $0x18] sm:$0xff]   ;;  %5413 = vmatmul.mubr.msk.bf16.gmra.mxu1 %vm1357_vm3, %v5110_v41  ;;  %v5111_v14 = vcombine.low %v9928_v8, %v9927_v2  ;;  %v9930_v41 = vld [vmem:[#allocation45_spill] sm:$0xff]  ;;  %v8163_v8 = vpop.permute.xlu1 %3291 }
 0x384   : > { %5422 = vmatprep.subr.bf16.mxu1 %v5565_v28  ;;  %v2965_v2 = vld [vmem:[#allocation3 + $0x7c] sm:$0xf] }
 0x385   : > { %3501 = vrot.lane.b32.xlu0 %v8105_v1, %s5607_s15  ;;  %5423 = vmatpush3.bf16.msra.mxu1 %v5565_v28  ;;  %v9931_v28 = vld [vmem:[#allocation44_spill] sm:$0xff] }
 0x386   : > { %5424 = vmatprep.subr.bf16.mxu1 %v5566_v10  ;;  %v5112_v20 = vcombine.low %v9931_v28, %v9930_v41  ;;  %5416 = vmatprep.mubr.msk.bf16.mxu1 %vm1357_vm3, %v5111_v14  ;;  %v9933_v14 = vld [vmem:[#allocation7_spill] sm:$0xff]  ;;  %v8170_v28 = vcombine.low %v2965_v2, %v7731_v19 }
 0x387   : > { %3606 = vrot.lane.b32.xlu1 %v7947_v32, %s5610_s26  ;;  %v8179_v7 = vpop.permute.xlu1 %3295 }
 0x389   : > { %3566 = vrot.lane.b32.xlu0 %v7711_v18, %s5609_s21  ;;  %5425 = vmatpush3.bf16.msra.mxu1 %v5566_v10  ;;  %v5568_v10 = vld [vmem:[%s9462_s3] sm:$0xff]  }
 0x38a   : > { %5426 = vmatprep.subr.bf16.mxu1 %v5567_v22 }
 0x38b   : > { %3674 = vrot.lane.b32.xlu1 %v8078_v12, %s5611_s29  ;;  %5417 = vmatmul.mubr.msk.bf16.gmra.mxu1 %vm1357_vm3, %v5112_v20  ;;  %v9934_v20 = vld [vmem:[#allocation6_spill] sm:$0xff]  ;;  %v8188_v2 = vpop.permute.xlu1 %3299 }
 0x38c   : > { %v5097_v41 = vcombine.low %v9934_v20, %v9933_v14 }
 0x38d   : > { %3608 = vrot.lane.b32.xlu0 %v7895_v43, %s5610_s26  ;;  %5427 = vmatpush3.bf16.msra.mxu1 %v5567_v22  ;;  %v9936_v22 = vld [vmem:[#allocation4_spill] sm:$0xff] }
 0x38e   : > { %5428 = vmatprep.subr.bf16.mxu1 %v5568_v10  ;;  %5388 = vmatprep.mubr.msk.bf16.mxu0 %vm1357_vm3, %v5097_v41 }
 0x38f   : > { %3678 = vrot.lane.b32.xlu1 %v8137_v33, %s5611_s29 }
 0x391   : > { %3612 = vrot.lane.b32.xlu0 %v7900_v51, %s5610_s26  ;;  %5429 = vmatpush3.bf16.msra.mxu1 %v5568_v10  ;;  %v8198_v10 = vcombine.low %v7689_v60, %v7689_v60  ;;  %v2969_v60 = vld [vmem:[#allocation3 + $0x94] sm:$0xf] }
 0x393   : > { %v8156_v43 = vpop.permute.xlu0 %3317  ;;  %3747 = vrot.lane.b32.xlu1 %v7711_v18, %s5612_s30  ;;  %v9935_v18 = vld [vmem:[#allocation5_spill] sm:$0xff]  ;;  %9937 = vst [vmem:[#allocation96_spill] sm:$0xff] %v8198_v10 }
 0x394   : > { %9932 = vst [vmem:[#allocation61_spill] sm:$0xff] %v8156_v43  ;;  %v5098_v38 = vcombine.low %v9936_v22, %v9935_v18 }
 0x395   : > { %3680 = vrot.lane.b32.xlu0 %v8105_v1, %s5611_s29 }
 0x396   : > { %5389 = vmatmul.mubr.msk.bf16.vlgmr.msra.gmra.mxu0 %vm1357_vm3, %v5098_v38  ;;  %v8200_v38 = vpop.permute.xlu1 %3303 }
 0x397   : > { %v8172_v43 = vpop.permute.xlu0 %3417  ;;  %3785 = vrot.lane.b32.xlu1 %v7947_v32, %s5613_s8  ;;  %9938 = vst [vmem:[#allocation97_spill] sm:$0xff] %v8200_v38 }
 0x399   : > { %3684 = vrot.lane.b32.xlu0 %v8170_v28, %s5611_s29 }
 0x39a   : > { %v8208_v20 = vpop.permute.xlu1 %3307 }
 0x39b   : > { %v8184_v19 = vpop.permute.xlu0 %3421  ;;  %3789 = vrot.lane.b32.xlu1 %v7958_v56, %s5613_s8  ;;  %9939 = vst [vmem:[#allocation98_spill] sm:$0xff] %v8208_v20 }
 0x39d   : > { %3749 = vrot.lane.b32.xlu0 %v7707_v6, %s5612_s30 }
 0x39e   : > { %v8216_v18 = vpop.permute.xlu1 %3311 }
 0x39f   : > { %v8192_v32 = vpop.permute.xlu0 %3425  ;;  %3499 = vrot.lane.b32.xlu1 %v8137_v33, %s5607_s15  ;;  %9941 = vst [vmem:[#allocation55_spill] sm:$0xff] %v8216_v18 }
 0x3a1   : > { %3791 = vrot.lane.b32.xlu0 %v7900_v51, %s5613_s8  ;;  %v8221_v51 = vcombine.low %v2969_v60, %v7723_v36 }
 0x3a2   : > { %v8227_v20 = vpop.permute.xlu1 %3315 }
 0x3a3   : > { %v8204_v14 = vpop.permute.xlu0 %3429  ;;  %3503 = vrot.lane.b32.xlu1 %v8198_v10, %s5607_s15  ;;  %9942 = vst [vmem:[#allocation56_spill] sm:$0xff] %v8221_v51  ;;  %9944 = vst [vmem:[#allocation85_spill] sm:$0xff] %v8227_v20 }
 0x3a5   : > { %3795 = vrot.lane.b32.xlu0 %v7905_v30, %s5613_s8 }
 0x3a7   : > { %v8212_v41 = vpop.permute.xlu0 %3433  ;;  %3568 = vrot.lane.b32.xlu1 %v7707_v6, %s5609_s21 }
 0x3a8   : > { %9940 = vst [vmem:[#allocation54_spill] sm:$0xff] %v8212_v41 }
 0x3a9   : > { %3505 = vrot.lane.b32.xlu0 %v8170_v28, %s5607_s15 }
 0x3ab   : > { %v8223_v22 = vpop.permute.xlu0 %3437  ;;  %3610 = vrot.lane.b32.xlu1 %v7958_v56, %s5610_s26  ;;  %v8245_v56 = vcombine.low %v7733_v37, %v7733_v37  ;;  %v2973_v37 = vld [vmem:[#allocation3 + $0xac] sm:$0xf] }
 0x3ac   : > { %9943 = vst [vmem:[#allocation57_spill] sm:$0xff] %v8223_v22  ;;  %v8270_v53 = vcombine.low %v2973_v37, %v7767_v62 }
 0x3ad   : > { %3509 = vrot.lane.b32.xlu0 %v8221_v51, %s5607_s15  ;;  %9948 = vst [vmem:[#allocation63_spill] sm:$0xff] %v8245_v56 }
 0x3ae   : > { %9953 = vst [vmem:[#allocation26_spill] sm:$0xff] %v8270_v53 }
 0x3af   : > { %v8231_v6 = vpop.permute.xlu0 %3441  ;;  %3614 = vrot.lane.b32.xlu1 %v7969_v17, %s5610_s26 }
 0x3b0   : > { %9945 = vst [vmem:[#allocation87_spill] sm:$0xff] %v8231_v6 }
 0x3b1   : > { %v8235_v18 = vpop.permute.xlu1 %3319  ;;  %3570 = vrot.lane.b32.xlu0 %v7747_v58, %s5609_s21 }
 0x3b2   : > { %9946 = vst [vmem:[#allocation89_spill] sm:$0xff] %v8235_v18 }
 0x3b3   : > { %v8239_v36 = vpop.permute.xlu0 %3445  ;;  %3682 = vrot.lane.b32.xlu1 %v8198_v10, %s5611_s29  ;;  %v9956_v10 = vld [vmem:[#allocation10_spill] sm:$0xff] }
 0x3b4   : > { %9947 = vst [vmem:[#allocation91_spill] sm:$0xff] %v8239_v36 }
 0x3b5   : > { %v8247_v60 = vpop.permute.xlu1 %3419  ;;  %3616 = vrot.lane.b32.xlu0 %v7905_v30, %s5610_s26  ;;  %v9951_v30 = vld [vmem:[#allocation9_spill] sm:$0xff] }
 0x3b7   : > { %v8251_v20 = vpop.permute.xlu0 %3449  ;;  %3686 = vrot.lane.b32.xlu1 %v8245_v56, %s5611_s29 }
 0x3b8   : > { %9949 = vst [vmem:[#allocation99_spill] sm:$0xff] %v8251_v20  ;;  %v9952_v20 = vld [vmem:[#allocation8_spill] sm:$0xff] }
 0x3b9   : > { %v8255_v18 = vpop.permute.xlu1 %3423  ;;  %3620 = vrot.lane.b32.xlu0 %v7914_v52, %s5610_s26  ;;  %v5099_v38 = vcombine.low %v9952_v20, %v9951_v30  ;;  %v2977_v30 = vld [vmem:[#allocation3 + $0xc4] sm:$0xf] }
 0x3bb   : > { %v8259_v36 = vpop.permute.xlu0 %3453  ;;  %3751 = vrot.lane.b32.xlu1 %v7747_v58, %s5612_s30  ;;  %5392 = vmatprep.mubr.msk.bf16.mxu0 %vm1357_vm3, %v5099_v38 }
 0x3bc   : > { %9950 = vst [vmem:[#allocation65_spill] sm:$0xff] %v8259_v36  ;;  %v9955_v36 = vld [vmem:[#allocation11_spill] sm:$0xff] }
 0x3bd   : > { %v8263_v6 = vpop.permute.xlu1 %3427  ;;  %3688 = vrot.lane.b32.xlu0 %v8221_v51, %s5611_s29  ;;  %v5100_v58 = vcombine.low %v9956_v10, %v9955_v36  ;;  %v8298_v10 = vcombine.low %v7725_v39, %v7725_v39  ;;  %v9975_v51 = vld [vmem:[#allocation14_spill] sm:$0xff] }
 0x3bf   : > { %v8272_v4 = vpop.permute.xlu0 %3457  ;;  %3793 = vrot.lane.b32.xlu1 %v7969_v17, %s5613_s8  ;;  %5393 = vmatmul.mubr.msk.bf16.gmra.mxu0 %vm1357_vm3, %v5100_v58  ;;  %9960 = vst [vmem:[#allocation36_spill] sm:$0xff] %v8298_v10 }
 0x3c0   : > { %9954 = vst [vmem:[#allocation27_spill] sm:$0xff] %v8272_v4 }
 0x3c1   : > { %v8279_v22 = vpop.permute.xlu1 %3431  ;;  %3692 = vrot.lane.b32.xlu0 %v8270_v53, %s5611_s29 }
 0x3c3   : > { %v8284_v20 = vpop.permute.xlu0 %3461  ;;  %3797 = vrot.lane.b32.xlu1 %v7980_v21, %s5613_s8 }
 0x3c4   : > { %9957 = vst [vmem:[#allocation28_spill] sm:$0xff] %v8284_v20 }
 0x3c5   : > { %v8288_v62 = vpop.permute.xlu1 %3435  ;;  %3753 = vrot.lane.b32.xlu0 %v7743_v13, %s5612_s30 }
 0x3c6   : > { %9958 = vst [vmem:[#allocation58_spill] sm:$0xff] %v8288_v62  ;;  %v5583_v62 = vld [vmem:[#allocation3 + $0xc] sm:$0xf] }
 0x3c7   : > { %v8292_v17 = vpop.permute.xlu0 %3465  ;;  %3507 = vrot.lane.b32.xlu1 %v8245_v56, %s5607_s15  ;;  %v5162_v41 = vcombine.low %v5583_v62, %v5583_v62 }
 0x3c8   : > { %9959 = vst [vmem:[#allocation59_spill] sm:$0xff] %v8292_v17 }
 0x3c9   : > { %v8300_v38 = vpop.permute.xlu1 %3439  ;;  %3799 = vrot.lane.b32.xlu0 %v7914_v52, %s5613_s8  ;;  %v8321_v52 = vcombine.low %v2977_v30, %v7759_v61 }
 0x3ca   : > { %9961 = vst [vmem:[#allocation93_spill] sm:$0xff] %v8300_v38 }
 0x3cb   : > { %3511 = vrot.lane.b32.xlu1 %v8298_v10, %s5607_s15  ;;  %v8306_v36 = vpop.permute.xlu0 %3489  ;;  %9964 = vst [vmem:[#allocation103_spill] sm:$0xff] %v8321_v52 }
 0x3cd   : > { %v8308_v37 = vpop.permute.xlu1 %3443  ;;  %3803 = vrot.lane.b32.xlu0 %v7923_v25, %s5613_s8 }
 0x3ce   : > { %9962 = vst [vmem:[#allocation95_spill] sm:$0xff] %v8308_v37  ;;  %v9972_v37 = vld [vmem:[#allocation12_spill] sm:$0xff] }
 0x3cf   : > { %3572 = vrot.lane.b32.xlu1 %v7743_v13, %s5609_s21  ;;  %v8314_v39 = vpop.permute.xlu0 %3493 }
 0x3d1   : > { %v8316_v58 = vpop.permute.xlu1 %3447  ;;  %3513 = vrot.lane.b32.xlu0 %v8270_v53, %s5607_s15 }
 0x3d2   : > { %9963 = vst [vmem:[#allocation67_spill] sm:$0xff] %v8316_v58  ;;  %v2981_v58 = vld [vmem:[#allocation3 + $0xdc] sm:$0xf] }
 0x3d3   : > { %3618 = vrot.lane.b32.xlu1 %v7980_v21, %s5610_s26  ;;  %v8325_v17 = vpop.permute.xlu0 %3562  ;;  %v8345_v21 = vcombine.low %v7769_v11, %v7769_v11  ;;  %v8370_v53 = vcombine.low %v2981_v58, %v7800_v40 }
 0x3d5   : > { %v8327_v4 = vpop.permute.xlu1 %3451  ;;  %3517 = vrot.lane.b32.xlu0 %v8321_v52, %s5607_s15  ;;  %9967 = vst [vmem:[#allocation30_spill] sm:$0xff] %v8345_v21  ;;  %9973 = vst [vmem:[#allocation116_spill] sm:$0xff] %v8370_v53 }
 0x3d6   : > { %9965 = vst [vmem:[#allocation29_spill] sm:$0xff] %v8327_v4 }
 0x3d7   : > { %3622 = vrot.lane.b32.xlu1 %v7991_v3, %s5610_s26  ;;  %v8333_v13 = vpop.permute.xlu0 %3600 }
 0x3d9   : > { %v8335_v20 = vpop.permute.xlu1 %3455  ;;  %3574 = vrot.lane.b32.xlu0 %v7783_v23, %s5609_s21 }
 0x3da   : > { %9966 = vst [vmem:[#allocation69_spill] sm:$0xff] %v8335_v20 }
 0x3db   : > { %3690 = vrot.lane.b32.xlu1 %v8298_v10, %s5611_s29  ;;  %v8341_v61 = vpop.permute.xlu0 %3604 }
 0x3dd   : > { %v8347_v30 = vpop.permute.xlu1 %3459  ;;  %3624 = vrot.lane.b32.xlu0 %v7923_v25, %s5610_s26  ;;  %v9971_v25 = vld [vmem:[#allocation13_spill] sm:$0xff] }
 0x3de   : > { %9968 = vst [vmem:[#allocation100_spill] sm:$0xff] %v8347_v30  ;;  %v5101_v10 = vcombine.low %v9972_v37, %v9971_v25  ;;  %v5582_v25 = vld [vmem:[#allocation3 + $0x8] sm:$0xf] }
 0x3df   : > { %3694 = vrot.lane.b32.xlu1 %v8345_v21, %s5611_s29  ;;  %v8353_v20 = vpop.permute.xlu0 %3672 }
 0x3e0   : > { %5396 = vmatprep.mubr.msk.bf16.mxu0 %vm1357_vm3, %v5101_v10 }
 0x3e1   : > { %v8355_v4 = vpop.permute.xlu1 %3463  ;;  %3628 = vrot.lane.b32.xlu0 %v7930_v0, %s5610_s26 }
 0x3e2   : > { %9969 = vst [vmem:[#allocation39_spill] sm:$0xff] %v8355_v4 }
 0x3e3   : > { %3755 = vrot.lane.b32.xlu1 %v7783_v23, %s5612_s30  ;;  %v8361_v11 = vpop.permute.xlu0 %3676  ;;  %v9974_v23 = vld [vmem:[#allocation15_spill] sm:$0xff] }
 0x3e4   : > { %v5102_v38 = vcombine.low %v9975_v51, %v9974_v23  ;;  %v8392_v51 = vcombine.low %v7761_v34, %v7761_v34 }
 0x3e5   : > { %v8363_v30 = vpop.permute.xlu1 %3467  ;;  %3696 = vrot.lane.b32.xlu0 %v8321_v52, %s5611_s29 }
 0x3e6   : > { %9970 = vst [vmem:[#allocation115_spill] sm:$0xff] %v8363_v30  ;;  %5397 = vmatmul.mubr.msk.bf16.gmra.mxu0 %vm1357_vm3, %v5102_v38  ;;  %v2945_v38 = vld [vmem:[#allocation3 + $0x4] sm:$0xf]  ;;  %vm4282_vm3 = vcmask 523264  }
 0x3e7   : > { %3801 = vrot.lane.b32.xlu1 %v7991_v3, %s5613_s8  ;;  %v8374_v4 = vpop.permute.xlu0 %3745  ;;  %v5161_v23 = vcombine.low %v2945_v38, %v5582_v25 }
 0x3e9   : > { %v3492_v30 = vpop.permute.xlu1 %3491  ;;  %3700 = vrot.lane.b32.xlu0 %v8370_v53, %s5611_s29 }
 0x3eb   : > { %3805 = vrot.lane.b32.xlu1 %v8002_v15, %s5613_s8  ;;  %v3784_v40 = vpop.permute.xlu0 %3783 }
 0x3ed   : > { %v8384_v37 = vpop.permute.xlu1 %3495  ;;  %3757 = vrot.lane.b32.xlu0 %v7779_v44, %s5612_s30 }
 0x3ef   : > { %3515 = vrot.lane.b32.xlu1 %v8345_v21, %s5607_s15  ;;  %v3788_v3 = vpop.permute.xlu0 %3787  ;;  %v2985_v21 = vld [vmem:[#allocation3 + $0xf4] sm:$0xf] }
 0x3f0   : > { %v8413_v38 = vcombine.low %v2985_v21, %v7795_v48 }
 0x3f1   : > { %v8394_v10 = vpop.permute.xlu1 %3564  ;;  %3807 = vrot.lane.b32.xlu0 %v7930_v0, %s5613_s8  ;;  %v3849_v0 = vsel %vm1438_vm4, %v5161_v23, %v8063_v9 }
 0x3f2   : > { %v3928_v23 = vsel %vm1568_vm6, %v3849_v0, %v8172_v43  ;;  %v3851_v43 = vsel %vm1438_vm4, %v5162_v41, %v8063_v9 }
 0x3f3   : > { %3519 = vrot.lane.b32.xlu1 %v8392_v51, %s5607_s15  ;;  %v8400_v58 = vpop.permute.xlu0 %3497  ;;  %v3992_v48 = vsel %vm1682_vm8, %v3928_v23, %v8306_v36 }
 0x3f5   : > { %v3603_v52 = vpop.permute.xlu1 %3602  ;;  %3811 = vrot.lane.b32.xlu0 %v7941_v31, %s5613_s8 }
 0x3f7   : > { %3576 = vrot.lane.b32.xlu1 %v7779_v44, %s5609_s21  ;;  %v8406_v34 = vpop.permute.xlu0 %3501  ;;  %v3854_v44 = vsel %vm1438_vm4, %v7983_v50, %v8163_v8  ;;  %v4056_v50 = vsel %vm1796_vm10, %v3992_v48, %v8325_v17 }
 0x3f9   : > { %v3607_v56 = vpop.permute.xlu1 %3606  ;;  %3521 = vrot.lane.b32.xlu0 %v8370_v53, %s5607_s15  ;;  %v3932_v53 = vsel %vm1568_vm6, %v3854_v44, %v8184_v19  ;;  %v4105_v19 = vsel %vm4103_vm15, %v4056_v50, %v8333_v13 }
 0x3fb   : > { %3626 = vrot.lane.b32.xlu1 %v8002_v15, %s5610_s26  ;;  %v8417_v25 = vpop.permute.xlu0 %3566  ;;  %v3996_v15 = vsel %vm1682_vm8, %v3932_v53, %v8314_v39  ;;  %v3930_v53 = vsel %vm1568_vm6, %v3851_v43, %v8247_v60  ;;  %v4170_v39 = vsel %vm4168_vm0, %v4105_v19, %v8353_v20 }
 0x3fc   : > { %v4059_v36 = vsel %vm1796_vm10, %v3996_v15, %v8394_v10  ;;  %v4235_v9 = vsel %vm4233_vm2, %v4170_v39, %v8374_v4  ;;  %v3994_v41 = vsel %vm1682_vm8, %v3930_v53, %v3492_v30  ;;  %v8464_v30 = vcombine.low %v7802_v26, %v7802_v26 }
 0x3fd   : > { %v3675_v62 = vpop.permute.xlu1 %3674  ;;  %3525 = vrot.lane.b32.xlu0 %v8413_v38, %s5607_s15  ;;  %v4284_v0 = vsel %vm4282_vm3, %v4235_v9, %v3784_v40  ;;  %v4109_v44 = vsel %vm4103_vm15, %v4059_v36, %v8341_v61  ;;  %v4057_v20 = vsel %vm1796_vm10, %v3994_v41, %v8325_v17  ;;  %v3856_v26 = vsel %vm1438_vm4, %v8067_v59, %v8163_v8  ;;  %v2989_v59 = vld [vmem:[#allocation3 + $0x10c] sm:$0xf] }
 0x3fe   : > { %v4347_v23 = vshrl.u32 %v4284_v0, 16  ;;  %v4107_v48 = vsel %vm4103_vm15, %v4057_v20, %v3603_v52  ;;  %v4174_v40 = vsel %vm4168_vm0, %v4109_v44, %v8361_v11  ;;  %v4350_v61 = vshll.u32 %v4284_v0, 16 }
 0x3ff   : > { %3630 = vrot.lane.b32.xlu1 %v8010_v24, %s5610_s26  ;;  %v8442_v21 = vpop.permute.xlu0 %3608  ;;  %v4172_v50 = vsel %vm4168_vm0, %v4107_v48, %v3675_v62  ;;  %v3934_v11 = vsel %vm1568_vm6, %v3856_v26, %v8255_v18  ;;  %v8499_v44 = vcombine.low %v2989_v59, %v7833_v27 }
 0x400   : > { %v3998_v62 = vsel %vm1682_vm8, %v3934_v11, %v8384_v37  ;;  %v4236_v36 = vsel %vm4233_vm2, %v4172_v50, %v8374_v4  ;;  %v4352_v8 = vrot.slane %v4350_v61, 4 }
 0x401   : > { %v3679_v13 = vpop.permute.xlu1 %3678  ;;  %3578 = vrot.lane.b32.xlu0 %v7816_v47, %s5609_s21 }
 0x403   : > { %3698 = vrot.lane.b32.xlu1 %v8392_v51, %s5611_s29  ;;  %v8458_v60 = vpop.permute.xlu0 %3612 }
 0x405   : > { %v3748_v15 = vpop.permute.xlu1 %3747  ;;  %3632 = vrot.lane.b32.xlu0 %v7941_v31, %s5610_s26  ;;  %v4349_v31 = vrot.slane %v4347_v23, 3 }
 0x406   : > { %v4238_v43 = vsel %vm4233_vm2, %v4174_v40, %v3748_v15 }
 0x407   : > { %v4288_v17 = vsel %vm4282_vm3, %v4238_v43, %v3788_v3  ;;  %3702 = vrot.lane.b32.xlu1 %v8464_v30, %s5611_s29  ;;  %v8479_v52 = vpop.permute.xlu0 %3680  ;;  %v4060_v3 = vsel %vm1796_vm10, %v3998_v62, %v8394_v10 }
 0x408   : > { %v4362_v53 = vshrl.u32 %v4288_v17, 16  ;;  %v4111_v18 = vsel %vm4103_vm15, %v4060_v3, %v3607_v56  ;;  %v4365_v9 = vshll.u32 %v4288_v17, 16  ;;  %v4353_v56 = vor.u32 %v4352_v8, %v4349_v31  ;;  %v5584_v8 = vld [vmem:[#allocation3 + $0xfc] sm:$0xf] }
 0x409   : > { %v3786_v19 = vpop.permute.xlu1 %3785  ;;  %3636 = vrot.lane.b32.xlu0 %v7952_v54, %s5610_s26  ;;  %v4176_v0 = vsel %vm4168_vm0, %v4111_v18, %v3679_v13  ;;  %v8523_v3 = vcombine.low %v5584_v8, %v5584_v8 }
 0x40a   : > { %v4286_v39 = vsel %vm4282_vm3, %v4236_v36, %v3786_v19  ;;  %v4239_v10 = vsel %vm4233_vm2, %v4176_v0, %v3748_v15  ;;  %v4364_v40 = vrot.slane %v4362_v53, 3 }
 0x40b   : > { %v4354_v41 = vshrl.u32 %v4286_v39, 16  ;;  %v4357_v37 = vshll.u32 %v4286_v39, 16  ;;  %3759 = vrot.lane.b32.xlu1 %v7816_v47, %s5612_s30  ;;  %v8495_v4 = vpop.permute.xlu0 %3684  ;;  %v4367_v47 = vrot.slane %v4365_v9, 4 }
 0x40d   : > { %v4356_v20 = vrot.slane %v4354_v41, 3  ;;  %v4359_v23 = vrot.slane %v4357_v37, 4  ;;  %v3790_v48 = vpop.permute.xlu1 %3789  ;;  %3704 = vrot.lane.b32.xlu0 %v8413_v38, %s5611_s29  ;;  %v4368_v31 = vor.u32 %v4367_v47, %v4364_v40  ;;  %v2993_v41 = vld [vmem:[#allocation3 + $0x124] sm:$0xf] }
 0x40e   : > { %v4290_v61 = vsel %vm4282_vm3, %v4239_v10, %v3790_v48  ;;  %v8543_v0 = vcombine.low %v2993_v41, %v7828_v45 }
 0x40f   : > { %v4360_v50 = vor.u32 %v4359_v23, %v4356_v20  ;;  %v4369_v43 = vshrl.u32 %v4290_v61, 16  ;;  %v4372_v13 = vshll.u32 %v4290_v61, 16  ;;  %3809 = vrot.lane.b32.xlu1 %v8010_v24, %s5613_s8  ;;  %v8507_v27 = vpop.permute.xlu0 %3749 }
 0x411   : > { %v4371_v15 = vrot.slane %v4369_v43, 3  ;;  %v4374_v26 = vrot.slane %v4372_v13, 4  ;;  %v3500_v17 = vpop.permute.xlu1 %3499  ;;  %3708 = vrot.lane.b32.xlu0 %v8499_v44, %s5611_s29  ;;  %v4361_v11 = vsel %vm1861_vm11, %v4353_v56, %v4360_v50  ;;  %v5585_v50 = vld [vmem:[#allocation3 + $0x114] sm:$0xf] }
 0x412   : > { %5430 = vmatprep.mubr.msk.bf16.mxu1 %vm4630_vm5, %v4361_v11  ;;  %v8592_v43 = vcombine.low %v5585_v50, %v5585_v50 }
 0x413   : > { %v4375_v62 = vor.u32 %v4374_v26, %v4371_v15  ;;  %3813 = vrot.lane.b32.xlu1 %v8018_v35, %s5613_s8  ;;  %v3792_v19 = vpop.permute.xlu0 %3791 }
 0x415   : > { %v8515_v36 = vpop.permute.xlu1 %3503  ;;  %3761 = vrot.lane.b32.xlu0 %v7812_v5, %s5612_s30  ;;  %v4376_v24 = vsel %vm1861_vm11, %v4368_v31, %v4375_v62 }
 0x416   : > { %5431 = vmatmul.mubr.msk.bf16.vlgmr.msra.gmra.mxu1 %vm4630_vm5, %v4376_v24 }
 0x417   : > { %3523 = vrot.lane.b32.xlu1 %v8464_v30, %s5607_s15  ;;  %v3796_v59 = vpop.permute.xlu0 %3795 }
 0x419   : > { %v3569_v53 = vpop.permute.xlu1 %3568  ;;  %3815 = vrot.lane.b32.xlu0 %v7952_v54, %s5613_s8  ;;  %v3859_v54 = vsel %vm1438_vm4, %v7994_v46, %v8083_v29 }
 0x41a   : > { %v3936_v20 = vsel %vm1568_vm6, %v3859_v54, %v8192_v32  ;;  %v2997_v54 = vld [vmem:[#allocation3 + $0x13c] sm:$0xf] }
 0x41b   : > { %3527 = vrot.lane.b32.xlu1 %v8523_v3, %s5607_s15  ;;  %v8529_v39 = vpop.permute.xlu0 %3505  ;;  %v4000_v46 = vsel %vm1682_vm8, %v3936_v20, %v8400_v58 }
 0x41c   : > { %v4062_v48 = vsel %vm1796_vm10, %v4000_v46, %v8417_v25 }
 0x41d   : > { %v3611_v18 = vpop.permute.xlu1 %3610  ;;  %3819 = vrot.lane.b32.xlu0 %v7963_v16, %s5613_s8  ;;  %v4113_v32 = vsel %vm4103_vm15, %v4062_v48, %v8442_v21  ;;  %v9976_v21 = vld [vmem:[#allocation88_spill] sm:$0xff]  ;;  %v5586_v48 = vld [vmem:[#allocation3 + $0x140] sm:$0xf] }
 0x41e   : > { %v4178_v56 = vsel %vm4168_vm0, %v4113_v32, %v8479_v52 }
 0x41f   : > { %3580 = vrot.lane.b32.xlu1 %v7812_v5, %s5609_s21  ;;  %v8535_v9 = vpop.permute.xlu0 %3509  ;;  %v3864_v5 = vsel %vm1438_vm4, %v8045_v49, %v8179_v7  ;;  %v3861_v49 = vsel %vm1438_vm4, %v8078_v12, %v8083_v29  ;;  %v4241_v40 = vsel %vm4233_vm2, %v4178_v56, %v8507_v27 }
 0x420   : > { %v3940_v23 = vsel %vm1568_vm6, %v3864_v5, %v8204_v14  ;;  %v4292_v61 = vsel %vm4282_vm3, %v4241_v40, %v3792_v19 }
 0x421   : > { %v3615_v37 = vpop.permute.xlu1 %3614  ;;  %3529 = vrot.lane.b32.xlu0 %v8499_v44, %s5607_s15  ;;  %v4377_v13 = vshrl.u32 %v4292_v61, 16 }
 0x423   : > { %3634 = vrot.lane.b32.xlu1 %v8018_v35, %s5610_s26  ;;  %v8547_v10 = vpop.permute.xlu0 %3570  ;;  %v4004_v35 = vsel %vm1682_vm8, %v3940_v23, %v8406_v34  ;;  %v3938_v34 = vsel %vm1568_vm6, %v3861_v49, %v8263_v6 }
 0x424   : > { %v4065_v14 = vsel %vm1796_vm10, %v4004_v35, %v3569_v53  ;;  %v4002_v12 = vsel %vm1682_vm8, %v3938_v34, %v3500_v17 }
 0x425   : > { %v3683_v45 = vpop.permute.xlu1 %3682  ;;  %3533 = vrot.lane.b32.xlu0 %v8543_v0, %s5607_s15  ;;  %v4117_v47 = vsel %vm4103_vm15, %v4065_v14, %v8458_v60  ;;  %v4063_v52 = vsel %vm1796_vm10, %v4002_v12, %v8417_v25  ;;  %v4380_v60 = vshll.u32 %v4292_v61, 16  ;;  %v3866_v25 = vsel %vm1438_vm4, %v8137_v33, %v8179_v7 }
 0x426   : > { %v4115_v15 = vsel %vm4103_vm15, %v4063_v52, %v3611_v18  ;;  %v4182_v17 = vsel %vm4168_vm0, %v4117_v47, %v8495_v4  ;;  %v3942_v4 = vsel %vm1568_vm6, %v3866_v25, %v8279_v22 }
 0x427   : > { %3638 = vrot.lane.b32.xlu1 %v8026_v55, %s5610_s26  ;;  %v8572_v58 = vpop.permute.xlu0 %3616  ;;  %v4180_v11 = vsel %vm4168_vm0, %v4115_v15, %v3683_v45  ;;  %v4006_v24 = vsel %vm1682_vm8, %v3942_v4, %v8515_v36  ;;  %v4382_v7 = vrot.slane %v4380_v60, 4  ;;  %v9978_v4 = vld [vmem:[#allocation92_spill] sm:$0xff] }
 0x428   : > { %v4242_v18 = vsel %vm4233_vm2, %v4180_v11, %v8507_v27  ;;  %v4066_v33 = vsel %vm1796_vm10, %v4006_v24, %v3569_v53  ;;  %v5587_v11 = vld [vmem:[#allocation3 + $0x12c] sm:$0xf] }
 0x429   : > { %v3687_v29 = vpop.permute.xlu1 %3686  ;;  %3582 = vrot.lane.b32.xlu0 %v9976_v21, %s5609_s21  ;;  %v4119_v22 = vsel %vm4103_vm15, %v4066_v33, %v3615_v37  ;;  %v8628_v37 = vcombine.low %v2997_v54, %v5586_v48  ;;  %v3874_v33 = vsel %vm1438_vm4, %v8170_v28, %v8188_v2  ;;  %v9983_v48 = vld [vmem:[#allocation58_spill] sm:$0xff] }
 0x42a   : > { %v4184_v27 = vsel %vm4168_vm0, %v4119_v22, %v3687_v29  ;;  %v9980_v22 = vld [vmem:[#allocation57_spill] sm:$0xff] }
 0x42b   : > { %3706 = vrot.lane.b32.xlu1 %v8523_v3, %s5611_s29  ;;  %v8588_v6 = vpop.permute.xlu0 %3620 }
 0x42d   : > { %v3752_v26 = vpop.permute.xlu1 %3751  ;;  %3640 = vrot.lane.b32.xlu0 %v7963_v16, %s5610_s26  ;;  %v4379_v16 = vrot.slane %v4377_v13, 3 }
 0x42e   : > { %v4244_v31 = vsel %vm4233_vm2, %v4182_v17, %v3752_v26  ;;  %v4245_v46 = vsel %vm4233_vm2, %v4184_v27, %v3752_v26 }
 0x42f   : > { %v4296_v62 = vsel %vm4282_vm3, %v4244_v31, %v3796_v59  ;;  %3710 = vrot.lane.b32.xlu1 %v8592_v43, %s5611_s29  ;;  %v8607_v19 = vpop.permute.xlu0 %3688  ;;  %v4383_v49 = vor.u32 %v4382_v7, %v4379_v16  ;;  %v8649_v31 = vcombine.low %v5587_v11, %v5587_v11  ;;  %v8660_v16 = vrot.slane %v9978_v4, 5 }
 0x430   : > { %v4392_v59 = vshrl.u32 %v4296_v62, 16  ;;  %v4395_v5 = vshll.u32 %v4296_v62, 16 }
 0x431   : > { %v3794_v8 = vpop.permute.xlu1 %3793  ;;  %3644 = vrot.lane.b32.xlu0 %v7974_v42, %s5610_s26 }
 0x432   : > { %v4294_v41 = vsel %vm4282_vm3, %v4242_v18, %v3794_v8  ;;  %v4394_v32 = vrot.slane %v4392_v59, 3  ;;  %v4397_v34 = vrot.slane %v4395_v5, 4  ;;  %v3001_v59 = vld [vmem:[#allocation3 + $0x154] sm:$0xf]  ;;  %v3948_v5 = vsel %vm1568_vm6, %v3874_v33, %v9980_v22 }
 0x433   : > { %v4384_v20 = vshrl.u32 %v4294_v41, 16  ;;  %v4387_v23 = vshll.u32 %v4294_v41, 16  ;;  %3763 = vrot.lane.b32.xlu1 %v9976_v21, %s5612_s30  ;;  %v8622_v36 = vpop.permute.xlu0 %3692  ;;  %v9979_v41 = vld [vmem:[#allocation54_spill] sm:$0xff] }
 0x434   : > { %v4398_v15 = vor.u32 %v4397_v34, %v4394_v32 }
 0x435   : > { %v4386_v45 = vrot.slane %v4384_v20, 3  ;;  %v4389_v53 = vrot.slane %v4387_v23, 4  ;;  %v3798_v35 = vpop.permute.xlu1 %3797  ;;  %3712 = vrot.lane.b32.xlu0 %v8543_v0, %s5611_s29  ;;  %v9981_v23 = vld [vmem:[#allocation96_spill] sm:$0xff] }
 0x436   : > { %v4298_v14 = vsel %vm4282_vm3, %v4245_v46, %v3798_v35  ;;  %v3871_v27 = vsel %vm1438_vm4, %v9981_v23, %v8094_v63  ;;  %v5588_v46 = vld [vmem:[#allocation3 + $0x158] sm:$0xf]  ;;  %v9982_v35 = vld [vmem:[#allocation79_spill] sm:$0xff] }
 0x437   : > { %v4390_v56 = vor.u32 %v4389_v53, %v4386_v45  ;;  %v4399_v40 = vshrl.u32 %v4298_v14, 16  ;;  %v4402_v12 = vshll.u32 %v4298_v14, 16  ;;  %3817 = vrot.lane.b32.xlu1 %v8026_v55, %s5613_s8  ;;  %v8633_v29 = vpop.permute.xlu0 %3753  ;;  %v9977_v55 = vld [vmem:[#allocation50_spill] sm:$0xff]  ;;  %v8695_v45 = vcombine.low %v3001_v59, %v5588_v46 }
 0x439   : > { %v4401_v21 = vrot.slane %v4399_v40, 3  ;;  %v4404_v61 = vrot.slane %v4402_v12, 4  ;;  %v3508_v47 = vpop.permute.xlu1 %3507  ;;  %3716 = vrot.lane.b32.xlu0 %v8628_v37, %s5611_s29  ;;  %v4391_v52 = vsel %vm1861_vm11, %v4383_v49, %v4390_v56  ;;  %v3946_v49 = vsel %vm1568_vm6, %v3871_v27, %v9983_v48  ;;  %v5589_v12 = vld [vmem:[#allocation3 + $0x144] sm:$0xf] }
 0x43a   : > { %5434 = vmatprep.mubr.msk.bf16.mxu1 %vm4630_vm5, %v4391_v52  ;;  %v4010_v14 = vsel %vm1682_vm8, %v3946_v49, %v3508_v47 }
 0x43b   : > { %v4405_v50 = vor.u32 %v4404_v61, %v4401_v21  ;;  %3821 = vrot.lane.b32.xlu1 %v8040_v57, %s5613_s8  ;;  %v3800_v13 = vpop.permute.xlu0 %3799  ;;  %v8723_v21 = vcombine.low %v5589_v12, %v5589_v12 }
 0x43d   : > { %v8641_v26 = vpop.permute.xlu1 %3511  ;;  %3765 = vrot.lane.b32.xlu0 %v9977_v55, %s5612_s30  ;;  %v4406_v17 = vsel %vm1861_vm11, %v4398_v15, %v4405_v50 }
 0x43e   : > { %5435 = vmatmul.mubr.msk.bf16.gmra.mxu1 %vm4630_vm5, %v4406_v17 }
 0x43f   : > { %3531 = vrot.lane.b32.xlu1 %v8592_v43, %s5607_s15  ;;  %v3804_v60 = vpop.permute.xlu0 %3803 }
 0x441   : > { %v8651_v25 = vpop.permute.xlu1 %3572  ;;  %3823 = vrot.lane.b32.xlu0 %v7974_v42, %s5613_s8  ;;  %v3869_v42 = vsel %vm1438_vm4, %v8105_v1, %v8094_v63 }
 0x442   : > { %v3944_v54 = vsel %vm1568_vm6, %v3869_v42, %v9979_v41 }
 0x443   : > { %3535 = vrot.lane.b32.xlu1 %v8649_v31, %s5607_s15  ;;  %v8657_v62 = vpop.permute.xlu0 %3513  ;;  %v4008_v20 = vsel %vm1682_vm8, %v3944_v54, %v8529_v39 }
 0x444   : > { %v4068_v28 = vsel %vm1796_vm10, %v4008_v20, %v8547_v10 }
 0x445   : > { %v3619_v24 = vpop.permute.xlu1 %3618  ;;  %3827 = vrot.lane.b32.xlu0 %v8660_v16, %s5613_s8  ;;  %v4121_v39 = vsel %vm4103_vm15, %v4068_v28, %v8572_v58 }
 0x446   : > { %v4186_v63 = vsel %vm4168_vm0, %v4121_v39, %v8607_v19  ;;  %v4069_v19 = vsel %vm1796_vm10, %v4010_v14, %v8547_v10  ;;  %v9985_v10 = vld [vmem:[#allocation63_spill] sm:$0xff] }
 0x447   : > { %3584 = vrot.lane.b32.xlu1 %v9977_v55, %s5609_s21  ;;  %v8666_v8 = vpop.permute.xlu0 %3517  ;;  %v4247_v32 = vsel %vm4233_vm2, %v4186_v63, %v8633_v29  ;;  %v4123_v47 = vsel %vm4103_vm15, %v4069_v19, %v3619_v24  ;;  %v3876_v17 = vsel %vm1438_vm4, %v9985_v10, %v8188_v2  ;;  %v9987_v2 = vld [vmem:[#allocation90_spill] sm:$0xff]  ;;  %v3005_v19 = vld [vmem:[#allocation3 + $0x16c] sm:$0xf] }
 0x448   : > { %v4300_v34 = vsel %vm4282_vm3, %v4247_v32, %v3800_v13 }
 0x449   : > { %v3623_v18 = vpop.permute.xlu1 %3622  ;;  %3469 = vrot.lane.b32.xlu0 %v8660_v16, %s5605_s11  ;;  %v4407_v61 = vshrl.u32 %v4300_v34, 16  ;;  %v4410_v13 = vshll.u32 %v4300_v34, 16 }
 0x44b   : > { %3642 = vrot.lane.b32.xlu1 %v8040_v57, %s5610_s26  ;;  %v8675_v7 = vpop.permute.xlu0 %3574  ;;  %v4012_v57 = vsel %vm1682_vm8, %v3948_v5, %v8535_v9  ;;  %v4409_v42 = vrot.slane %v4407_v61, 3  ;;  %v4412_v54 = vrot.slane %v4410_v13, 4 }
 0x44c   : > { %v4071_v53 = vsel %vm1796_vm10, %v4012_v57, %v8651_v25 }
 0x44d   : > { %v3691_v1 = vpop.permute.xlu1 %3690  ;;  %3537 = vrot.lane.b32.xlu0 %v8628_v37, %s5607_s15  ;;  %v4125_v56 = vsel %vm4103_vm15, %v4071_v53, %v8588_v6  ;;  %v9984_v6 = vld [vmem:[#allocation52_spill] sm:$0xff]  ;;  %v4413_v48 = vor.u32 %v4412_v54, %v4409_v42  ;;  %v5591_v42 = vld [vmem:[#allocation3 + $0x15c] sm:$0xf] }
 0x44e   : > { %v4190_v50 = vsel %vm4168_vm0, %v4125_v56, %v8622_v36  ;;  %v4188_v15 = vsel %vm4168_vm0, %v4123_v47, %v3691_v1  ;;  %v9986_v36 = vld [vmem:[#allocation93_spill] sm:$0xff]  ;;  %v5569_v1 = vld [vmem:[#allocation3 + $0x148] ss:$0 sps:$4 sm:$0xff]  }
 0x44f   : > { %3646 = vrot.lane.b32.xlu1 %v9982_v35, %s5610_s26  ;;  %v8703_v9 = vpop.permute.xlu0 %3624  ;;  %v3950_v24 = vsel %vm1568_vm6, %v3876_v17, %v9986_v36  ;;  %v4248_v41 = vsel %vm4233_vm2, %v4188_v15, %v8633_v29  ;;  %v3409_v63 = vrot.slane %v5569_v1, 5  ;;  %v9988_v36 = vld [vmem:[#allocation51_spill] sm:$0xff]  ;;  %v9991_v1 = vld [vmem:[#allocation56_spill] sm:$0xff] }
 0x450   : > { %v4014_v33 = vsel %vm1682_vm8, %v3950_v24, %v8641_v26 }
 0x451   : > { %v3695_v58 = vpop.permute.xlu1 %3694  ;;  %3541 = vrot.lane.b32.xlu0 %v8695_v45, %s5607_s15  ;;  %v4072_v22 = vsel %vm1796_vm10, %v4014_v33, %v8651_v25  ;;  %v8792_v33 = vcombine.low %v5591_v42, %v5591_v42 }
 0x452   : > { %v4127_v26 = vsel %vm4103_vm15, %v4072_v22, %v3623_v18 }
 0x453   : > { %3714 = vrot.lane.b32.xlu1 %v8649_v31, %s5611_s29  ;;  %v8719_v40 = vpop.permute.xlu0 %3628  ;;  %v4192_v27 = vsel %vm4168_vm0, %v4127_v26, %v3695_v58 }
 0x455   : > { %v3756_v52 = vpop.permute.xlu1 %3755  ;;  %3586 = vrot.lane.b32.xlu0 %v9984_v6, %s5609_s21 }
 0x456   : > { %v4250_v55 = vsel %vm4233_vm2, %v4190_v50, %v3756_v52  ;;  %v4251_v46 = vsel %vm4233_vm2, %v4192_v27, %v3756_v52  ;;  %v3410_v50 = vsel %vm878_vm1, %v8660_v16, %v3409_v63 }
 0x457   : > { %v4304_v11 = vsel %vm4282_vm3, %v4250_v55, %v3804_v60  ;;  %3718 = vrot.lane.b32.xlu1 %v8723_v21, %s5611_s29  ;;  %v8738_v4 = vpop.permute.xlu0 %3696  ;;  %v8749_v60 = vrot.slane %v9987_v2, 5  ;;  %v9989_v2 = vld [vmem:[#allocation53_spill] sm:$0xff] }
 0x458   : > { %v4422_v5 = vshrl.u32 %v4304_v11, 16  ;;  %v4425_v57 = vshll.u32 %v4304_v11, 16  ;;  %v8801_v54 = vrot.slane %v9989_v2, 5 }
 0x459   : > { %v3802_v59 = vpop.permute.xlu1 %3801  ;;  %3648 = vrot.lane.b32.xlu0 %v8660_v16, %s5610_s26 }
 0x45a   : > { %v4302_v20 = vsel %vm4282_vm3, %v4248_v41, %v3802_v59  ;;  %v4424_v18 = vrot.slane %v4422_v5, 3  ;;  %v4427_v32 = vrot.slane %v4425_v57, 4  ;;  %v5570_v5 = vld [vmem:[#allocation3 + $0x160] ss:$0 sps:$4 sm:$0xff]  }
 0x45b   : > { %v4414_v28 = vshrl.u32 %v4302_v20, 16  ;;  %v4417_v23 = vshll.u32 %v4302_v20, 16  ;;  %3767 = vrot.lane.b32.xlu1 %v9984_v6, %s5612_s30  ;;  %v8757_v29 = vpop.permute.xlu0 %3700  ;;  %v5590_v6 = vld [vmem:[#allocation3 + $0x170] sm:$0xf]  ;;  %v9990_v20 = vld [vmem:[#allocation81_spill] sm:$0xff] }
 0x45c   : > { %v8774_v13 = vcombine.low %v3005_v19, %v5590_v6  ;;  %v4428_v55 = vor.u32 %v4427_v32, %v4424_v18  ;;  %v3879_v26 = vsel %vm1438_vm4, %v9991_v1, %v9990_v20  ;;  %v3412_v32 = vrot.slane %v5570_v5, 5  ;;  %v9998_v1 = vld [vmem:[#allocation30_spill] sm:$0xff] }
 0x45d   : > { %v4416_v39 = vrot.slane %v4414_v28, 3  ;;  %v4419_v25 = vrot.slane %v4417_v23, 4  ;;  %v3806_v53 = vpop.permute.xlu1 %3805  ;;  %3652 = vrot.lane.b32.xlu0 %v8749_v60, %s5610_s26  ;;  %v9992_v28 = vld [vmem:[#allocation97_spill] sm:$0xff]  ;;  %v9993_v23 = vld [vmem:[#allocation26_spill] sm:$0xff] }
 0x45e   : > { %v4306_v49 = vsel %vm4282_vm3, %v4251_v46, %v3806_v53  ;;  %v3884_v27 = vsel %vm1438_vm4, %v9993_v23, %v9992_v28  ;;  %v9994_v46 = vld [vmem:[#allocation87_spill] sm:$0xff] }
 0x45f   : > { %v4420_v14 = vor.u32 %v4419_v25, %v4416_v39  ;;  %v4429_v34 = vshrl.u32 %v4306_v49, 16  ;;  %v4432_v56 = vshll.u32 %v4306_v49, 16  ;;  %3825 = vrot.lane.b32.xlu1 %v9982_v35, %s5613_s8  ;;  %v8766_v58 = vpop.permute.xlu0 %3757  ;;  %v3952_v39 = vsel %vm1568_vm6, %v3879_v26, %v9994_v46  ;;  %v9995_v25 = vld [vmem:[#allocation91_spill] sm:$0xff]  ;;  %v5592_v46 = vld [vmem:[#allocation3 + $0x174] sm:$0xf] }
 0x460   : > { %v3956_v53 = vsel %vm1568_vm6, %v3884_v27, %v9995_v25  ;;  %v9999_v23 = vld [vmem:[#allocation67_spill] sm:$0xff] }
 0x461   : > { %v4431_v12 = vrot.slane %v4429_v34, 3  ;;  %v4434_v61 = vrot.slane %v4432_v56, 4  ;;  %v3516_v47 = vpop.permute.xlu1 %3515  ;;  %3720 = vrot.lane.b32.xlu0 %v8695_v45, %s5611_s29  ;;  %v4421_v52 = vsel %vm1861_vm11, %v4413_v48, %v4420_v14  ;;  %v4016_v48 = vsel %vm1682_vm8, %v3952_v39, %v8657_v62  ;;  %v9996_v14 = vld [vmem:[#allocation36_spill] sm:$0xff] }
 0x462   : > { %5438 = vmatprep.mubr.msk.bf16.mxu1 %vm4630_vm5, %v4421_v52  ;;  %v4020_v49 = vsel %vm1682_vm8, %v3956_v53, %v8666_v8  ;;  %v4074_v63 = vsel %vm1796_vm10, %v4016_v48, %v8675_v7  ;;  %v3881_v34 = vsel %vm1438_vm4, %v9996_v14, %v9990_v20  ;;  %v8878_v39 = vcombine.low %v5592_v46, %v5592_v46 }
 0x463   : > { %v4435_v35 = vor.u32 %v4434_v61, %v4431_v12  ;;  %3829 = vrot.lane.b32.xlu1 %v3410_v50, %s5613_s8  ;;  %v3808_v15 = vpop.permute.xlu0 %3807  ;;  %v4129_v56 = vsel %vm4103_vm15, %v4074_v63, %v8703_v9  ;;  %v9997_v12 = vld [vmem:[#allocation95_spill] sm:$0xff] }
 0x464   : > { %v3954_v8 = vsel %vm1568_vm6, %v3881_v34, %v9997_v12  ;;  %v4194_v61 = vsel %vm4168_vm0, %v4129_v56, %v8738_v4 }
 0x465   : > { %v8777_v10 = vpop.permute.xlu1 %3519  ;;  %3724 = vrot.lane.b32.xlu0 %v8774_v13, %s5611_s29  ;;  %v4436_v17 = vsel %vm1861_vm11, %v4428_v55, %v4435_v35  ;;  %v4253_v52 = vsel %vm4233_vm2, %v4194_v61, %v8766_v58  ;;  %v4018_v6 = vsel %vm1682_vm8, %v3954_v8, %v3516_v47  ;;  %v8851_v55 = vsel %vm878_vm1, %v8749_v60, %v3412_v32 }
 0x466   : > { %5439 = vmatmul.mubr.msk.bf16.gmra.mxu1 %vm4630_vm5, %v4436_v17  ;;  %v4308_v9 = vsel %vm4282_vm3, %v4253_v52, %v3808_v15  ;;  %v4075_v47 = vsel %vm1796_vm10, %v4018_v6, %v8675_v7  ;;  %v3009_v17 = vld [vmem:[#allocation3 + $0x184] sm:$0xf]  ;;  %v3886_v7 = vsel %vm1438_vm4, %v9998_v1, %v9992_v28 }
 0x467   : > { %3471 = vrot.lane.b32.xlu1 %v3410_v50, %s5605_s11  ;;  %v3812_v16 = vpop.permute.xlu0 %3811  ;;  %v4437_v42 = vshrl.u32 %v4308_v9, 16  ;;  %v3958_v27 = vsel %vm1568_vm6, %v3886_v7, %v9999_v23  ;;  %v10000_v52 = vld [vmem:[#allocation78_spill] sm:$0xff] }
 0x468   : > { %v4022_v53 = vsel %vm1682_vm8, %v3958_v27, %v8777_v10  ;;  %v8890_v10 = vld [vmem:[#allocation3 + $0x18c] sm:$0xf] }
 0x469   : > { %v8784_v11 = vpop.permute.xlu1 %3576  ;;  %3769 = vrot.lane.b32.xlu0 %v9988_v36, %s5612_s30  ;;  %v4439_v25 = vrot.slane %v4437_v42, 3 }
 0x46a   : > { %v4077_v62 = vsel %vm1796_vm10, %v4020_v49, %v8784_v11 }
 0x46b   : > { %3539 = vrot.lane.b32.xlu1 %v8723_v21, %s5607_s15  ;;  %v8790_v24 = vpop.permute.xlu0 %3521 }
 0x46d   : > { %v3627_v59 = vpop.permute.xlu1 %3626  ;;  %3831 = vrot.lane.b32.xlu0 %v8749_v60, %s5613_s8 }
 0x46e   : > { %v4131_v15 = vsel %vm4103_vm15, %v4075_v47, %v3627_v59  ;;  %v5573_v47 = vld [vmem:[#allocation3 + $0x178] ss:$0 sps:$4 sm:$0xff]  }
 0x46f   : > { %3543 = vrot.lane.b32.xlu1 %v8792_v33, %s5607_s15  ;;  %v8798_v41 = vpop.permute.xlu0 %3525  ;;  %v3415_v1 = vrot.slane %v5573_v47, 5 }
 0x471   : > { %v3631_v22 = vpop.permute.xlu1 %3630  ;;  %3835 = vrot.lane.b32.xlu0 %v8801_v54, %s5613_s8 }
 0x473   : > { %3588 = vrot.lane.b32.xlu1 %v9988_v36, %s5609_s21  ;;  %v8810_v57 = vpop.permute.xlu0 %3578  ;;  %v3010_v36 = vld [vmem:[#allocation3 + $0x188] sm:$0xf] }
 0x475   : > { %v3699_v18 = vpop.permute.xlu1 %3698  ;;  %3473 = vrot.lane.b32.xlu0 %v8749_v60, %s5605_s11  ;;  %v4440_v60 = vshll.u32 %v4308_v9, 16  ;;  %v5227_v9 = vcombine.low %v3010_v36, %v8890_v10 }
 0x476   : > { %v4196_v5 = vsel %vm4168_vm0, %v4131_v15, %v3699_v18  ;;  %v4078_v18 = vsel %vm1796_vm10, %v4022_v53, %v8784_v11 }
 0x477   : > { %3650 = vrot.lane.b32.xlu1 %v3410_v50, %s5610_s26  ;;  %v8835_v19 = vpop.permute.xlu0 %3632  ;;  %v4133_v50 = vsel %vm4103_vm15, %v4077_v62, %v8719_v40  ;;  %v4442_v48 = vrot.slane %v4440_v60, 4  ;;  %v4135_v32 = vsel %vm4103_vm15, %v4078_v18, %v3631_v22  ;;  %v8918_v46 = vrot.slane %v5227_v9, 5 }
 0x478   : > { %v4198_v40 = vsel %vm4168_vm0, %v4133_v50, %v8757_v29  ;;  %v8874_v29 = vcombine.low %v3009_v17, %v3010_v36  ;;  %v8902_v17 = vpop.f32.mrf.mxu1 }
 0x479   : > { %v3703_v35 = vpop.permute.xlu1 %3702  ;;  %3477 = vrot.lane.b32.xlu0 %v8801_v54, %s5605_s11  ;;  %v4443_v22 = vor.u32 %v4442_v48, %v4439_v25  ;;  %v3014_v48 = vld [vmem:[#allocation3 + $0x1a0] sm:$0xf] }
 0x47a   : > { %v4200_v62 = vsel %vm4168_vm0, %v4135_v32, %v3703_v35  ;;  %v8914_v7 = vpop.f32.mrf.mxu1  ;;  %v3558_v32 = vshll.u32 %v5227_v9, 16 }
 0x47b   : > { %3654 = vrot.lane.b32.xlu1 %v8851_v55, %s5610_s26  ;;  %v8855_v4 = vpop.permute.xlu0 %3636 }
 0x47c   : > { %v8930_v18 = vpop.f32.mrf.mxu1 }
 0x47d   : > { %v3760_v2 = vpop.permute.xlu1 %3759  ;;  %3545 = vrot.lane.b32.xlu0 %v8774_v13, %s5607_s15 }
 0x47e   : > { %v4256_v20 = vsel %vm4233_vm2, %v4198_v40, %v3760_v2  ;;  %v4257_v12 = vsel %vm4233_vm2, %v4200_v62, %v3760_v2 }
 0x47f   : > { %v4312_v26 = vsel %vm4282_vm3, %v4256_v20, %v3812_v16  ;;  %3722 = vrot.lane.b32.xlu1 %v8792_v33, %s5611_s29  ;;  %v8872_v59 = vpop.permute.xlu0 %3704  ;;  %v4254_v16 = vsel %vm4233_vm2, %v4196_v5, %v8766_v58 }
 0x480   : > { %v4452_v49 = vshrl.u32 %v4312_v26, 16  ;;  %v4455_v14 = vshll.u32 %v4312_v26, 16 }
 0x481   : > { %v3810_v28 = vpop.permute.xlu1 %3809  ;;  %3549 = vrot.lane.b32.xlu0 %v8874_v29, %s5607_s15 }
 0x482   : > { %v4310_v63 = vsel %vm4282_vm3, %v4254_v16, %v3810_v28  ;;  %v4454_v6 = vrot.slane %v4452_v49, 3  ;;  %v4457_v42 = vrot.slane %v4455_v14, 4  ;;  %v8928_v28 = vsel %vm878_vm1, %v8801_v54, %v3415_v1  ;;  %v3013_v16 = vld [vmem:[#allocation3 + $0x19c] sm:$0xf] }
 0x483   : > { %v4444_v34 = vshrl.u32 %v4310_v63, 16  ;;  %v4447_v56 = vshll.u32 %v4310_v63, 16  ;;  %3726 = vrot.lane.b32.xlu1 %v8878_v39, %s5611_s29  ;;  %v8894_v58 = vpop.permute.xlu0 %3708  ;;  %v3555_v63 = vshrl.u32 %v5227_v9, 16  ;;  %v10002_v9 = vld [vmem:[#allocation103_spill] sm:$0xff] }
 0x484   : > { %v4458_v26 = vor.u32 %v4457_v42, %v4454_v6  ;;  %v10001_v6 = vld [vmem:[#allocation84_spill] sm:$0xff] }
 0x485   : > { %v4446_v11 = vrot.slane %v4444_v34, 3  ;;  %v4449_v8 = vrot.slane %v4447_v56, 4  ;;  %v3814_v61 = vpop.permute.xlu1 %3813  ;;  %3590 = vrot.lane.b32.xlu0 %v10000_v52, %s5609_s21  ;;  %v5229_v34 = vcombine.low %v3013_v16, %v3014_v48  ;;  %v8940_v56 = vpop.f32.mrf.mxu1  ;;  %v3557_v62 = vrot.slane %v3555_v63, 4 }
 0x486   : > { %v4314_v50 = vsel %vm4282_vm3, %v4257_v12, %v3814_v61  ;;  %v3560_v12 = vrot.slane %v3558_v32, 5 }
 0x487   : > { %v4450_v15 = vor.u32 %v4449_v8, %v4446_v11  ;;  %v4459_v35 = vshrl.u32 %v4314_v50, 16  ;;  %v4462_v40 = vshll.u32 %v4314_v50, 16  ;;  %3771 = vrot.lane.b32.xlu1 %v10000_v52, %s5612_s30  ;;  %v8906_v2 = vpop.permute.xlu0 %3761  ;;  %v8947_v8 = vpop.f32.mrf.mxu1  ;;  %v8953_v52 = vld [vmem:[#allocation3 + $0x1a4] sm:$0xf]  ;;  %v3889_v50 = vsel %vm1438_vm4, %v10002_v9, %v10001_v6 }
 0x488   : > { %v8968_v42 = vcombine.low %v3014_v48, %v8953_v52 }
 0x489   : > { %v4461_v60 = vrot.slane %v4459_v35, 3  ;;  %v4464_v5 = vrot.slane %v4462_v40, 4  ;;  %v8908_v20 = vpop.permute.xlu1 %3523  ;;  %3656 = vrot.lane.b32.xlu0 %v8801_v54, %s5610_s26  ;;  %v4451_v36 = vsel %vm1861_vm11, %v4443_v22, %v4450_v15  ;;  %v10003_v15 = vld [vmem:[#allocation98_spill] sm:$0xff]  ;;  %v10004_v35 = vld [vmem:[#allocation116_spill] sm:$0xff] }
 0x48a   : > { %5442 = vmatprep.mubr.msk.bf16.mxu1 %vm4630_vm5, %v4451_v36  ;;  %v3894_v40 = vsel %vm1438_vm4, %v10004_v35, %v10003_v15  ;;  %v10006_v36 = vld [vmem:[#allocation65_spill] sm:$0xff]  ;;  %v3780_v16 = vrot.slane %v8968_v42, 5 }
 0x48b   : > { %v4465_v23 = vor.u32 %v4464_v5, %v4461_v60  ;;  %3833 = vrot.lane.b32.xlu1 %v8851_v55, %s5613_s8  ;;  %v3816_v27 = vpop.permute.xlu0 %3815  ;;  %v10005_v60 = vld [vmem:[#allocation99_spill] sm:$0xff]  ;;  %v3964_v1 = vsel %vm1568_vm6, %v3894_v40, %v10006_v36 }
 0x48c   : > { %v3960_v5 = vsel %vm1568_vm6, %v3889_v50, %v10005_v60  ;;  %v4028_v48 = vsel %vm1682_vm8, %v3964_v1, %v8798_v41  ;;  %v10007_v41 = vld [vmem:[#allocation29_spill] sm:$0xff]  ;;  %v5576_v50 = vld [vmem:[#allocation3 + $0x190] ss:$0 sps:$4 sm:$0xff]  }
 0x48d   : > { %v8920_v25 = vpop.permute.xlu1 %3527  ;;  %3660 = vrot.lane.b32.xlu0 %v8918_v46, %s5610_s26  ;;  %v4466_v53 = vsel %vm1861_vm11, %v4458_v26, %v4465_v23  ;;  %v4024_v26 = vsel %vm1682_vm8, %v3960_v5, %v8790_v24  ;;  %v3891_v24 = vsel %vm1438_vm4, %v8392_v51, %v10001_v6 }
 0x48e   : > { %5443 = vmatmul.mubr.msk.bf16.gmra.mxu1 %vm4630_vm5, %v4466_v53  ;;  %v8983_v53 = vcombine.low %v8890_v10, %v8890_v10  ;;  %v4080_v63 = vsel %vm1796_vm10, %v4024_v26, %v8810_v57 }
 0x48f   : > { %3837 = vrot.lane.b32.xlu1 %v8928_v28, %s5613_s8  ;;  %v8934_v49 = vpop.permute.xlu0 %3819 }
 0x491   : > { %v8936_v14 = vpop.permute.xlu1 %3580  ;;  %3728 = vrot.lane.b32.xlu0 %v8874_v29, %s5611_s29  ;;  %v3561_v29 = vor.u32 %v3560_v12, %v3557_v62  ;;  %v3962_v12 = vsel %vm1568_vm6, %v3891_v24, %v10007_v41 }
 0x492   : > { %v4083_v10 = vsel %vm1796_vm10, %v4028_v48, %v8936_v14 }
 0x493   : > { %3475 = vrot.lane.b32.xlu1 %v8851_v55, %s5605_s11  ;;  %v8944_v54 = vpop.permute.xlu0 %3529  ;;  %v8958_v55 = vpop.f32.mrf.mxu1  ;;  %v4141_v40 = vsel %vm4103_vm15, %v4083_v10, %v8855_v4  ;;  %v3738_v10 = vshrl.u32 %v8968_v42, 16 }
 0x495   : > { %v3635_v11 = vpop.permute.xlu1 %3634  ;;  %3732 = vrot.lane.b32.xlu0 %v5229_v34, %s5611_s29  ;;  %v8990_v32 = vpop.f32.mrf.mxu1  ;;  %v4137_v34 = vsel %vm4103_vm15, %v4080_v63, %v8835_v19  ;;  %v4026_v19 = vsel %vm1682_vm8, %v3962_v12, %v8908_v20  ;;  %v3598_v20 = vrot.slane %v5576_v50, 5 }
 0x496   : > { %v4202_v9 = vsel %vm4168_vm0, %v4137_v34, %v8872_v59  ;;  %v4081_v5 = vsel %vm1796_vm10, %v4026_v19, %v8810_v57 }
 0x497   : > { %3479 = vrot.lane.b32.xlu1 %v8928_v28, %s5605_s11  ;;  %v8951_v61 = vpop.permute.xlu0 %3533  ;;  %v4259_v51 = vsel %vm4233_vm2, %v4202_v9, %v8906_v2  ;;  %v9017_v60 = vpop.f32.mrf.mxu1  ;;  %v4139_v1 = vsel %vm4103_vm15, %v4081_v5, %v3635_v11 }
 0x498   : > { %v4316_v35 = vsel %vm4282_vm3, %v4259_v51, %v3816_v27  ;;  %v4206_v27 = vsel %vm4168_vm0, %v4141_v40, %v8894_v58  ;;  %v10008_v58 = vld [vmem:[#allocation69_spill] sm:$0xff] }
 0x499   : > { %v8955_v22 = vpop.permute.xlu1 %3638  ;;  %3773 = vrot.lane.b32.xlu0 %v3561_v29, %s5612_s30  ;;  %v4467_v36 = vshrl.u32 %v4316_v35, 16  ;;  %v4470_v48 = vshll.u32 %v4316_v35, 16  ;;  %v9029_v24 = vpop.f32.mrf.mxu1 }
 0x49b   : > { %3547 = vrot.lane.b32.xlu1 %v8878_v39, %s5607_s15  ;;  %v8965_v47 = vpop.permute.xlu0 %3582  ;;  %v4469_v41 = vrot.slane %v4467_v36, 3  ;;  %v4472_v12 = vrot.slane %v4470_v48, 4  ;;  %v3740_v48 = vrot.slane %v3738_v10, 4 }
 0x49d   : > { %v3707_v23 = vpop.permute.xlu1 %3706  ;;  %3839 = vrot.lane.b32.xlu0 %v8918_v46, %s5613_s8 }
 0x49e   : > { %v4204_v4 = vsel %vm4168_vm0, %v4139_v1, %v3707_v23  ;;  %v3599_v23 = vsel %vm878_vm1, %v8918_v46, %v3598_v20  ;;  %v9053_v46 = vpop.f32.mrf.mxu1 }
 0x49f   : > { %3551 = vrot.lane.b32.xlu1 %v8983_v53, %s5607_s15  ;;  %v9001_v62 = vpop.permute.xlu0 %3640 }
 0x4a1   : > { %v3711_v6 = vpop.permute.xlu1 %3710  ;;  %3843 = vrot.lane.b32.xlu0 %v3780_v16, %s5613_s8 }
 0x4a3   : > { %3592 = vrot.lane.b32.xlu1 %v3561_v29, %s5609_s21  ;;  %v9020_v59 = vpop.permute.xlu0 %3644  ;;  %v3896_v29 = vsel %vm1438_vm4, %v8464_v30, %v10003_v15 }
 0x4a4   : > { %v3966_v34 = vsel %vm1568_vm6, %v3896_v29, %v10008_v58 }
 0x4a5   : > { %v3764_v26 = vpop.permute.xlu1 %3763  ;;  %v4030_v30 = vsel %vm1682_vm8, %v3966_v34, %v8920_v25 }
 0x4a6   : > { %v4262_v63 = vsel %vm4233_vm2, %v4206_v27, %v3764_v26  ;;  %v4084_v9 = vsel %vm1796_vm10, %v4030_v30, %v8936_v14  ;;  %v5230_v14 = vcombine.low %v8953_v52, %v8953_v52 }
 0x4a7   : > { %v4320_v57 = vsel %vm4282_vm3, %v4262_v63, %v8934_v49  ;;  %3658 = vrot.lane.b32.xlu1 %v8928_v28, %s5610_s26  ;;  %v9038_v11 = vpop.permute.xlu0 %3712  ;;  %v4260_v49 = vsel %vm4233_vm2, %v4204_v4, %v8906_v2  ;;  %v3741_v28 = vshll.u32 %v8968_v42, 16  ;;  %v4143_v19 = vsel %vm4103_vm15, %v4084_v9, %v8955_v22 }
 0x4a8   : > { %v4482_v50 = vshrl.u32 %v4320_v57, 16  ;;  %v4485_v35 = vshll.u32 %v4320_v57, 16  ;;  %v4208_v5 = vsel %vm4168_vm0, %v4143_v19, %v3711_v6  ;;  %v4473_v4 = vor.u32 %v4472_v12, %v4469_v41  ;;  %v9065_v57 = vpop.f32.mrf.mxu1 }
 0x4a9   : > { %v3818_v15 = vpop.permute.xlu1 %3817  ;;  %v4263_v20 = vsel %vm4233_vm2, %v4208_v5, %v3764_v26  ;;  %v3743_v29 = vrot.slane %v3741_v28, 5 }
 0x4aa   : > { %v4318_v51 = vsel %vm4282_vm3, %v4260_v49, %v3818_v15  ;;  %v4484_v22 = vrot.slane %v4482_v50, 3  ;;  %v4487_v58 = vrot.slane %v4485_v35, 4  ;;  %v9073_v41 = vpop.f32.mrf.mxu1 }
 0x4ab   : > { %v4474_v25 = vshrl.u32 %v4318_v51, 16  ;;  %v4477_v40 = vshll.u32 %v4318_v51, 16  ;;  %3662 = vrot.lane.b32.xlu1 %v3599_v23, %s5610_s26  ;;  %v9058_v2 = vpop.permute.xlu0 %3716  ;;  %v3744_v50 = vor.u32 %v3743_v29, %v3740_v48  ;;  %v5579_v51 = vld [vmem:[#allocation3 + $0x1a8] ss:$0 sps:$4 sm:$0xff]  }
 0x4ac   : > { %v4488_v28 = vor.u32 %v4487_v58, %v4484_v22  ;;  %v9078_v35 = vpop.f32.mrf.mxu1  ;;  %v10009_v29 = vld [vmem:[#allocation55_spill] sm:$0xff]  ;;  %v10010_v58 = vld [vmem:[#allocation28_spill] sm:$0xff] }
 0x4ad   : > { %v4476_v36 = vrot.slane %v4474_v25, 3  ;;  %v4479_v1 = vrot.slane %v4477_v40, 4  ;;  %v3822_v27 = vpop.permute.xlu1 %3821  ;;  %v3781_v40 = vrot.slane %v5579_v51, 5 }
 0x4ae   : > { %v4322_v63 = vsel %vm4282_vm3, %v4263_v20, %v3822_v27  ;;  %v9081_v20 = vpop.f32.mrf.mxu1 }
 0x4af   : > { %v4480_v34 = vor.u32 %v4479_v1, %v4476_v36  ;;  %v4489_v30 = vshrl.u32 %v4322_v63, 16  ;;  %v4492_v6 = vshll.u32 %v4322_v63, 16  ;;  %3730 = vrot.lane.b32.xlu1 %v8983_v53, %s5611_s29  ;;  %v9069_v52 = vpop.permute.xlu0 %3765  ;;  %v3782_v36 = vsel %vm878_vm1, %v3780_v16, %v3781_v40 }
 0x4b0   : > { %v9089_v27 = vpop.f32.mrf.mxu1 }
 0x4b1   : > { %v4491_v26 = vrot.slane %v4489_v30, 3  ;;  %v4494_v15 = vrot.slane %v4492_v6, 4  ;;  %v3532_v49 = vpop.permute.xlu1 %3531  ;;  %v4481_v10 = vsel %vm1861_vm11, %v4473_v4, %v4480_v34  ;;  %v10011_v34 = vld [vmem:[#allocation60_spill] sm:$0xff] }
 0x4b2   : > { %5446 = vmatprep.mubr.msk.bf16.mxu1 %vm4630_vm5, %v4481_v10  ;;  %v9094_v22 = vpop.f32.mrf.mxu1  ;;  %v3899_v30 = vsel %vm1438_vm4, %v8413_v38, %v10011_v34  ;;  %v10012_v10 = vld [vmem:[#allocation27_spill] sm:$0xff] }
 0x4b3   : > { %v4495_v12 = vor.u32 %v4494_v15, %v4491_v26  ;;  %3734 = vrot.lane.b32.xlu1 %v5230_v14, %s5611_s29  ;;  %v3824_v9 = vpop.permute.xlu0 %3823  ;;  %v3901_v15 = vsel %vm1438_vm4, %v8523_v3, %v10011_v34 }
 0x4b4   : > { %v9108_v26 = vpop.f32.mrf.mxu1 }
 0x4b5   : > { %v3536_v19 = vpop.permute.xlu1 %3535  ;;  %v4496_v53 = vsel %vm1861_vm11, %v4488_v28, %v4495_v12 }
 0x4b6   : > { %5447 = vmatmul.mubr.msk.bf16.gmra.mxu1 %vm4630_vm5, %v4496_v53 }
 0x4b7   : > { %3775 = vrot.lane.b32.xlu1 %v3744_v50, %s5612_s30  ;;  %v3828_v25 = vpop.permute.xlu0 %3827  ;;  %v10013_v50 = vld [vmem:[#allocation100_spill] sm:$0xff] }
 0x4b8   : > { %v3970_v51 = vsel %vm1568_vm6, %v3901_v15, %v10013_v50 }
 0x4b9   : > { %v3585_v5 = vpop.permute.xlu1 %3584  ;;  %v4034_v53 = vsel %vm1682_vm8, %v3970_v51, %v3532_v49 }
 0x4ba   : > { %v4087_v49 = vsel %vm1796_vm10, %v4034_v53, %v8965_v47 }
 0x4bb   : > { %3841 = vrot.lane.b32.xlu1 %v3599_v23, %s5613_s8  ;;  %v9084_v14 = vpop.permute.xlu0 %3469  ;;  %v3904_v23 = vsel %vm1438_vm4, %v8499_v44, %v10009_v29  ;;  %v3968_v44 = vsel %vm1568_vm6, %v3899_v30, %v10012_v10 }
 0x4bc   : > { %v3972_v42 = vsel %vm1568_vm6, %v3904_v23, %v10010_v58  ;;  %v4032_v38 = vsel %vm1682_vm8, %v3968_v44, %v8944_v54  ;;  %v9129_v23 = vpop.f32.mrf.mxu1  ;;  %v5390_v54 = vpop.f32.mrf.mxu0  ;;  %v3906_v44 = vsel %vm1438_vm4, %v8592_v43, %v10009_v29  ;;  %v9161_v43 = vld [vmem:[%s9465_s6] ss:$0 sm:$0xff] }
 0x4bd   : > { %v3643_v1 = vpop.permute.xlu1 %3642  ;;  %v4036_v6 = vsel %vm1682_vm8, %v3972_v42, %v8951_v61  ;;  %v4086_v61 = vsel %vm1796_vm10, %v4032_v38, %v8965_v47 }
 0x4be   : > { %v4089_v28 = vsel %vm1796_vm10, %v4036_v6, %v3585_v5  ;;  %v4145_v3 = vsel %vm4103_vm15, %v4086_v61, %v9001_v62  ;;  %v4147_v62 = vsel %vm4103_vm15, %v4087_v49, %v3643_v1  ;;  %v9145_v10 = vpop.f32.mrf.mxu1  ;;  %v10014_v1 = vld [vmem:[#allocation39_spill] sm:$0xff] }
 0x4bf   : > { %3845 = vrot.lane.b32.xlu1 %v3782_v36, %s5613_s8  ;;  %v9092_v48 = vpop.permute.xlu0 %3537  ;;  %v4149_v36 = vsel %vm4103_vm15, %v4089_v28, %v9020_v59  ;;  %v4210_v58 = vsel %vm4168_vm0, %v4145_v3, %v9038_v11  ;;  %v3974_v50 = vsel %vm1568_vm6, %v3906_v44, %v10014_v1 }
 0x4c0   : > { %v4265_v34 = vsel %vm4233_vm2, %v4210_v58, %v9069_v52  ;;  %v4214_v59 = vsel %vm4168_vm0, %v4149_v36, %v9058_v2  ;;  %v9165_v36 = vpop.f32.mrf.mxu1 }
 0x4c1   : > { %v3647_v4 = vpop.permute.xlu1 %3646  ;;  %v4324_v30 = vsel %vm4282_vm3, %v4265_v34, %v3824_v9  ;;  %v2548_v9 = vpop.f32.mrf.mxu0 }
 0x4c2   : > { %v4497_v51 = vshrl.u32 %v4324_v30, 16  ;;  %v4500_v2 = vshll.u32 %v4324_v30, 16 }
 0x4c3   : > { %v9096_v63 = vpop.permute.xlu0 %3541 }
 0x4c4   : > { %v4499_v30 = vrot.slane %v4497_v51, 3 }
 0x4c5   : > { %v3715_v16 = vpop.permute.xlu1 %3714 }
 0x4c6   : > { %v4212_v15 = vsel %vm4168_vm0, %v4147_v62, %v3715_v16  ;;  %v4038_v16 = vsel %vm1682_vm8, %v3974_v50, %v3536_v19  ;;  %v4502_v62 = vrot.slane %v4500_v2, 4 }
 0x4c7   : > { %v9116_v12 = vpop.permute.xlu0 %3586  ;;  %v4266_v61 = vsel %vm4233_vm2, %v4212_v15, %v9069_v52  ;;  %v5391_v52 = vpop.f32.mrf.mxu0 }
 0x4c9   : > { %v3719_v40 = vpop.permute.xlu1 %3718 }
 0x4cb   : > { %v9133_v42 = vpop.permute.xlu0 %3648 }
 0x4cd   : > { %v3768_v6 = vpop.permute.xlu1 %3767 }
 0x4ce   : > { %v4268_v11 = vsel %vm4233_vm2, %v4214_v59, %v3768_v6 }
 0x4cf   : > { %v4328_v47 = vsel %vm4282_vm3, %v4268_v11, %v3828_v25  ;;  %v9151_v28 = vpop.permute.xlu0 %3652  ;;  %v4090_v25 = vsel %vm1796_vm10, %v4038_v16, %v3585_v5  ;;  %v9174_v5 = vld [vmem:[%s9463_s4] ss:$0 sm:$0xff]  ;;  %v2549_v16 = vadd.f32 %v9161_v43, %v2548_v9 }
 0x4d0   : > { %v4512_v29 = vshrl.u32 %v4328_v47, 16  ;;  %v4515_v53 = vshll.u32 %v4328_v47, 16  ;;  %v4151_v58 = vsel %vm4103_vm15, %v4090_v25, %v3647_v4  ;;  %v2557_v47 = vadd.f32 %v5390_v54, %v9161_v43 }
 0x4d1   : > { %v3826_v38 = vpop.permute.xlu1 %3825  ;;  %v4216_v59 = vsel %vm4168_vm0, %v4151_v58, %v3719_v40  ;;  %v4503_v58 = vor.u32 %v4502_v62, %v4499_v30  ;;  %v2560_v54 = vadd.f32 %v5391_v52, %v9161_v43 }
 0x4d2   : > { %v4326_v3 = vsel %vm4282_vm3, %v4266_v61, %v3826_v38  ;;  %v4269_v15 = vsel %vm4233_vm2, %v4216_v59, %v3768_v6  ;;  %v4514_v1 = vrot.slane %v4512_v29, 3  ;;  %v4517_v50 = vrot.slane %v4515_v53, 4  ;;  %v2551_v6 = vpop.f32.mrf.mxu0 }
 0x4d3   : > { %v4504_v19 = vshrl.u32 %v4326_v3, 16  ;;  %v4507_v34 = vshll.u32 %v4326_v3, 16  ;;  %v9168_v49 = vpop.permute.xlu0 %3720  ;;  %v2552_v52 = vadd.f32 %v9161_v43, %v2551_v6 }
 0x4d4   : > { %v4518_v9 = vor.u32 %v4517_v50, %v4514_v1 }
 0x4d5   : > { %v4506_v11 = vrot.slane %v4504_v19, 3  ;;  %v4509_v44 = vrot.slane %v4507_v34, 4  ;;  %v3830_v4 = vpop.permute.xlu1 %3829 }
 0x4d6   : > { %v4330_v51 = vsel %vm4282_vm3, %v4269_v15, %v3830_v4  ;;  %v5432_v2 = vpop.f32.mrf.mxu1 }
 0x4d7   : > { %v4510_v40 = vor.u32 %v4509_v44, %v4506_v11  ;;  %v4519_v38 = vshrl.u32 %v4330_v51, 16  ;;  %v4522_v61 = vshll.u32 %v4330_v51, 16  ;;  %v4726_v25 = vadd.f32 %v5432_v2, %v9174_v5  ;;  %v9182_v3 = vpop.permute.xlu0 %3724 }
 0x4d8   : > { %v4717_v19 = vpop.f32.mrf.mxu1 }
 0x4d9   : > { %v4521_v29 = vrot.slane %v4519_v38, 3  ;;  %v4524_v53 = vrot.slane %v4522_v61, 4  ;;  %v4846_v34 = vadd.f32 %v4726_v25, %v2557_v47  ;;  %v4718_v59 = vadd.f32 %v9174_v5, %v4717_v19  ;;  %v9186_v15 = vpop.permute.xlu1 %3471 }
 0x4da   : > { %v5433_v11 = vpop.f32.mrf.mxu1  ;;  %v4511_v30 = vsel %vm1861_vm11, %v4503_v58, %v4510_v40 }
 0x4db   : > { %v4525_v62 = vor.u32 %v4524_v53, %v4521_v29  ;;  %v4878_v44 = vmax.f32 %v4846_v34, 0.0  ;;  %v4844_v4 = vadd.f32 %v4718_v59, %v2549_v16  ;;  %v4729_v47 = vadd.f32 %v5433_v11, %v9174_v5  ;;  %5450 = vmatprep.mubr.msk.bf16.mxu1 %vm4630_vm5, %v4511_v30  ;;  %v3770_v1 = vpop.permute.xlu0 %3769  ;;  %v10015_v11 = vld [vmem:[#allocation94_spill] sm:$0xff] }
 0x4dc   : > { %v4720_v50 = vpop.f32.mrf.mxu1  ;;  %v3909_v30 = vsel %vm1438_vm4, %v8543_v0, %v10015_v11  ;;  %v3911_v0 = vsel %vm1438_vm4, %v8649_v31, %v10015_v11 }
 0x4dd   : > { %4910 = vst.msk [vmem:[%s9191_s25 + $0x10] sm:$0xff] %vm1438_vm4, %v4878_v44  ;;  %v4876_v51 = vmax.f32 %v4844_v4, 0.0  ;;  %v4847_v2 = vadd.f32 %v4729_v47, %v2560_v54  ;;  %v4721_v40 = vadd.f32 %v9174_v5, %v4720_v50  ;;  %v3540_v38 = vpop.permute.xlu1 %3539  ;;  %v4526_v61 = vsel %vm1861_vm11, %v4518_v9, %v4525_v62  ;;  %v10017_v44 = vld [vmem:[#allocation59_spill] sm:$0xff] }
 0x4de   : > { %5451 = vmatmul.mubr.msk.bf16.gmra.mxu1 %vm4630_vm5, %v4526_v61  ;;  %v3976_v4 = vsel %vm1568_vm6, %v3909_v30, %v10017_v44 }
 0x4df   : > { %4908 = vst.msk [vmem:[%s9191_s25] sm:$0xff] %vm1438_vm4, %v4876_v51  ;;  %v4879_v16 = vmax.f32 %v4847_v2, 0.0  ;;  %v4845_v25 = vadd.f32 %v4721_v40, %v2552_v52  ;;  %v3832_v6 = vpop.permute.xlu0 %3831  ;;  %v10016_v52 = vld [vmem:[#allocation85_spill] sm:$0xff]  ;;  %v4040_v51 = vsel %vm1682_vm8, %v3976_v4, %v9092_v48 }
 0x4e0   : > { %v3914_v62 = vsel %vm1438_vm4, %v8628_v37, %v10016_v52  ;;  %v4092_v37 = vsel %vm1796_vm10, %v4040_v51, %v9116_v12 }
 0x4e1   : > { %4911 = vst.msk [vmem:[%s9191_s25 + $0x18] sm:$0xff] %vm1438_vm4, %v4879_v16  ;;  %v4877_v58 = vmax.f32 %v4845_v25, 0.0  ;;  %v3544_v19 = vpop.permute.xlu1 %3543  ;;  %v3980_v47 = vsel %vm1568_vm6, %v3914_v62, %v9084_v14  ;;  %v5394_v16 = vpop.f32.mrf.mxu0  ;;  %v10018_v14 = vld [vmem:[#allocation115_spill] sm:$0xff]  ;;  %v4153_v48 = vsel %vm4103_vm15, %v4092_v37, %v9133_v42  ;;  %v3916_v42 = vsel %vm1438_vm4, %v8723_v21, %v10016_v52 }
 0x4e2   : > { %v4044_v2 = vsel %vm1682_vm8, %v3980_v47, %v9096_v63  ;;  %v3978_v25 = vsel %vm1568_vm6, %v3911_v0, %v10018_v14  ;;  %v4218_v63 = vsel %vm4168_vm0, %v4153_v48, %v9168_v49  ;;  %v2573_v21 = vadd.f32 %v5394_v16, %v9161_v43 }
 0x4e3   : > { %4909 = vst.msk [vmem:[%s9191_s25 + $0x8] sm:$0xff] %vm1438_vm4, %v4877_v58  ;;  %v3836_v29 = vpop.permute.xlu0 %3835  ;;  %v4042_v58 = vsel %vm1682_vm8, %v3978_v25, %v3540_v38  ;;  %v4271_v31 = vsel %vm4233_vm2, %v4218_v63, %v3770_v1  ;;  %v2564_v44 = vpop.f32.mrf.mxu0 }
 0x4e4   : > { %v4332_v62 = vsel %vm4282_vm3, %v4271_v31, %v3832_v6  ;;  %v4093_v4 = vsel %vm1796_vm10, %v4042_v58, %v9116_v12  ;;  %v3982_v12 = vsel %vm1568_vm6, %v3916_v42, %v9186_v15  ;;  %v2565_v25 = vadd.f32 %v9161_v43, %v2564_v44 }
 0x4e5   : > { %v3589_v54 = vpop.permute.xlu1 %3588  ;;  %v5395_v37 = vpop.f32.mrf.mxu0 }
 0x4e6   : > { %v4095_v61 = vsel %vm1796_vm10, %v4044_v2, %v3589_v54  ;;  %v4527_v2 = vshrl.u32 %v4332_v62, 16 }
 0x4e7   : > { %v9208_v53 = vpop.permute.xlu0 %3473  ;;  %v4157_v11 = vsel %vm4103_vm15, %v4095_v61, %v9151_v28  ;;  %v4530_v28 = vshll.u32 %v4332_v62, 16  ;;  %v4046_v61 = vsel %vm1682_vm8, %v3982_v12, %v3544_v19 }
 0x4e8   : > { %v4222_v51 = vsel %vm4168_vm0, %v4157_v11, %v9182_v3  ;;  %v2567_v11 = vpop.f32.mrf.mxu0 }
 0x4e9   : > { %v3651_v34 = vpop.permute.xlu1 %3650  ;;  %v4532_v48 = vrot.slane %v4530_v28, 4  ;;  %v2568_v12 = vadd.f32 %v9161_v43, %v2567_v11 }
 0x4ea   : > { %v4155_v49 = vsel %vm4103_vm15, %v4093_v4, %v3651_v34  ;;  %v4096_v34 = vsel %vm1796_vm10, %v4046_v61, %v3589_v54 }
 0x4eb   : > { %v9210_v59 = vpop.permute.xlu0 %3477 }
 0x4ed   : > { %v3655_v9 = vpop.permute.xlu1 %3654 }
 0x4ee   : > { %v4159_v63 = vsel %vm4103_vm15, %v4096_v34, %v3655_v9 }
 0x4ef   : > { %v9226_v40 = vpop.permute.xlu0 %3545 }
 0x4f1   : > { %v3723_v50 = vpop.permute.xlu1 %3722 }
 0x4f2   : > { %v4220_v6 = vsel %vm4168_vm0, %v4155_v49, %v3723_v50  ;;  %v4529_v50 = vrot.slane %v4527_v2, 3 }
 0x4f3   : > { %v9247_v47 = vpop.permute.xlu0 %3549  ;;  %v4272_v3 = vsel %vm4233_vm2, %v4220_v6, %v3770_v1  ;;  %v2576_v6 = vadd.f32 %v5395_v37, %v9161_v43 }
 0x4f4   : > { %v4533_v28 = vor.u32 %v4532_v48, %v4529_v50 }
 0x4f5   : > { %v3727_v30 = vpop.permute.xlu1 %3726 }
 0x4f6   : > { %v4224_v16 = vsel %vm4168_vm0, %v4159_v63, %v3727_v30 }
 0x4f7   : > { %v9266_v58 = vpop.permute.xlu0 %3590 }
 0x4f9   : > { %v3772_v38 = vpop.permute.xlu1 %3771 }
 0x4fa   : > { %v4274_v0 = vsel %vm4233_vm2, %v4222_v51, %v3772_v38  ;;  %v4275_v1 = vsel %vm4233_vm2, %v4224_v16, %v3772_v38 }
 0x4fb   : > { %v4336_v52 = vsel %vm4282_vm3, %v4274_v0, %v3836_v29 }
 0x4fc   : > { %v4542_v62 = vshrl.u32 %v4336_v52, 16  ;;  %v4545_v44 = vshll.u32 %v4336_v52, 16 }
 0x4fd   : > { %v3834_v14 = vpop.permute.xlu1 %3833 }
 0x4fe   : > { %v4334_v15 = vsel %vm4282_vm3, %v4272_v3, %v3834_v14  ;;  %v5436_v19 = vpop.f32.mrf.mxu1  ;;  %v4544_v14 = vrot.slane %v4542_v62, 3  ;;  %v4547_v3 = vrot.slane %v4545_v44, 4 }
 0x4ff   : > { %v4534_v31 = vshrl.u32 %v4334_v15, 16  ;;  %v4537_v54 = vshll.u32 %v4334_v15, 16  ;;  %v4742_v29 = vadd.f32 %v5436_v19, %v9174_v5 }
 0x500   : > { %v4733_v4 = vpop.f32.mrf.mxu1  ;;  %v4548_v11 = vor.u32 %v4547_v3, %v4544_v14  ;;  %v10020_v3 = vld [vmem:[#allocation89_spill] sm:$0xff] }
 0x501   : > { %v4536_v42 = vrot.slane %v4534_v31, 3  ;;  %v4539_v49 = vrot.slane %v4537_v54, 4  ;;  %v4850_v9 = vadd.f32 %v4742_v29, %v2573_v21  ;;  %v4734_v51 = vadd.f32 %v9174_v5, %v4733_v4  ;;  %v3838_v2 = vpop.permute.xlu1 %3837  ;;  %v3657_v21 = vpop.permute.xlu0 %3656 }
 0x502   : > { %v4338_v30 = vsel %vm4282_vm3, %v4275_v1, %v3838_v2  ;;  %v5437_v0 = vpop.f32.mrf.mxu1 }
 0x503   : > { %v4540_v61 = vor.u32 %v4539_v49, %v4536_v42  ;;  %v4882_v38 = vmax.f32 %v4850_v9, 0.0  ;;  %v4848_v34 = vadd.f32 %v4734_v51, %v2565_v25  ;;  %v4549_v52 = vshrl.u32 %v4338_v30, 16 }
 0x504   : > { %v4552_v63 = vshll.u32 %v4338_v30, 16  ;;  %v4745_v15 = vadd.f32 %v5437_v0, %v9174_v5  ;;  %v4736_v19 = vpop.f32.mrf.mxu1  ;;  %v5398_v0 = vpop.f32.mrf.mxu0 }
 0x505   : > { %4914 = vst.msk [vmem:[%s9191_s25 + $0x30] sm:$0xff] %vm1438_vm4, %v4882_v38  ;;  %v4880_v50 = vmax.f32 %v4848_v34, 0.0  ;;  %v4551_v37 = vrot.slane %v4549_v52, 3  ;;  %v4737_v48 = vadd.f32 %v9174_v5, %v4736_v19  ;;  %v3476_v16 = vpop.permute.xlu1 %3475  ;;  %v4541_v25 = vsel %vm1861_vm11, %v4533_v28, %v4540_v61  ;;  %v3661_v42 = vpop.permute.xlu0 %3660  ;;  %v10019_v38 = vld [vmem:[#allocation61_spill] sm:$0xff] }
 0x506   : > { %v4554_v31 = vrot.slane %v4552_v63, 4  ;;  %v4851_v54 = vadd.f32 %v4745_v15, %v2576_v6  ;;  %5454 = vmatprep.mubr.msk.bf16.mxu1 %vm4630_vm5, %v4541_v25  ;;  %v3919_v34 = vsel %vm1438_vm4, %v8695_v45, %v10019_v38  ;;  %v2580_v14 = vpop.f32.mrf.mxu0  ;;  %v3924_v63 = vsel %vm1438_vm4, %v8774_v13, %v10020_v3 }
 0x507   : > { %4912 = vst.msk [vmem:[%s9191_s25 + $0x20] sm:$0xff] %vm1438_vm4, %v4880_v50  ;;  %v4849_v29 = vadd.f32 %v4737_v48, %v2568_v12  ;;  %v3984_v52 = vsel %vm1568_vm6, %v3919_v34, %v9208_v53  ;;  %v3988_v19 = vsel %vm1568_vm6, %v3924_v63, %v9210_v59  ;;  %v3921_v13 = vsel %vm1438_vm4, %v8792_v33, %v10019_v38 }
 0x508   : > { %v4555_v1 = vor.u32 %v4554_v31, %v4551_v37  ;;  %v4883_v62 = vmax.f32 %v4851_v54, 0.0  ;;  %v4048_v15 = vsel %vm1682_vm8, %v3984_v52, %v9226_v40  ;;  %v4052_v45 = vsel %vm1682_vm8, %v3988_v19, %v9247_v47  ;;  %v5399_v31 = vpop.f32.mrf.mxu0 }
 0x509   : > { %v4881_v44 = vmax.f32 %v4849_v29, 0.0  ;;  %v3480_v4 = vpop.permute.xlu1 %3479  ;;  %v3729_v51 = vpop.permute.xlu0 %3728  ;;  %v4098_v50 = vsel %vm1796_vm10, %v4048_v15, %v9266_v58  ;;  %v3986_v59 = vsel %vm1568_vm6, %v3921_v13, %v3476_v16  ;;  %v3926_v33 = vsel %vm1438_vm4, %v8878_v39, %v10020_v3 }
 0x50a   : > { %4915 = vst.msk [vmem:[%s9191_s25 + $0x38] sm:$0xff] %vm1438_vm4, %v4883_v62  ;;  %v4556_v49 = vsel %vm1861_vm11, %v4548_v11, %v4555_v1  ;;  %v4161_v53 = vsel %vm4103_vm15, %v4098_v50, %v3657_v21  ;;  %v2589_v21 = vadd.f32 %v5398_v0, %v9161_v43  ;;  %v2581_v16 = vadd.f32 %v9161_v43, %v2580_v14 }
 0x50b   : > { %4913 = vst.msk [vmem:[%s9191_s25 + $0x28] sm:$0xff] %vm1438_vm4, %v4881_v44  ;;  %5455 = vmatmul.mubr.msk.bf16.gmra.mxu1 %vm4630_vm5, %v4556_v49  ;;  %v4226_v25 = vsel %vm4168_vm0, %v4161_v53, %v3729_v51  ;;  %v2592_v49 = vadd.f32 %v5399_v31, %v9161_v43  ;;  %v2583_v51 = vpop.f32.mrf.mxu0 }
 0x50d   : > { %v3548_v9 = vpop.permute.xlu1 %3547  ;;  %v3733_v30 = vpop.permute.xlu0 %3732 }
 0x50e   : > { %v4050_v29 = vsel %vm1682_vm8, %v3986_v59, %v3548_v9  ;;  %v3990_v9 = vsel %vm1568_vm6, %v3926_v33, %v3480_v4 }
 0x50f   : > { %v4099_v0 = vsel %vm1796_vm10, %v4050_v29, %v9266_v58  ;;  %v2584_v58 = vadd.f32 %v9161_v43, %v2583_v51 }
 0x511   : > { %v3552_v2 = vpop.permute.xlu1 %3551  ;;  %v3774_v12 = vpop.permute.xlu0 %3773 }
 0x512   : > { %v4277_v54 = vsel %vm4233_vm2, %v4226_v25, %v3774_v12  ;;  %v4054_v19 = vsel %vm1682_vm8, %v3990_v9, %v3552_v2 }
 0x515   : > { %v3593_v28 = vpop.permute.xlu1 %3592  ;;  %v3840_v48 = vpop.permute.xlu0 %3839 }
 0x516   : > { %v4101_v40 = vsel %vm1796_vm10, %v4052_v45, %v3593_v28  ;;  %v4340_v47 = vsel %vm4282_vm3, %v4277_v54, %v3840_v48 }
 0x517   : > { %v4165_v1 = vsel %vm4103_vm15, %v4101_v40, %v3661_v42  ;;  %v4557_v38 = vshrl.u32 %v4340_v47, 16  ;;  %v4560_v34 = vshll.u32 %v4340_v47, 16 }
 0x518   : > { %v4230_v14 = vsel %vm4168_vm0, %v4165_v1, %v3733_v30  ;;  %v4102_v30 = vsel %vm1796_vm10, %v4054_v19, %v3593_v28 }
 0x519   : > { %v3659_v6 = vpop.permute.xlu1 %3658  ;;  %v3844_v52 = vpop.permute.xlu0 %3843  ;;  %v4559_v25 = vrot.slane %v4557_v38, 3  ;;  %v4562_v40 = vrot.slane %v4560_v34, 4 }
 0x51a   : > { %v4163_v63 = vsel %vm4103_vm15, %v4099_v0, %v3659_v6 }
 0x51b   : > { %v4563_v34 = vor.u32 %v4562_v40, %v4559_v25 }
 0x51d   : > { %v3663_v61 = vpop.permute.xlu1 %3662 }
 0x51e   : > { %v4167_v47 = vsel %vm4103_vm15, %v4102_v30, %v3663_v61 }
 0x521   : > { %v3731_v37 = vpop.permute.xlu1 %3730 }
 0x522   : > { %v4228_v4 = vsel %vm4168_vm0, %v4163_v63, %v3731_v37 }
 0x523   : > { %v4278_v29 = vsel %vm4233_vm2, %v4228_v4, %v3774_v12 }
 0x525   : > { %v3735_v11 = vpop.permute.xlu1 %3734 }
 0x526   : > { %v5440_v62 = vpop.f32.mrf.mxu1 }
 0x527   : > { %v4758_v44 = vadd.f32 %v5440_v62, %v9174_v5 }
 0x528   : > { %v4749_v42 = vpop.f32.mrf.mxu1 }
 0x529   : > { %v4854_v15 = vadd.f32 %v4758_v44, %v2589_v21  ;;  %v4750_v39 = vadd.f32 %v9174_v5, %v4749_v42  ;;  %v3776_v3 = vpop.permute.xlu1 %3775 }
 0x52a   : > { %v4280_v50 = vsel %vm4233_vm2, %v4230_v14, %v3776_v3  ;;  %v5441_v45 = vpop.f32.mrf.mxu1 }
 0x52b   : > { %v4886_v53 = vmax.f32 %v4854_v15, 0.0  ;;  %v4852_v48 = vadd.f32 %v4750_v39, %v2581_v16  ;;  %v4344_v6 = vsel %vm4282_vm3, %v4280_v50, %v3844_v52  ;;  %v4761_v13 = vadd.f32 %v5441_v45, %v9174_v5 }
 0x52c   : > { %v4752_v31 = vpop.f32.mrf.mxu1  ;;  %v4572_v21 = vshrl.u32 %v4344_v6, 16  ;;  %v4575_v1 = vshll.u32 %v4344_v6, 16  ;;  %v2605_v45 = vadd.f32 %v8902_v17, %v9161_v43  ;;  %v2600_v17 = vadd.f32 %v9161_v43, %v8940_v56 }
 0x52d   : > { %4918 = vst.msk [vmem:[%s9191_s25 + $0x50] sm:$0xff] %vm1438_vm4, %v4886_v53  ;;  %v4884_v2 = vmax.f32 %v4852_v48, 0.0  ;;  %v4855_v37 = vadd.f32 %v4761_v13, %v2592_v49  ;;  %v4753_v59 = vadd.f32 %v9174_v5, %v4752_v31  ;;  %v3842_v54 = vpop.permute.xlu1 %3841  ;;  %v4232_v49 = vsel %vm4168_vm0, %v4167_v47, %v3735_v11 }
 0x52e   : > { %v4342_v62 = vsel %vm4282_vm3, %v4278_v29, %v3842_v54  ;;  %v4281_v51 = vsel %vm4233_vm2, %v4232_v49, %v3776_v3  ;;  %v4574_v0 = vrot.slane %v4572_v21, 3  ;;  %v4577_v52 = vrot.slane %v4575_v1, 4 }
 0x52f   : > { %4916 = vst.msk [vmem:[%s9191_s25 + $0x40] sm:$0xff] %vm1438_vm4, %v4884_v2  ;;  %v4887_v28 = vmax.f32 %v4855_v37, 0.0  ;;  %v4853_v33 = vadd.f32 %v4753_v59, %v2584_v58  ;;  %v4564_v44 = vshrl.u32 %v4342_v62, 16  ;;  %v4567_v16 = vshll.u32 %v4342_v62, 16 }
 0x530   : > { %v4578_v19 = vor.u32 %v4577_v52, %v4574_v0  ;;  %v2597_v53 = vadd.f32 %v9161_v43, %v8914_v7  ;;  %v2608_v13 = vadd.f32 %v8930_v18, %v9161_v43  ;;  %v2621_v56 = vadd.f32 %v8947_v8, %v9161_v43 }
 0x531   : > { %4919 = vst.msk [vmem:[%s9191_s25 + $0x58] sm:$0xff] %vm1438_vm4, %v4887_v28  ;;  %v4885_v12 = vmax.f32 %v4853_v33, 0.0  ;;  %v4566_v9 = vrot.slane %v4564_v44, 3  ;;  %v4569_v61 = vrot.slane %v4567_v16, 4  ;;  %v3846_v38 = vpop.permute.xlu1 %3845  ;;  %v2613_v62 = vadd.f32 %v9161_v43, %v8958_v55 }
 0x532   : > { %v4346_v42 = vsel %vm4282_vm3, %v4281_v51, %v3846_v38  ;;  %v2624_v44 = vadd.f32 %v8990_v32, %v9161_v43  ;;  %v2616_v8 = vadd.f32 %v9161_v43, %v9017_v60  ;;  %v2637_v60 = vadd.f32 %v9029_v24, %v9161_v43 }
 0x533   : > { %4917 = vst.msk [vmem:[%s9191_s25 + $0x48] sm:$0xff] %vm1438_vm4, %v4885_v12  ;;  %v4570_v63 = vor.u32 %v4569_v61, %v4566_v9  ;;  %v4579_v15 = vshrl.u32 %v4346_v42, 16  ;;  %v4582_v39 = vshll.u32 %v4346_v42, 16  ;;  %v2632_v24 = vadd.f32 %v9161_v43, %v9073_v41 }
 0x535   : > { %v4581_v14 = vrot.slane %v4579_v15, 3  ;;  %v4584_v11 = vrot.slane %v4582_v39, 4  ;;  %v4571_v3 = vsel %vm1861_vm11, %v4563_v34, %v4570_v63  ;;  %v2629_v15 = vadd.f32 %v9161_v43, %v9053_v46 }
 0x536   : > { %5458 = vmatprep.mubr.msk.bf16.mxu1 %vm4630_vm5, %v4571_v3 }
 0x537   : > { %v4585_v4 = vor.u32 %v4584_v11, %v4581_v14  ;;  %v2640_v11 = vadd.f32 %v9065_v57, %v9161_v43 }
 0x539   : > { %v4586_v50 = vsel %vm1861_vm11, %v4578_v19, %v4585_v4 }
 0x53a   : > { %5459 = vmatmul.mubr.msk.bf16.gmra.mxu1 %vm4630_vm5, %v4586_v50 }
 0x54e   : > { %v5444_v58 = vpop.f32.mrf.mxu1 }
 0x54f   : > { %v4774_v48 = vadd.f32 %v5444_v58, %v9174_v5 }
 0x550   : > { %v4765_v6 = vpop.f32.mrf.mxu1 }
 0x551   : > { %v4858_v25 = vadd.f32 %v4774_v48, %v2605_v45  ;;  %v4766_v40 = vadd.f32 %v9174_v5, %v4765_v6 }
 0x552   : > { %v5445_v30 = vpop.f32.mrf.mxu1 }
 0x553   : > { %v4890_v31 = vmax.f32 %v4858_v25, 0.0  ;;  %v4856_v2 = vadd.f32 %v4766_v40, %v2597_v53  ;;  %v4777_v7 = vadd.f32 %v5445_v30, %v9174_v5  ;;  %v2653_v40 = vadd.f32 %v9078_v35, %v9161_v43 }
 0x554   : > { %v4768_v37 = vpop.f32.mrf.mxu1 }
 0x555   : > { %4922 = vst.msk [vmem:[%s9191_s25 + $0x70] sm:$0xff] %vm1438_vm4, %v4890_v31  ;;  %v4888_v59 = vmax.f32 %v4856_v2, 0.0  ;;  %v4859_v54 = vadd.f32 %v4777_v7, %v2608_v13  ;;  %v4769_v18 = vadd.f32 %v9174_v5, %v4768_v37  ;;  %v2645_v31 = vadd.f32 %v9161_v43, %v9081_v20 }
 0x557   : > { %4920 = vst.msk [vmem:[%s9191_s25 + $0x60] sm:$0xff] %vm1438_vm4, %v4888_v59  ;;  %v4891_v29 = vmax.f32 %v4859_v54, 0.0  ;;  %v4857_v47 = vadd.f32 %v4769_v18, %v2600_v17  ;;  %v2656_v59 = vadd.f32 %v9089_v27, %v9161_v43 }
 0x559   : > { %4923 = vst.msk [vmem:[%s9191_s25 + $0x78] sm:$0xff] %vm1438_vm4, %v4891_v29  ;;  %v4889_v21 = vmax.f32 %v4857_v47, 0.0  ;;  %v2648_v47 = vadd.f32 %v9161_v43, %v9094_v22  ;;  %v2669_v22 = vadd.f32 %v9108_v26, %v9161_v43 }
 0x55b   : > { %4921 = vst.msk [vmem:[%s9191_s25 + $0x68] sm:$0xff] %vm1438_vm4, %v4889_v21 }
 0x576   : > { %v5448_v1 = vpop.f32.mrf.mxu1 }
 0x577   : > { %v4790_v28 = vadd.f32 %v5448_v1, %v9174_v5 }
 0x578   : > { %v4781_v33 = vpop.f32.mrf.mxu1 }
 0x579   : > { %v4862_v16 = vadd.f32 %v4790_v28, %v2621_v56  ;;  %v4782_v49 = vadd.f32 %v9174_v5, %v4781_v33 }
 0x57a   : > { %v5449_v51 = vpop.f32.mrf.mxu1 }
 0x57b   : > { %v4894_v12 = vmax.f32 %v4862_v16, 0.0  ;;  %v4860_v9 = vadd.f32 %v4782_v49, %v2613_v62  ;;  %v4793_v55 = vadd.f32 %v5449_v51, %v9174_v5  ;;  %v2661_v16 = vadd.f32 %v9161_v43, %v9129_v23 }
 0x57c   : > { %v4784_v61 = vpop.f32.mrf.mxu1 }
 0x57d   : > { %4926 = vst.msk [vmem:[%s9191_s25 + $0x90] sm:$0xff] %vm1438_vm4, %v4894_v12  ;;  %v4892_v38 = vmax.f32 %v4860_v9, 0.0  ;;  %v4863_v34 = vadd.f32 %v4793_v55, %v2624_v44  ;;  %v4785_v32 = vadd.f32 %v9174_v5, %v4784_v61  ;;  %v2672_v12 = vadd.f32 %v9145_v10, %v9161_v43 }
 0x57f   : > { %4924 = vst.msk [vmem:[%s9191_s25 + $0x80] sm:$0xff] %vm1438_vm4, %v4892_v38  ;;  %v4895_v0 = vmax.f32 %v4863_v34, 0.0  ;;  %v4861_v42 = vadd.f32 %v4785_v32, %v2616_v8  ;;  %v2664_v38 = vadd.f32 %v9161_v43, %v9165_v36 }
 0x581   : > { %4927 = vst.msk [vmem:[%s9191_s25 + $0x98] sm:$0xff] %vm1438_vm4, %v4895_v0  ;;  %v4893_v52 = vmax.f32 %v4861_v42, 0.0 }
 0x583   : > { %4925 = vst.msk [vmem:[%s9191_s25 + $0x88] sm:$0xff] %vm1438_vm4, %v4893_v52 }
 0x59e   : > { %v5452_v63 = vpop.f32.mrf.mxu1 }
 0x59f   : > { %v4806_v39 = vadd.f32 %v5452_v63, %v9174_v5 }
 0x5a0   : > { %v4797_v14 = vpop.f32.mrf.mxu1 }
 0x5a1   : > { %v4866_v3 = vadd.f32 %v4806_v39, %v2637_v60  ;;  %v4798_v19 = vadd.f32 %v9174_v5, %v4797_v14 }
 0x5a2   : > { %v5453_v4 = vpop.f32.mrf.mxu1 }
 0x5a3   : > { %v4898_v50 = vmax.f32 %v4866_v3, 0.0  ;;  %v4864_v45 = vadd.f32 %v4798_v19, %v2629_v15  ;;  %v4809_v46 = vadd.f32 %v5453_v4, %v9174_v5 }
 0x5a4   : > { %v4800_v58 = vpop.f32.mrf.mxu1 }
 0x5a5   : > { %4930 = vst.msk [vmem:[%s9191_s25 + $0xb0] sm:$0xff] %vm1438_vm4, %v4898_v50  ;;  %v4896_v53 = vmax.f32 %v4864_v45, 0.0  ;;  %v4867_v48 = vadd.f32 %v4809_v46, %v2640_v11  ;;  %v4801_v57 = vadd.f32 %v9174_v5, %v4800_v58 }
 0x5a7   : > { %4928 = vst.msk [vmem:[%s9191_s25 + $0xa0] sm:$0xff] %vm1438_vm4, %v4896_v53  ;;  %v4899_v6 = vmax.f32 %v4867_v48, 0.0  ;;  %v4865_v13 = vadd.f32 %v4801_v57, %v2632_v24 }
 0x5a9   : > { %4931 = vst.msk [vmem:[%s9191_s25 + $0xb8] sm:$0xff] %vm1438_vm4, %v4899_v6  ;;  %v4897_v25 = vmax.f32 %v4865_v13, 0.0 }
 0x5ab   : > { %4929 = vst.msk [vmem:[%s9191_s25 + $0xa8] sm:$0xff] %vm1438_vm4, %v4897_v25 }
 0x5cb   : > { %v5456_v41 = vpop.f32.mrf.mxu1 }
 0x5cc   : > { %v4822_v30 = vadd.f32 %v5456_v41, %v9174_v5 }
 0x5cd   : > { %v4813_v17 = vpop.f32.mrf.mxu1 }
 0x5ce   : > { %v4870_v2 = vadd.f32 %v4822_v30, %v2653_v40  ;;  %v4814_v7 = vadd.f32 %v9174_v5, %v4813_v17 }
 0x5cf   : > { %v5457_v37 = vpop.f32.mrf.mxu1 }
 0x5d0   : > { %v4902_v54 = vmax.f32 %v4870_v2, 0.0  ;;  %v4868_v18 = vadd.f32 %v4814_v7, %v2645_v31  ;;  %v4825_v35 = vadd.f32 %v5457_v37, %v9174_v5 }
 0x5d1   : > { %v4816_v29 = vpop.f32.mrf.mxu1 }
 0x5d2   : > { %4934 = vst.msk [vmem:[%s9191_s25 + $0xd0] sm:$0xff] %vm1438_vm4, %v4902_v54  ;;  %v4900_v20 = vmax.f32 %v4868_v18, 0.0  ;;  %v4871_v21 = vadd.f32 %v4825_v35, %v2656_v59  ;;  %v4817_v56 = vadd.f32 %v9174_v5, %v4816_v29 }
 0x5d4   : > { %4932 = vst.msk [vmem:[%s9191_s25 + $0xc0] sm:$0xff] %vm1438_vm4, %v4900_v20  ;;  %v4903_v1 = vmax.f32 %v4871_v21, 0.0  ;;  %v4869_v62 = vadd.f32 %v4817_v56, %v2648_v47 }
 0x5d6   : > { %4935 = vst.msk [vmem:[%s9191_s25 + $0xd8] sm:$0xff] %vm1438_vm4, %v4903_v1  ;;  %v4901_v27 = vmax.f32 %v4869_v62, 0.0 }
 0x5d8   : > { %4933 = vst.msk [vmem:[%s9191_s25 + $0xc8] sm:$0xff] %vm1438_vm4, %v4901_v27 }
 0x5fa   : > { %v5460_v28 = vpop.f32.mrf.mxu1 }
 0x5fb   : > { %v4838_v33 = vadd.f32 %v5460_v28, %v9174_v5 }
 0x5fc   : > { %v4829_v44 = vpop.f32.mrf.mxu1 }
 0x5fd   : > { %v4874_v49 = vadd.f32 %v4838_v33, %v2669_v22  ;;  %v4830_v51 = vadd.f32 %v9174_v5, %v4829_v44 }
 0x5fe   : > { %v5461_v8 = vpop.f32.mrf.mxu1 }
 0x5ff   : > { %v4906_v9 = vmax.f32 %v4874_v49, 0.0  ;;  %v4872_v55 = vadd.f32 %v4830_v51, %v2661_v16  ;;  %v4841_v26 = vadd.f32 %v5461_v8, %v9174_v5 }
 0x600   : > { %v4832_v61 = vpop.f32.mrf.mxu1 }
 0x601   : > { %4938 = vst.msk [vmem:[%s9191_s25 + $0xf0] sm:$0xff] %vm1438_vm4, %v4906_v9  ;;  %v4904_v23 = vmax.f32 %v4872_v55, 0.0  ;;  %v4875_v34 = vadd.f32 %v4841_v26, %v2672_v12  ;;  %v4833_v32 = vadd.f32 %v9174_v5, %v4832_v61 }
 0x603   : > { %4936 = vst.msk [vmem:[%s9191_s25 + $0xe0] sm:$0xff] %vm1438_vm4, %v4904_v23  ;;  %v4907_v0 = vmax.f32 %v4875_v34, 0.0  ;;  %v4873_v42 = vadd.f32 %v4833_v32, %v2664_v38 }
 0x605   : > { %4939 = vst.msk [vmem:[%s9191_s25 + $0xf8] sm:$0xff] %vm1438_vm4, %v4907_v0  ;;  %v4905_v10 = vmax.f32 %v4873_v42, 0.0 }
 0x607   : > { %4937 = vst.msk [vmem:[%s9191_s25 + $0xe8] sm:$0xff] %vm1438_vm4, %v4905_v10 }
 0x608 PF: > { %s17_s24 = sadd.s32 1, %s5599_s24  }
 0x609   : > { %p14_p4 = scmp.ge.s32.totalorder %s17_s24, 4  }
 0x60b   :  { %16 = sbr.rel (!%p14_p4) target bundleno = 1 (0x1), region = 80 }

</bundles_post_ra>
